<compile_context>
chip_gen: v5e
topology: v5e:2x2
jax: 0.10.0
libtpu: 0.0.40
codegen_flags: <defaults>
</compile_context>

<pallas_src>
import functools
import math

import jax
import jax.numpy as jnp
from jax.experimental import pallas as pl
from jax.experimental.pallas import tpu as pltpu

LANE = 128
SUBLANE = 8
VMEM_LIMIT_BYTES = 32 * 1024 * 1024
# Flip to jnp.bfloat16 on v6e/v7x (pre-cast weights in prepare_encoder_params,
# keep preferred_element_type=f32) and loosen the validation tolerance.
MXU_COMPUTE_DTYPE = jnp.float32


def _round_up(x, m):
    return (x + m - 1) // m * m


# ----------------------------------------------------------------------------
# Pallas kernels
# ----------------------------------------------------------------------------
def _conv_s2_kernel(x_ref, w_ref, b_ref, o_ref, *, rows, wh, cdt):
    """4x4 / stride-2 / pad-1 conv + bias + ReLU, phase-decomposed.

    x_ref : (rows + guard, Kp)  flattened phase image (4*Cin channels padded to
            Kp lanes), rows ordered (n, oh, ow) over the (Hh, Wh) phase grid.
    w_ref : (4, Kp, Cop)        one matrix per 2x2 tap (dh, dw).
    """
    shifts = (0, 1, wh, wh + 1)
    acc = jnp.zeros((rows, o_ref.shape[1]), jnp.float32)
    for t, sh in enumerate(shifts):
        slab = x_ref[pl.ds(sh, rows), :]
        acc += jnp.dot(slab.astype(cdt), w_ref[t, :, :].astype(cdt),
                       preferred_element_type=jnp.float32)
    acc += b_ref[...]
    o_ref[...] = jnp.maximum(acc, 0.0).astype(o_ref.dtype)


def _conv3_res_stack_kernel(x_ref, m_ref, w3_ref, b3_ref, wr3_ref, wr1_ref,
                            o_ref, buf_ref, *, rows, guard, wp, layers, cdt):
    """Fused conv_3 (3x3,s1,p1,+bias) + residual stack + final ReLU.

    Everything is computed on the flattened zero-padded (N, Hp, Wp) grid:
    `rows` x 128 lanes.  Border / filler rows hold don't-care values; the
    interior mask zeroes them whenever they would feed a 3x3 tap, and the
    caller slices the interior at the end.  y never leaves VMEM.
    """
    f32 = jnp.float32
    shifts = tuple((kh - 1) * wp + (kw - 1) for kh in range(3) for kw in range(3))

    # ---- conv_3: 9 shifted slabs of the (already zero-padded, guarded) input.
    acc = jnp.zeros((rows, o_ref.shape[1]), f32)
    for t, sh in enumerate(shifts):
        slab = x_ref[pl.ds(guard + sh, rows), :]
        acc += jnp.dot(slab.astype(cdt), w3_ref[t, :, :].astype(cdt),
                       preferred_element_type=f32)
    y = acc + b3_ref[...]

    mask = m_ref[...]                         # (rows, 1): 1 on interior rows
    buf_ref[...] = jnp.zeros_like(buf_ref)    # guard rows stay zero forever

    # ---- residual stack: y += relu(conv3x3(relu(y))) @ W1, all in VMEM.
    for l in range(layers):
        branch = jnp.maximum(y, 0.0) * mask   # ReLU + spatial zero-padding
        buf_ref[pl.ds(guard, rows), :] = branch.astype(buf_ref.dtype)
        h = jnp.zeros((rows, wr3_ref.shape[2]), f32)
        for t, sh in enumerate(shifts):
            slab = buf_ref[pl.ds(guard + sh, rows), :]
            h += jnp.dot(slab.astype(cdt), wr3_ref[l * 9 + t, :, :].astype(cdt),
                         preferred_element_type=f32)
        h = jnp.maximum(h, 0.0)
        y = y + jnp.dot(h.astype(cdt), wr1_ref[l, :, :].astype(cdt),
                        preferred_element_type=f32)

    o_ref[...] = jnp.maximum(y, 0.0).astype(o_ref.dtype)   # stack's final ReLU


# ----------------------------------------------------------------------------
# pallas_call wrappers (single grid step: M is tiny at these shapes)
# ----------------------------------------------------------------------------
def _conv_s2_call(xflat, wcat, bias, *, rows, wh):
    total, kp = xflat.shape
    cop = wcat.shape[2]
    kernel = functools.partial(_conv_s2_kernel, rows=rows, wh=wh,
                               cdt=MXU_COMPUTE_DTYPE)
    return pl.pallas_call(
        kernel,
        out_shape=jax.ShapeDtypeStruct((rows, cop), jnp.float32),
        grid=(1,),
        in_specs=[
            pl.BlockSpec((total, kp), lambda i: (0, 0)),
            pl.BlockSpec(wcat.shape, lambda i: (0, 0, 0)),
            pl.BlockSpec((1, cop), lambda i: (0, 0)),
        ],
        out_specs=pl.BlockSpec((rows, cop), lambda i: (0, 0)),
        compiler_params=pltpu.CompilerParams(
            dimension_semantics=("arbitrary",),
            vmem_limit_bytes=VMEM_LIMIT_BYTES),
    )(xflat, wcat, bias)


def _conv3_res_stack_call(xg, mask, w3, b3, wr3, wr1, *, rows, guard, wp, layers):
    cop = w3.shape[2]
    kernel = functools.partial(_conv3_res_stack_kernel, rows=rows, guard=guard,
                               wp=wp, layers=layers, cdt=MXU_COMPUTE_DTYPE)
    return pl.pallas_call(
        kernel,
        out_shape=jax.ShapeDtypeStruct((rows, cop), jnp.float32),
        grid=(1,),
        in_specs=[
            pl.BlockSpec(xg.shape, lambda i: (0, 0)),
            pl.BlockSpec(mask.shape, lambda i: (0, 0)),
            pl.BlockSpec(w3.shape, lambda i: (0, 0, 0)),
            pl.BlockSpec(b3.shape, lambda i: (0, 0)),
            pl.BlockSpec(wr3.shape, lambda i: (0, 0, 0)),
            pl.BlockSpec(wr1.shape, lambda i: (0, 0, 0)),
        ],
        out_specs=pl.BlockSpec((rows, cop), lambda i: (0, 0)),
        scratch_shapes=[pltpu.VMEM((xg.shape[0], cop), jnp.float32)],
        compiler_params=pltpu.CompilerParams(
            dimension_semantics=("arbitrary",),
            vmem_limit_bytes=VMEM_LIMIT_BYTES),
    )(xg, mask, w3, b3, wr3, wr1)


# ----------------------------------------------------------------------------
# XLA glue (1x-traffic layout transforms) around the kernels
# ----------------------------------------------------------------------------
def conv_s2_layer(x_nhwc, cin, wcat, bias):
    """4x4/s2/p1 conv + ReLU.  Returns (N, H//2, W//2, Cop) with lane-padded
    channels (padded lanes exactly zero)."""
    n, h, w, _ = x_nhwc.shape
    assert h % 2 == 0 and w % 2 == 0, "even spatial size expected for s=2 conv"
    ho, wo = h // 2, w // 2
    hh, wh = ho + 1, wo + 1
    kp = wcat.shape[1]
    # zero-pad spatially, then 2x2 space-to-depth: the stride-2 4x4 conv becomes
    # a stride-1 2x2 conv over 4*cin phase channels.
    xp = jnp.pad(x_nhwc[..., :cin], ((0, 0), (1, 1), (1, 1), (0, 0)))
    xph = jnp.concatenate(
        [xp[:, ph::2, pw::2, :] for ph in range(2) for pw in range(2)], axis=-1)
    xph = jnp.pad(xph, ((0, 0), (0, 0), (0, 0), (0, kp - 4 * cin)))
    r = n * hh * wh
    r_pad = _round_up(r, SUBLANE)
    guard = _round_up(wh + 1, SUBLANE)        # covers the max tap shift Wh+1
    xflat = jnp.pad(xph.reshape(r, kp), ((0, (r_pad - r) + guard), (0, 0)))
    out = _conv_s2_call(xflat, wcat, bias, rows=r_pad, wh=wh)
    return out[:r].reshape(n, hh, wh, -1)[:, :ho, :wo, :]


def conv3_res_stack_layer(x_nhwc, prep, layers):
    """conv_3 + residual stack + final ReLU as ONE pallas_call."""
    n, h, w, cpad = x_nhwc.shape
    hp, wp = h + 2, w + 2
    xp = jnp.pad(x_nhwc, ((0, 0), (1, 1), (1, 1), (0, 0)))
    r = n * hp * wp
    r_pad = _round_up(r, SUBLANE)
    guard = _round_up(wp + 1, SUBLANE)        # covers max |tap shift| = Wp+1
    xg = jnp.pad(xp.reshape(r, cpad), ((guard, guard + (r_pad - r)), (0, 0)))
    # interior mask over the flattened padded grid (re-pads the residual convs)
    rows_idx = jnp.arange(r_pad)
    rem = rows_idx % (hp * wp)
    ii, jj = rem // wp, rem % wp
    interior = ((rows_idx < r) & (ii >= 1) & (ii <= hp - 2)
                & (jj >= 1) & (jj <= wp - 2))
    mask = interior.astype(jnp.float32)[:, None]
    out = _conv3_res_stack_call(xg, mask, prep["w3"], prep["b3"],
                                prep["wr3"], prep["wr1"],
                                rows=r_pad, guard=guard, wp=wp, layers=layers)
    return out[:r].reshape(n, hp, wp, -1)[:, 1:-1, 1:-1, :]


# ----------------------------------------------------------------------------
# Parameter construction / packing (done once, outside the hot path)
# ----------------------------------------------------------------------------
def init_conv(key, cout, cin, k, bias=True):
    """Deterministic init mimicking PyTorch Conv2d default U(+-1/sqrt(fan_in))."""
    k1, k2 = jax.random.split(key)
    fan_in = cin * k * k
    bound = 1.0 / math.sqrt(fan_in)
    w = jax.random.uniform(k1, (cout, cin, k, k), jnp.float32, -bound, bound)
    b = jax.random.uniform(k2, (cout,), jnp.float32, -bound, bound) if bias else None
    return w, b


def make_encoder_params(key, in_channels, num_hiddens, num_residual_layers,
                        num_residual_hiddens):
    keys = jax.random.split(key, 3 + 2 * max(num_residual_layers, 1))
    w1, b1 = init_conv(keys[0], num_hiddens // 2, in_channels, 4)
    w2, b2 = init_conv(keys[1], num_hiddens, num_hiddens // 2, 4)
    w3, b3 = init_conv(keys[2], num_hiddens, num_hiddens, 3)
    res = []
    for i in range(num_residual_layers):
        wr3, _ = init_conv(keys[3 + 2 * i], num_residual_hiddens, num_hiddens, 3,
                           bias=False)
        wr1, _ = init_conv(keys[4 + 2 * i], num_hiddens, num_residual_hiddens, 1,
                           bias=False)
        res.append((wr3, wr1))
    return dict(w1=w1, b1=b1, w2=w2, b2=b2, w3=w3, b3=b3, res=res)


def _pack_w_s2(w_oihw, kp, cop):
    """(O,I,4,4) -> (4, kp, cop): one (4*I -> O) matrix per 2x2 output tap
    (dh,dw) with the four stride-2 phases stacked along the contraction dim in
    (ph,pw) order; zero-padded to lane multiples."""
    o, i, _, _ = w_oihw.shape
    taps = []
    for dh in range(2):
        for dw in range(2):
            blocks = [w_oihw[:, :, 2 * dh + ph, 2 * dw + pw].T
                      for ph in range(2) for pw in range(2)]
            m = jnp.concatenate(blocks, axis=0)              # (4*I, O)
            taps.append(jnp.pad(m, ((0, kp - 4 * i), (0, cop - o))))
    return jnp.stack(taps, axis=0)


def _pack_w_3x3(w_oihw, kin_pad, kout_pad):
    """(O,I,3,3) -> (9, kin_pad, kout_pad); tap order kh*3+kw."""
    o, i, _, _ = w_oihw.shape
    taps = [jnp.pad(w_oihw[:, :, kh, kw].T, ((0, kin_pad - i), (0, kout_pad - o)))
            for kh in range(3) for kw in range(3)]
    return jnp.stack(taps, axis=0)


def _pack_w_1x1(w_oihw, kin_pad, kout_pad):
    o, i, _, _ = w_oihw.shape
    return jnp.pad(w_oihw[:, :, 0, 0].T, ((0, kin_pad - i), (0, kout_pad - o)))


def _pad_bias(b, n_pad):
    return jnp.pad(b, (0, n_pad - b.shape[0])).reshape(1, n_pad)


def prepare_encoder_params(params, in_channels):
    c1 = int(params["w1"].shape[0])
    c2 = int(params["w2"].shape[0])
    c3 = int(params["w3"].shape[0])
    cop1, cop2, cop3 = (_round_up(c, LANE) for c in (c1, c2, c3))
    kp1 = _round_up(4 * in_channels, LANE)
    kp2 = _round_up(4 * c1, LANE)
    res = params["res"]
    if res:
        rp = _round_up(int(res[0][0].shape[0]), LANE)
        wr3 = jnp.concatenate([_pack_w_3x3(w3l, cop3, rp) for (w3l, _) in res],
                              axis=0)                         # (L*9, cop3, rp)
        wr1 = jnp.stack([_pack_w_1x1(w1l, rp, cop3) for (_, w1l) in res],
                        axis=0)                               # (L, rp, cop3)
    else:
        rp = LANE
        wr3 = jnp.zeros((9, cop3, rp), jnp.float32)
        wr1 = jnp.zeros((1, rp, cop3), jnp.float32)
    prep = dict(
        w1=_pack_w_s2(params["w1"], kp1, cop1), b1=_pad_bias(params["b1"], cop1),
        w2=_pack_w_s2(params["w2"], kp2, cop2), b2=_pad_bias(params["b2"], cop2),
        w3=_pack_w_3x3(params["w3"], cop2, cop3), b3=_pad_bias(params["b3"], cop3),
        wr3=wr3, wr1=wr1,
    )
    return prep, (in_channels, c1, c2, c3)


# ----------------------------------------------------------------------------
# Encoder forward (Pallas hot path)
# ----------------------------------------------------------------------------
def encoder_forward(x_nchw, prep, *, dims, num_residual_layers):
    in_ch, c1, c2, c3 = dims
    x = jnp.transpose(x_nchw, (0, 2, 3, 1))                       # NHWC
    y = conv_s2_layer(x, in_ch, prep["w1"], prep["b1"])           # conv_1 + ReLU
    y = conv_s2_layer(y, c1, prep["w2"], prep["b2"])              # conv_2 + ReLU
    y = conv3_res_stack_layer(y, prep, num_residual_layers)       # conv_3 + stack
    return jnp.transpose(y[..., :c3], (0, 3, 1, 2))               # back to NCHW


# ----------------------------------------------------------------------------
# Pure-JAX reference (mirrors the PyTorch module exactly) for validation
# ----------------------------------------------------------------------------
def conv2d_ref(x, w, b, stride, pad):
    out = jax.lax.conv_general_dilated(
        x, w, (stride, stride), [(pad, pad), (pad, pad)],
        dimension_numbers=("NCHW", "OIHW", "NCHW"))
    if b is not None:
        out = out + b[None, :, None, None]
    return out


def encoder_ref(x, params, num_residual_layers):
    x = jax.nn.relu(conv2d_ref(x, params["w1"], params["b1"], 2, 1))
    x = jax.nn.relu(conv2d_ref(x, params["w2"], params["b2"], 2, 1))
    x = conv2d_ref(x, params["w3"], params["b3"], 1, 1)
    for i in range(num_residual_layers):
        wr3, wr1 = params["res"][i]
        h = jax.nn.relu(x)
        h = jax.nn.relu(conv2d_ref(h, wr3, None, 1, 1))
        h = conv2d_ref(h, wr1, None, 1, 0)
        x = x + h
    return jax.nn.relu(x)


if __name__ == "__main__":
    batch, in_channels, spatial = 2, 4, 16
    num_hiddens, num_residual_layers, num_residual_hiddens = 32, 2, 8

    key = jax.random.PRNGKey(0)
    k_x, k_p = jax.random.split(key)
    x = jax.random.normal(k_x, (batch, in_channels, spatial, spatial), jnp.float32)
    params = make_encoder_params(k_p, in_channels, num_hiddens,
                                 num_residual_layers, num_residual_hiddens)
    prep, dims = prepare_encoder_params(params, in_channels)

    fwd = jax.jit(functools.partial(encoder_forward, dims=dims,
                                    num_residual_layers=num_residual_layers))
    out = jax.block_until_ready(fwd(x, prep))

    ref = jax.block_until_ready(encoder_ref(x, params, num_residual_layers))
    assert out.shape == (batch, num_hiddens, spatial // 4, spatial // 4), out.shape
    max_err = float(jnp.max(jnp.abs(out - ref)))
    assert jnp.allclose(out, ref, rtol=2e-3, atol=2e-3), max_err

    print("KERNEL_OK")
</pallas_src>

<mosaic_0001>
module attributes {stable_mosaic.version = 11 : i64} {
  func.func @_conv_s2_kernel(%arg0: i32, %arg1: memref<184x128xf32, #tpu.memory_space<vmem>>, %arg2: memref<4x128x128xf32, #tpu.memory_space<vmem>>, %arg3: memref<1x128xf32, #tpu.memory_space<vmem>>, %arg4: memref<168x128xf32, #tpu.memory_space<vmem>>) attributes {dimension_semantics = [#tpu.dimension_semantics<arbitrary>], iteration_bounds = array<i64: 1>, scalar_prefetch = 0 : i64, scratch_operands = 0 : i64, tpu.core_type = #tpu.core_type<tc>, window_params = [{pipeline_mode = #tpu.pipeline_mode<synchronous>, transform_indices = @transform_0, window_bounds = array<i64: 184, 128>}, {pipeline_mode = #tpu.pipeline_mode<synchronous>, transform_indices = @transform_1, window_bounds = array<i64: 4, 128, 128>}, {pipeline_mode = #tpu.pipeline_mode<synchronous>, transform_indices = @transform_2, window_bounds = array<i64: 1, 128>}, {pipeline_mode = #tpu.pipeline_mode<synchronous>, transform_indices = @transform_3, window_bounds = array<i64: 168, 128>}]} {
    %cst = arith.constant 0.000000e+00 : f32
    %0 = vector.broadcast %cst : f32 to vector<168x128xf32>
    %c0 = arith.constant 0 : index
    %c0_0 = arith.constant 0 : index
    %1 = vector.load %arg1[%c0, %c0_0] : memref<184x128xf32, #tpu.memory_space<vmem>>, vector<168x128xf32>
    %c0_1 = arith.constant 0 : index
    %c0_2 = arith.constant 0 : index
    %c0_3 = arith.constant 0 : index
    %2 = vector.load %arg2[%c0_1, %c0_2, %c0_3] : memref<4x128x128xf32, #tpu.memory_space<vmem>>, vector<1x128x128xf32>
    %3 = vector.shape_cast %2 : vector<1x128x128xf32> to vector<128x128xf32>
    %cst_4 = arith.constant dense<0.000000e+00> : vector<168x128xf32>
    %4 = tpu.matmul %1, %3, %cst_4 {dimension_numbers = #tpu.dot_dimension_numbers<[1], [0], [0], [1], [0, 0, 1, 1], [], []>} : vector<168x128xf32>, vector<128x128xf32>, vector<168x128xf32> -> vector<168x128xf32>
    %5 = arith.addf %0, %4 : vector<168x128xf32>
    %c1 = arith.constant 1 : index
    %c0_5 = arith.constant 0 : index
    %6 = vector.load %arg1[%c1, %c0_5] : memref<184x128xf32, #tpu.memory_space<vmem>>, vector<168x128xf32>
    %c1_6 = arith.constant 1 : index
    %c0_7 = arith.constant 0 : index
    %c0_8 = arith.constant 0 : index
    %7 = vector.load %arg2[%c1_6, %c0_7, %c0_8] : memref<4x128x128xf32, #tpu.memory_space<vmem>>, vector<1x128x128xf32>
    %8 = vector.shape_cast %7 : vector<1x128x128xf32> to vector<128x128xf32>
    %cst_9 = arith.constant dense<0.000000e+00> : vector<168x128xf32>
    %9 = tpu.matmul %6, %8, %cst_9 {dimension_numbers = #tpu.dot_dimension_numbers<[1], [0], [0], [1], [0, 0, 1, 1], [], []>} : vector<168x128xf32>, vector<128x128xf32>, vector<168x128xf32> -> vector<168x128xf32>
    %10 = arith.addf %5, %9 : vector<168x128xf32>
    %c9 = arith.constant 9 : index
    %c0_10 = arith.constant 0 : index
    %11 = vector.load %arg1[%c9, %c0_10] : memref<184x128xf32, #tpu.memory_space<vmem>>, vector<168x128xf32>
    %c2 = arith.constant 2 : index
    %c0_11 = arith.constant 0 : index
    %c0_12 = arith.constant 0 : index
    %12 = vector.load %arg2[%c2, %c0_11, %c0_12] : memref<4x128x128xf32, #tpu.memory_space<vmem>>, vector<1x128x128xf32>
    %13 = vector.shape_cast %12 : vector<1x128x128xf32> to vector<128x128xf32>
    %cst_13 = arith.constant dense<0.000000e+00> : vector<168x128xf32>
    %14 = tpu.matmul %11, %13, %cst_13 {dimension_numbers = #tpu.dot_dimension_numbers<[1], [0], [0], [1], [0, 0, 1, 1], [], []>} : vector<168x128xf32>, vector<128x128xf32>, vector<168x128xf32> -> vector<168x128xf32>
    %15 = arith.addf %10, %14 : vector<168x128xf32>
    %c10 = arith.constant 10 : index
    %c0_14 = arith.constant 0 : index
    %16 = vector.load %arg1[%c10, %c0_14] : memref<184x128xf32, #tpu.memory_space<vmem>>, vector<168x128xf32>
    %c3 = arith.constant 3 : index
    %c0_15 = arith.constant 0 : index
    %c0_16 = arith.constant 0 : index
    %17 = vector.load %arg2[%c3, %c0_15, %c0_16] : memref<4x128x128xf32, #tpu.memory_space<vmem>>, vector<1x128x128xf32>
    %18 = vector.shape_cast %17 : vector<1x128x128xf32> to vector<128x128xf32>
    %cst_17 = arith.constant dense<0.000000e+00> : vector<168x128xf32>
    %19 = tpu.matmul %16, %18, %cst_17 {dimension_numbers = #tpu.dot_dimension_numbers<[1], [0], [0], [1], [0, 0, 1, 1], [], []>} : vector<168x128xf32>, vector<128x128xf32>, vector<168x128xf32> -> vector<168x128xf32>
    %20 = arith.addf %15, %19 : vector<168x128xf32>
    %c0_18 = arith.constant 0 : index
    %c0_19 = arith.constant 0 : index
    %21 = vector.load %arg3[%c0_18, %c0_19] : memref<1x128xf32, #tpu.memory_space<vmem>>, vector<1x128xf32>
    %22 = vector.broadcast %21 : vector<1x128xf32> to vector<168x128xf32>
    %23 = arith.addf %20, %22 : vector<168x128xf32>
    %cst_20 = arith.constant 0.000000e+00 : f32
    %24 = vector.broadcast %cst_20 : f32 to vector<168x128xf32>
    %25 = arith.maximumf %23, %24 : vector<168x128xf32>
    %c0_21 = arith.constant 0 : index
    %c0_22 = arith.constant 0 : index
    %26 = vector.load %arg4[%c0_21, %c0_22] : memref<168x128xf32, #tpu.memory_space<vmem>>, vector<168x128xf32>
    tpu.vector_store %arg4[%c0_21, %c0_22], %25 {strides = array<i32>} : memref<168x128xf32, #tpu.memory_space<vmem>>, vector<168x128xf32>,
    return
  }
  func.func @transform_0(%arg0: i32) -> (i32, i32) {
    %c0_i32 = arith.constant 0 : i32
    %c0_i32_0 = arith.constant 0 : i32
    %c0_i32_1 = arith.constant 0 : i32
    return %c0_i32, %c0_i32_0 : i32, i32
  }
  func.func @transform_1(%arg0: i32) -> (i32, i32, i32) {
    %c0_i32 = arith.constant 0 : i32
    %c0_i32_0 = arith.constant 0 : i32
    %c0_i32_1 = arith.constant 0 : i32
    %c0_i32_2 = arith.constant 0 : i32
    return %c0_i32, %c0_i32_0, %c0_i32_1 : i32, i32, i32
  }
  func.func @transform_2(%arg0: i32) -> (i32, i32) {
    %c0_i32 = arith.constant 0 : i32
    %c0_i32_0 = arith.constant 0 : i32
    %c0_i32_1 = arith.constant 0 : i32
    return %c0_i32, %c0_i32_0 : i32, i32
  }
  func.func @transform_3(%arg0: i32) -> (i32, i32) {
    %c0_i32 = arith.constant 0 : i32
    %c0_i32_0 = arith.constant 0 : i32
    %c0_i32_1 = arith.constant 0 : i32
    return %c0_i32, %c0_i32_0 : i32, i32
  }
}

module attributes {stable_mosaic.version = 11 : i64} {
  func.func @_conv_s2_kernel(%arg0: i32, %arg1: memref<64x128xf32, #tpu.memory_space<vmem>>, %arg2: memref<4x128x128xf32, #tpu.memory_space<vmem>>, %arg3: memref<1x128xf32, #tpu.memory_space<vmem>>, %arg4: memref<56x128xf32, #tpu.memory_space<vmem>>) attributes {dimension_semantics = [#tpu.dimension_semantics<arbitrary>], iteration_bounds = array<i64: 1>, scalar_prefetch = 0 : i64, scratch_operands = 0 : i64, tpu.core_type = #tpu.core_type<tc>, window_params = [{pipeline_mode = #tpu.pipeline_mode<synchronous>, transform_indices = @transform_0, window_bounds = array<i64: 64, 128>}, {pipeline_mode = #tpu.pipeline_mode<synchronous>, transform_indices = @transform_1, window_bounds = array<i64: 4, 128, 128>}, {pipeline_mode = #tpu.pipeline_mode<synchronous>, transform_indices = @transform_2, window_bounds = array<i64: 1, 128>}, {pipeline_mode = #tpu.pipeline_mode<synchronous>, transform_indices = @transform_3, window_bounds = array<i64: 56, 128>}]} {
    %cst = arith.constant 0.000000e+00 : f32
    %0 = vector.broadcast %cst : f32 to vector<56x128xf32>
    %c0 = arith.constant 0 : index
    %c0_0 = arith.constant 0 : index
    %1 = vector.load %arg1[%c0, %c0_0] : memref<64x128xf32, #tpu.memory_space<vmem>>, vector<56x128xf32>
    %c0_1 = arith.constant 0 : index
    %c0_2 = arith.constant 0 : index
    %c0_3 = arith.constant 0 : index
    %2 = vector.load %arg2[%c0_1, %c0_2, %c0_3] : memref<4x128x128xf32, #tpu.memory_space<vmem>>, vector<1x128x128xf32>
    %3 = vector.shape_cast %2 : vector<1x128x128xf32> to vector<128x128xf32>
    %cst_4 = arith.constant dense<0.000000e+00> : vector<56x128xf32>
    %4 = tpu.matmul %1, %3, %cst_4 {dimension_numbers = #tpu.dot_dimension_numbers<[1], [0], [0], [1], [0, 0, 1, 1], [], []>} : vector<56x128xf32>, vector<128x128xf32>, vector<56x128xf32> -> vector<56x128xf32>
    %5 = arith.addf %0, %4 : vector<56x128xf32>
    %c1 = arith.constant 1 : index
    %c0_5 = arith.constant 0 : index
    %6 = vector.load %arg1[%c1, %c0_5] : memref<64x128xf32, #tpu.memory_space<vmem>>, vector<56x128xf32>
    %c1_6 = arith.constant 1 : index
    %c0_7 = arith.constant 0 : index
    %c0_8 = arith.constant 0 : index
    %7 = vector.load %arg2[%c1_6, %c0_7, %c0_8] : memref<4x128x128xf32, #tpu.memory_space<vmem>>, vector<1x128x128xf32>
    %8 = vector.shape_cast %7 : vector<1x128x128xf32> to vector<128x128xf32>
    %cst_9 = arith.constant dense<0.000000e+00> : vector<56x128xf32>
    %9 = tpu.matmul %6, %8, %cst_9 {dimension_numbers = #tpu.dot_dimension_numbers<[1], [0], [0], [1], [0, 0, 1, 1], [], []>} : vector<56x128xf32>, vector<128x128xf32>, vector<56x128xf32> -> vector<56x128xf32>
    %10 = arith.addf %5, %9 : vector<56x128xf32>
    %c5 = arith.constant 5 : index
    %c0_10 = arith.constant 0 : index
    %11 = vector.load %arg1[%c5, %c0_10] : memref<64x128xf32, #tpu.memory_space<vmem>>, vector<56x128xf32>
    %c2 = arith.constant 2 : index
    %c0_11 = arith.constant 0 : index
    %c0_12 = arith.constant 0 : index
    %12 = vector.load %arg2[%c2, %c0_11, %c0_12] : memref<4x128x128xf32, #tpu.memory_space<vmem>>, vector<1x128x128xf32>
    %13 = vector.shape_cast %12 : vector<1x128x128xf32> to vector<128x128xf32>
    %cst_13 = arith.constant dense<0.000000e+00> : vector<56x128xf32>
    %14 = tpu.matmul %11, %13, %cst_13 {dimension_numbers = #tpu.dot_dimension_numbers<[1], [0], [0], [1], [0, 0, 1, 1], [], []>} : vector<56x128xf32>, vector<128x128xf32>, vector<56x128xf32> -> vector<56x128xf32>
    %15 = arith.addf %10, %14 : vector<56x128xf32>
    %c6 = arith.constant 6 : index
    %c0_14 = arith.constant 0 : index
    %16 = vector.load %arg1[%c6, %c0_14] : memref<64x128xf32, #tpu.memory_space<vmem>>, vector<56x128xf32>
    %c3 = arith.constant 3 : index
    %c0_15 = arith.constant 0 : index
    %c0_16 = arith.constant 0 : index
    %17 = vector.load %arg2[%c3, %c0_15, %c0_16] : memref<4x128x128xf32, #tpu.memory_space<vmem>>, vector<1x128x128xf32>
    %18 = vector.shape_cast %17 : vector<1x128x128xf32> to vector<128x128xf32>
    %cst_17 = arith.constant dense<0.000000e+00> : vector<56x128xf32>
    %19 = tpu.matmul %16, %18, %cst_17 {dimension_numbers = #tpu.dot_dimension_numbers<[1], [0], [0], [1], [0, 0, 1, 1], [], []>} : vector<56x128xf32>, vector<128x128xf32>, vector<56x128xf32> -> vector<56x128xf32>
    %20 = arith.addf %15, %19 : vector<56x128xf32>
    %c0_18 = arith.constant 0 : index
    %c0_19 = arith.constant 0 : index
    %21 = vector.load %arg3[%c0_18, %c0_19] : memref<1x128xf32, #tpu.memory_space<vmem>>, vector<1x128xf32>
    %22 = vector.broadcast %21 : vector<1x128xf32> to vector<56x128xf32>
    %23 = arith.addf %20, %22 : vector<56x128xf32>
    %cst_20 = arith.constant 0.000000e+00 : f32
    %24 = vector.broadcast %cst_20 : f32 to vector<56x128xf32>
    %25 = arith.maximumf %23, %24 : vector<56x128xf32>
    %c0_21 = arith.constant 0 : index
    %c0_22 = arith.constant 0 : index
    %26 = vector.load %arg4[%c0_21, %c0_22] : memref<56x128xf32, #tpu.memory_space<vmem>>, vector<56x128xf32>
    tpu.vector_store %arg4[%c0_21, %c0_22], %25 {strides = array<i32>} : memref<56x128xf32, #tpu.memory_space<vmem>>, vector<56x128xf32>,
    return
  }
  func.func @transform_0(%arg0: i32) -> (i32, i32) {
    %c0_i32 = arith.constant 0 : i32
    %c0_i32_0 = arith.constant 0 : i32
    %c0_i32_1 = arith.constant 0 : i32
    return %c0_i32, %c0_i32_0 : i32, i32
  }
  func.func @transform_1(%arg0: i32) -> (i32, i32, i32) {
    %c0_i32 = arith.constant 0 : i32
    %c0_i32_0 = arith.constant 0 : i32
    %c0_i32_1 = arith.constant 0 : i32
    %c0_i32_2 = arith.constant 0 : i32
    return %c0_i32, %c0_i32_0, %c0_i32_1 : i32, i32, i32
  }
  func.func @transform_2(%arg0: i32) -> (i32, i32) {
    %c0_i32 = arith.constant 0 : i32
    %c0_i32_0 = arith.constant 0 : i32
    %c0_i32_1 = arith.constant 0 : i32
    return %c0_i32, %c0_i32_0 : i32, i32
  }
  func.func @transform_3(%arg0: i32) -> (i32, i32) {
    %c0_i32 = arith.constant 0 : i32
    %c0_i32_0 = arith.constant 0 : i32
    %c0_i32_1 = arith.constant 0 : i32
    return %c0_i32, %c0_i32_0 : i32, i32
  }
}

module attributes {stable_mosaic.version = 11 : i64} {
  func.func @_conv3_res_stack_kernel(%arg0: i32, %arg1: memref<88x128xf32, #tpu.memory_space<vmem>>, %arg2: memref<72x1xf32, #tpu.memory_space<vmem>>, %arg3: memref<9x128x128xf32, #tpu.memory_space<vmem>>, %arg4: memref<1x128xf32, #tpu.memory_space<vmem>>, %arg5: memref<18x128x128xf32, #tpu.memory_space<vmem>>, %arg6: memref<2x128x128xf32, #tpu.memory_space<vmem>>, %arg7: memref<72x128xf32, #tpu.memory_space<vmem>>, %arg8: memref<88x128xf32, #tpu.memory_space<vmem>>) attributes {dimension_semantics = [#tpu.dimension_semantics<arbitrary>], iteration_bounds = array<i64: 1>, scalar_prefetch = 0 : i64, scratch_operands = 1 : i64, tpu.core_type = #tpu.core_type<tc>, window_params = [{pipeline_mode = #tpu.pipeline_mode<synchronous>, transform_indices = @transform_0, window_bounds = array<i64: 88, 128>}, {pipeline_mode = #tpu.pipeline_mode<synchronous>, transform_indices = @transform_1, window_bounds = array<i64: 72, 1>}, {pipeline_mode = #tpu.pipeline_mode<synchronous>, transform_indices = @transform_2, window_bounds = array<i64: 9, 128, 128>}, {pipeline_mode = #tpu.pipeline_mode<synchronous>, transform_indices = @transform_3, window_bounds = array<i64: 1, 128>}, {pipeline_mode = #tpu.pipeline_mode<synchronous>, transform_indices = @transform_4, window_bounds = array<i64: 18, 128, 128>}, {pipeline_mode = #tpu.pipeline_mode<synchronous>, transform_indices = @transform_5, window_bounds = array<i64: 2, 128, 128>}, {pipeline_mode = #tpu.pipeline_mode<synchronous>, transform_indices = @transform_6, window_bounds = array<i64: 72, 128>}]} {
    %cst = arith.constant 0.000000e+00 : f32
    %0 = vector.broadcast %cst : f32 to vector<72x128xf32>
    %c1 = arith.constant 1 : index
    %c0 = arith.constant 0 : index
    %1 = vector.load %arg1[%c1, %c0] : memref<88x128xf32, #tpu.memory_space<vmem>>, vector<72x128xf32>
    %c0_0 = arith.constant 0 : index
    %c0_1 = arith.constant 0 : index
    %c0_2 = arith.constant 0 : index
    %2 = vector.load %arg3[%c0_0, %c0_1, %c0_2] : memref<9x128x128xf32, #tpu.memory_space<vmem>>, vector<1x128x128xf32>
    %3 = vector.shape_cast %2 : vector<1x128x128xf32> to vector<128x128xf32>
    %cst_3 = arith.constant dense<0.000000e+00> : vector<72x128xf32>
    %4 = tpu.matmul %1, %3, %cst_3 {dimension_numbers = #tpu.dot_dimension_numbers<[1], [0], [0], [1], [0, 0, 1, 1], [], []>} : vector<72x128xf32>, vector<128x128xf32>, vector<72x128xf32> -> vector<72x128xf32>
    %5 = arith.addf %0, %4 : vector<72x128xf32>
    %c2 = arith.constant 2 : index
    %c0_4 = arith.constant 0 : index
    %6 = vector.load %arg1[%c2, %c0_4] : memref<88x128xf32, #tpu.memory_space<vmem>>, vector<72x128xf32>
    %c1_5 = arith.constant 1 : index
    %c0_6 = arith.constant 0 : index
    %c0_7 = arith.constant 0 : index
    %7 = vector.load %arg3[%c1_5, %c0_6, %c0_7] : memref<9x128x128xf32, #tpu.memory_space<vmem>>, vector<1x128x128xf32>
    %8 = vector.shape_cast %7 : vector<1x128x128xf32> to vector<128x128xf32>
    %cst_8 = arith.constant dense<0.000000e+00> : vector<72x128xf32>
    %9 = tpu.matmul %6, %8, %cst_8 {dimension_numbers = #tpu.dot_dimension_numbers<[1], [0], [0], [1], [0, 0, 1, 1], [], []>} : vector<72x128xf32>, vector<128x128xf32>, vector<72x128xf32> -> vector<72x128xf32>
    %10 = arith.addf %5, %9 : vector<72x128xf32>
    %c3 = arith.constant 3 : index
    %c0_9 = arith.constant 0 : index
    %11 = vector.load %arg1[%c3, %c0_9] : memref<88x128xf32, #tpu.memory_space<vmem>>, vector<72x128xf32>
    %c2_10 = arith.constant 2 : index
    %c0_11 = arith.constant 0 : index
    %c0_12 = arith.constant 0 : index
    %12 = vector.load %arg3[%c2_10, %c0_11, %c0_12] : memref<9x128x128xf32, #tpu.memory_space<vmem>>, vector<1x128x128xf32>
    %13 = vector.shape_cast %12 : vector<1x128x128xf32> to vector<128x128xf32>
    %cst_13 = arith.constant dense<0.000000e+00> : vector<72x128xf32>
    %14 = tpu.matmul %11, %13, %cst_13 {dimension_numbers = #tpu.dot_dimension_numbers<[1], [0], [0], [1], [0, 0, 1, 1], [], []>} : vector<72x128xf32>, vector<128x128xf32>, vector<72x128xf32> -> vector<72x128xf32>
    %15 = arith.addf %10, %14 : vector<72x128xf32>
    %c7 = arith.constant 7 : index
    %c0_14 = arith.constant 0 : index
    %16 = vector.load %arg1[%c7, %c0_14] : memref<88x128xf32, #tpu.memory_space<vmem>>, vector<72x128xf32>
    %c3_15 = arith.constant 3 : index
    %c0_16 = arith.constant 0 : index
    %c0_17 = arith.constant 0 : index
    %17 = vector.load %arg3[%c3_15, %c0_16, %c0_17] : memref<9x128x128xf32, #tpu.memory_space<vmem>>, vector<1x128x128xf32>
    %18 = vector.shape_cast %17 : vector<1x128x128xf32> to vector<128x128xf32>
    %cst_18 = arith.constant dense<0.000000e+00> : vector<72x128xf32>
    %19 = tpu.matmul %16, %18, %cst_18 {dimension_numbers = #tpu.dot_dimension_numbers<[1], [0], [0], [1], [0, 0, 1, 1], [], []>} : vector<72x128xf32>, vector<128x128xf32>, vector<72x128xf32> -> vector<72x128xf32>
    %20 = arith.addf %15, %19 : vector<72x128xf32>
    %c8 = arith.constant 8 : index
    %c0_19 = arith.constant 0 : index
    %21 = vector.load %arg1[%c8, %c0_19] : memref<88x128xf32, #tpu.memory_space<vmem>>, vector<72x128xf32>
    %c4 = arith.constant 4 : index
    %c0_20 = arith.constant 0 : index
    %c0_21 = arith.constant 0 : index
    %22 = vector.load %arg3[%c4, %c0_20, %c0_21] : memref<9x128x128xf32, #tpu.memory_space<vmem>>, vector<1x128x128xf32>
    %23 = vector.shape_cast %22 : vector<1x128x128xf32> to vector<128x128xf32>
    %cst_22 = arith.constant dense<0.000000e+00> : vector<72x128xf32>
    %24 = tpu.matmul %21, %23, %cst_22 {dimension_numbers = #tpu.dot_dimension_numbers<[1], [0], [0], [1], [0, 0, 1, 1], [], []>} : vector<72x128xf32>, vector<128x128xf32>, vector<72x128xf32> -> vector<72x128xf32>
    %25 = arith.addf %20, %24 : vector<72x128xf32>
    %c9 = arith.constant 9 : index
    %c0_23 = arith.constant 0 : index
    %26 = vector.load %arg1[%c9, %c0_23] : memref<88x128xf32, #tpu.memory_space<vmem>>, vector<72x128xf32>
    %c5 = arith.constant 5 : index
    %c0_24 = arith.constant 0 : index
    %c0_25 = arith.constant 0 : index
    %27 = vector.load %arg3[%c5, %c0_24, %c0_25] : memref<9x128x128xf32, #tpu.memory_space<vmem>>, vector<1x128x128xf32>
    %28 = vector.shape_cast %27 : vector<1x128x128xf32> to vector<128x128xf32>
    %cst_26 = arith.constant dense<0.000000e+00> : vector<72x128xf32>
    %29 = tpu.matmul %26, %28, %cst_26 {dimension_numbers = #tpu.dot_dimension_numbers<[1], [0], [0], [1], [0, 0, 1, 1], [], []>} : vector<72x128xf32>, vector<128x128xf32>, vector<72x128xf32> -> vector<72x128xf32>
    %30 = arith.addf %25, %29 : vector<72x128xf32>
    %c13 = arith.constant 13 : index
    %c0_27 = arith.constant 0 : index
    %31 = vector.load %arg1[%c13, %c0_27] : memref<88x128xf32, #tpu.memory_space<vmem>>, vector<72x128xf32>
    %c6 = arith.constant 6 : index
    %c0_28 = arith.constant 0 : index
    %c0_29 = arith.constant 0 : index
    %32 = vector.load %arg3[%c6, %c0_28, %c0_29] : memref<9x128x128xf32, #tpu.memory_space<vmem>>, vector<1x128x128xf32>
    %33 = vector.shape_cast %32 : vector<1x128x128xf32> to vector<128x128xf32>
    %cst_30 = arith.constant dense<0.000000e+00> : vector<72x128xf32>
    %34 = tpu.matmul %31, %33, %cst_30 {dimension_numbers = #tpu.dot_dimension_numbers<[1], [0], [0], [1], [0, 0, 1, 1], [], []>} : vector<72x128xf32>, vector<128x128xf32>, vector<72x128xf32> -> vector<72x128xf32>
    %35 = arith.addf %30, %34 : vector<72x128xf32>
    %c14 = arith.constant 14 : index
    %c0_31 = arith.constant 0 : index
    %36 = vector.load %arg1[%c14, %c0_31] : memref<88x128xf32, #tpu.memory_space<vmem>>, vector<72x128xf32>
    %c7_32 = arith.constant 7 : index
    %c0_33 = arith.constant 0 : index
    %c0_34 = arith.constant 0 : index
    %37 = vector.load %arg3[%c7_32, %c0_33, %c0_34] : memref<9x128x128xf32, #tpu.memory_space<vmem>>, vector<1x128x128xf32>
    %38 = vector.shape_cast %37 : vector<1x128x128xf32> to vector<128x128xf32>
    %cst_35 = arith.constant dense<0.000000e+00> : vector<72x128xf32>
    %39 = tpu.matmul %36, %38, %cst_35 {dimension_numbers = #tpu.dot_dimension_numbers<[1], [0], [0], [1], [0, 0, 1, 1], [], []>} : vector<72x128xf32>, vector<128x128xf32>, vector<72x128xf32> -> vector<72x128xf32>
    %40 = arith.addf %35, %39 : vector<72x128xf32>
    %c15 = arith.constant 15 : index
    %c0_36 = arith.constant 0 : index
    %41 = vector.load %arg1[%c15, %c0_36] : memref<88x128xf32, #tpu.memory_space<vmem>>, vector<72x128xf32>
    %c8_37 = arith.constant 8 : index
    %c0_38 = arith.constant 0 : index
    %c0_39 = arith.constant 0 : index
    %42 = vector.load %arg3[%c8_37, %c0_38, %c0_39] : memref<9x128x128xf32, #tpu.memory_space<vmem>>, vector<1x128x128xf32>
    %43 = vector.shape_cast %42 : vector<1x128x128xf32> to vector<128x128xf32>
    %cst_40 = arith.constant dense<0.000000e+00> : vector<72x128xf32>
    %44 = tpu.matmul %41, %43, %cst_40 {dimension_numbers = #tpu.dot_dimension_numbers<[1], [0], [0], [1], [0, 0, 1, 1], [], []>} : vector<72x128xf32>, vector<128x128xf32>, vector<72x128xf32> -> vector<72x128xf32>
    %45 = arith.addf %40, %44 : vector<72x128xf32>
    %c0_41 = arith.constant 0 : index
    %c0_42 = arith.constant 0 : index
    %46 = vector.load %arg4[%c0_41, %c0_42] : memref<1x128xf32, #tpu.memory_space<vmem>>, vector<1x128xf32>
    %47 = vector.broadcast %46 : vector<1x128xf32> to vector<72x128xf32>
    %48 = arith.addf %45, %47 : vector<72x128xf32>
    %c0_43 = arith.constant 0 : index
    %c0_44 = arith.constant 0 : index
    %49 = vector.load %arg2[%c0_43, %c0_44] : memref<72x1xf32, #tpu.memory_space<vmem>>, vector<72x1xf32>
    %cst_45 = arith.constant 0.000000e+00 : f32
    %50 = vector.broadcast %cst_45 : f32 to vector<88x128xf32>
    %c0_46 = arith.constant 0 : index
    %c0_47 = arith.constant 0 : index
    %51 = vector.load %arg8[%c0_46, %c0_47] : memref<88x128xf32, #tpu.memory_space<vmem>>, vector<88x128xf32>
    tpu.vector_store %arg8[%c0_46, %c0_47], %50 {strides = array<i32>} : memref<88x128xf32, #tpu.memory_space<vmem>>, vector<88x128xf32>,
    %cst_48 = arith.constant 0.000000e+00 : f32
    %52 = vector.broadcast %cst_48 : f32 to vector<72x128xf32>
    %53 = arith.maximumf %48, %52 : vector<72x128xf32>
    %54 = vector.broadcast %49 : vector<72x1xf32> to vector<72x128xf32>
    %55 = arith.mulf %53, %54 : vector<72x128xf32>
    %c8_49 = arith.constant 8 : index
    %c0_50 = arith.constant 0 : index
    %56 = vector.load %arg8[%c8_49, %c0_50] : memref<88x128xf32, #tpu.memory_space<vmem>>, vector<72x128xf32>
    tpu.vector_store %arg8[%c8_49, %c0_50], %55 {strides = array<i32>} : memref<88x128xf32, #tpu.memory_space<vmem>>, vector<72x128xf32>,
    %cst_51 = arith.constant 0.000000e+00 : f32
    %57 = vector.broadcast %cst_51 : f32 to vector<72x128xf32>
    %c1_52 = arith.constant 1 : index
    %c0_53 = arith.constant 0 : index
    %58 = vector.load %arg8[%c1_52, %c0_53] : memref<88x128xf32, #tpu.memory_space<vmem>>, vector<72x128xf32>
    %c0_54 = arith.constant 0 : index
    %c0_55 = arith.constant 0 : index
    %c0_56 = arith.constant 0 : index
    %59 = vector.load %arg5[%c0_54, %c0_55, %c0_56] : memref<18x128x128xf32, #tpu.memory_space<vmem>>, vector<1x128x128xf32>
    %60 = vector.shape_cast %59 : vector<1x128x128xf32> to vector<128x128xf32>
    %cst_57 = arith.constant dense<0.000000e+00> : vector<72x128xf32>
    %61 = tpu.matmul %58, %60, %cst_57 {dimension_numbers = #tpu.dot_dimension_numbers<[1], [0], [0], [1], [0, 0, 1, 1], [], []>} : vector<72x128xf32>, vector<128x128xf32>, vector<72x128xf32> -> vector<72x128xf32>
    %62 = arith.addf %57, %61 : vector<72x128xf32>
    %c2_58 = arith.constant 2 : index
    %c0_59 = arith.constant 0 : index
    %63 = vector.load %arg8[%c2_58, %c0_59] : memref<88x128xf32, #tpu.memory_space<vmem>>, vector<72x128xf32>
    %c1_60 = arith.constant 1 : index
    %c0_61 = arith.constant 0 : index
    %c0_62 = arith.constant 0 : index
    %64 = vector.load %arg5[%c1_60, %c0_61, %c0_62] : memref<18x128x128xf32, #tpu.memory_space<vmem>>, vector<1x128x128xf32>
    %65 = vector.shape_cast %64 : vector<1x128x128xf32> to vector<128x128xf32>
    %cst_63 = arith.constant dense<0.000000e+00> : vector<72x128xf32>
    %66 = tpu.matmul %63, %65, %cst_63 {dimension_numbers = #tpu.dot_dimension_numbers<[1], [0], [0], [1], [0, 0, 1, 1], [], []>} : vector<72x128xf32>, vector<128x128xf32>, vector<72x128xf32> -> vector<72x128xf32>
    %67 = arith.addf %62, %66 : vector<72x128xf32>
    %c3_64 = arith.constant 3 : index
    %c0_65 = arith.constant 0 : index
    %68 = vector.load %arg8[%c3_64, %c0_65] : memref<88x128xf32, #tpu.memory_space<vmem>>, vector<72x128xf32>
    %c2_66 = arith.constant 2 : index
    %c0_67 = arith.constant 0 : index
    %c0_68 = arith.constant 0 : index
    %69 = vector.load %arg5[%c2_66, %c0_67, %c0_68] : memref<18x128x128xf32, #tpu.memory_space<vmem>>, vector<1x128x128xf32>
    %70 = vector.shape_cast %69 : vector<1x128x128xf32> to vector<128x128xf32>
    %cst_69 = arith.constant dense<0.000000e+00> : vector<72x128xf32>
    %71 = tpu.matmul %68, %70, %cst_69 {dimension_numbers = #tpu.dot_dimension_numbers<[1], [0], [0], [1], [0, 0, 1, 1], [], []>} : vector<72x128xf32>, vector<128x128xf32>, vector<72x128xf32> -> vector<72x128xf32>
    %72 = arith.addf %67, %71 : vector<72x128xf32>
    %c7_70 = arith.constant 7 : index
    %c0_71 = arith.constant 0 : index
    %73 = vector.load %arg8[%c7_70, %c0_71] : memref<88x128xf32, #tpu.memory_space<vmem>>, vector<72x128xf32>
    %c3_72 = arith.constant 3 : index
    %c0_73 = arith.constant 0 : index
    %c0_74 = arith.constant 0 : index
    %74 = vector.load %arg5[%c3_72, %c0_73, %c0_74] : memref<18x128x128xf32, #tpu.memory_space<vmem>>, vector<1x128x128xf32>
    %75 = vector.shape_cast %74 : vector<1x128x128xf32> to vector<128x128xf32>
    %cst_75 = arith.constant dense<0.000000e+00> : vector<72x128xf32>
    %76 = tpu.matmul %73, %75, %cst_75 {dimension_numbers = #tpu.dot_dimension_numbers<[1], [0], [0], [1], [0, 0, 1, 1], [], []>} : vector<72x128xf32>, vector<128x128xf32>, vector<72x128xf32> -> vector<72x128xf32>
    %77 = arith.addf %72, %76 : vector<72x128xf32>
    %c8_76 = arith.constant 8 : index
    %c0_77 = arith.constant 0 : index
    %78 = vector.load %arg8[%c8_76, %c0_77] : memref<88x128xf32, #tpu.memory_space<vmem>>, vector<72x128xf32>
    %c4_78 = arith.constant 4 : index
    %c0_79 = arith.constant 0 : index
    %c0_80 = arith.constant 0 : index
    %79 = vector.load %arg5[%c4_78, %c0_79, %c0_80] : memref<18x128x128xf32, #tpu.memory_space<vmem>>, vector<1x128x128xf32>
    %80 = vector.shape_cast %79 : vector<1x128x128xf32> to vector<128x128xf32>
    %cst_81 = arith.constant dense<0.000000e+00> : vector<72x128xf32>
    %81 = tpu.matmul %78, %80, %cst_81 {dimension_numbers = #tpu.dot_dimension_numbers<[1], [0], [0], [1], [0, 0, 1, 1], [], []>} : vector<72x128xf32>, vector<128x128xf32>, vector<72x128xf32> -> vector<72x128xf32>
    %82 = arith.addf %77, %81 : vector<72x128xf32>
    %c9_82 = arith.constant 9 : index
    %c0_83 = arith.constant 0 : index
    %83 = vector.load %arg8[%c9_82, %c0_83] : memref<88x128xf32, #tpu.memory_space<vmem>>, vector<72x128xf32>
    %c5_84 = arith.constant 5 : index
    %c0_85 = arith.constant 0 : index
    %c0_86 = arith.constant 0 : index
    %84 = vector.load %arg5[%c5_84, %c0_85, %c0_86] : memref<18x128x128xf32, #tpu.memory_space<vmem>>, vector<1x128x128xf32>
    %85 = vector.shape_cast %84 : vector<1x128x128xf32> to vector<128x128xf32>
    %cst_87 = arith.constant dense<0.000000e+00> : vector<72x128xf32>
    %86 = tpu.matmul %83, %85, %cst_87 {dimension_numbers = #tpu.dot_dimension_numbers<[1], [0], [0], [1], [0, 0, 1, 1], [], []>} : vector<72x128xf32>, vector<128x128xf32>, vector<72x128xf32> -> vector<72x128xf32>
    %87 = arith.addf %82, %86 : vector<72x128xf32>
    %c13_88 = arith.constant 13 : index
    %c0_89 = arith.constant 0 : index
    %88 = vector.load %arg8[%c13_88, %c0_89] : memref<88x128xf32, #tpu.memory_space<vmem>>, vector<72x128xf32>
    %c6_90 = arith.constant 6 : index
    %c0_91 = arith.constant 0 : index
    %c0_92 = arith.constant 0 : index
    %89 = vector.load %arg5[%c6_90, %c0_91, %c0_92] : memref<18x128x128xf32, #tpu.memory_space<vmem>>, vector<1x128x128xf32>
    %90 = vector.shape_cast %89 : vector<1x128x128xf32> to vector<128x128xf32>
    %cst_93 = arith.constant dense<0.000000e+00> : vector<72x128xf32>
    %91 = tpu.matmul %88, %90, %cst_93 {dimension_numbers = #tpu.dot_dimension_numbers<[1], [0], [0], [1], [0, 0, 1, 1], [], []>} : vector<72x128xf32>, vector<128x128xf32>, vector<72x128xf32> -> vector<72x128xf32>
    %92 = arith.addf %87, %91 : vector<72x128xf32>
    %c14_94 = arith.constant 14 : index
    %c0_95 = arith.constant 0 : index
    %93 = vector.load %arg8[%c14_94, %c0_95] : memref<88x128xf32, #tpu.memory_space<vmem>>, vector<72x128xf32>
    %c7_96 = arith.constant 7 : index
    %c0_97 = arith.constant 0 : index
    %c0_98 = arith.constant 0 : index
    %94 = vector.load %arg5[%c7_96, %c0_97, %c0_98] : memref<18x128x128xf32, #tpu.memory_space<vmem>>, vector<1x128x128xf32>
    %95 = vector.shape_cast %94 : vector<1x128x128xf32> to vector<128x128xf32>
    %cst_99 = arith.constant dense<0.000000e+00> : vector<72x128xf32>
    %96 = tpu.matmul %93, %95, %cst_99 {dimension_numbers = #tpu.dot_dimension_numbers<[1], [0], [0], [1], [0, 0, 1, 1], [], []>} : vector<72x128xf32>, vector<128x128xf32>, vector<72x128xf32> -> vector<72x128xf32>
    %97 = arith.addf %92, %96 : vector<72x128xf32>
    %c15_100 = arith.constant 15 : index
    %c0_101 = arith.constant 0 : index
    %98 = vector.load %arg8[%c15_100, %c0_101] : memref<88x128xf32, #tpu.memory_space<vmem>>, vector<72x128xf32>
    %c8_102 = arith.constant 8 : index
    %c0_103 = arith.constant 0 : index
    %c0_104 = arith.constant 0 : index
    %99 = vector.load %arg5[%c8_102, %c0_103, %c0_104] : memref<18x128x128xf32, #tpu.memory_space<vmem>>, vector<1x128x128xf32>
    %100 = vector.shape_cast %99 : vector<1x128x128xf32> to vector<128x128xf32>
    %cst_105 = arith.constant dense<0.000000e+00> : vector<72x128xf32>
    %101 = tpu.matmul %98, %100, %cst_105 {dimension_numbers = #tpu.dot_dimension_numbers<[1], [0], [0], [1], [0, 0, 1, 1], [], []>} : vector<72x128xf32>, vector<128x128xf32>, vector<72x128xf32> -> vector<72x128xf32>
    %102 = arith.addf %97, %101 : vector<72x128xf32>
    %cst_106 = arith.constant 0.000000e+00 : f32
    %103 = vector.broadcast %cst_106 : f32 to vector<72x128xf32>
    %104 = arith.maximumf %102, %103 : vector<72x128xf32>
    %c0_107 = arith.constant 0 : index
    %c0_108 = arith.constant 0 : index
    %c0_109 = arith.constant 0 : index
    %105 = vector.load %arg6[%c0_107, %c0_108, %c0_109] : memref<2x128x128xf32, #tpu.memory_space<vmem>>, vector<1x128x128xf32>
    %106 = vector.shape_cast %105 : vector<1x128x128xf32> to vector<128x128xf32>
    %cst_110 = arith.constant dense<0.000000e+00> : vector<72x128xf32>
    %107 = tpu.matmul %104, %106, %cst_110 {dimension_numbers = #tpu.dot_dimension_numbers<[1], [0], [0], [1], [0, 0, 1, 1], [], []>} : vector<72x128xf32>, vector<128x128xf32>, vector<72x128xf32> -> vector<72x128xf32>
    %108 = arith.addf %48, %107 : vector<72x128xf32>
    %cst_111 = arith.constant 0.000000e+00 : f32
    %109 = vector.broadcast %cst_111 : f32 to vector<72x128xf32>
    %110 = arith.maximumf %108, %109 : vector<72x128xf32>
    %111 = vector.broadcast %49 : vector<72x1xf32> to vector<72x128xf32>
    %112 = arith.mulf %110, %111 : vector<72x128xf32>
    %c8_112 = arith.constant 8 : index
    %c0_113 = arith.constant 0 : index
    %113 = vector.load %arg8[%c8_112, %c0_113] : memref<88x128xf32, #tpu.memory_space<vmem>>, vector<72x128xf32>
    tpu.vector_store %arg8[%c8_112, %c0_113], %112 {strides = array<i32>} : memref<88x128xf32, #tpu.memory_space<vmem>>, vector<72x128xf32>,
    %cst_114 = arith.constant 0.000000e+00 : f32
    %114 = vector.broadcast %cst_114 : f32 to vector<72x128xf32>
    %c1_115 = arith.constant 1 : index
    %c0_116 = arith.constant 0 : index
    %115 = vector.load %arg8[%c1_115, %c0_116] : memref<88x128xf32, #tpu.memory_space<vmem>>, vector<72x128xf32>
    %c9_117 = arith.constant 9 : index
    %c0_118 = arith.constant 0 : index
    %c0_119 = arith.constant 0 : index
    %116 = vector.load %arg5[%c9_117, %c0_118, %c0_119] : memref<18x128x128xf32, #tpu.memory_space<vmem>>, vector<1x128x128xf32>
    %117 = vector.shape_cast %116 : vector<1x128x128xf32> to vector<128x128xf32>
    %cst_120 = arith.constant dense<0.000000e+00> : vector<72x128xf32>
    %118 = tpu.matmul %115, %117, %cst_120 {dimension_numbers = #tpu.dot_dimension_numbers<[1], [0], [0], [1], [0, 0, 1, 1], [], []>} : vector<72x128xf32>, vector<128x128xf32>, vector<72x128xf32> -> vector<72x128xf32>
    %119 = arith.addf %114, %118 : vector<72x128xf32>
    %c2_121 = arith.constant 2 : index
    %c0_122 = arith.constant 0 : index
    %120 = vector.load %arg8[%c2_121, %c0_122] : memref<88x128xf32, #tpu.memory_space<vmem>>, vector<72x128xf32>
    %c10 = arith.constant 10 : index
    %c0_123 = arith.constant 0 : index
    %c0_124 = arith.constant 0 : index
    %121 = vector.load %arg5[%c10, %c0_123, %c0_124] : memref<18x128x128xf32, #tpu.memory_space<vmem>>, vector<1x128x128xf32>
    %122 = vector.shape_cast %121 : vector<1x128x128xf32> to vector<128x128xf32>
    %cst_125 = arith.constant dense<0.000000e+00> : vector<72x128xf32>
    %123 = tpu.matmul %120, %122, %cst_125 {dimension_numbers = #tpu.dot_dimension_numbers<[1], [0], [0], [1], [0, 0, 1, 1], [], []>} : vector<72x128xf32>, vector<128x128xf32>, vector<72x128xf32> -> vector<72x128xf32>
    %124 = arith.addf %119, %123 : vector<72x128xf32>
    %c3_126 = arith.constant 3 : index
    %c0_127 = arith.constant 0 : index
    %125 = vector.load %arg8[%c3_126, %c0_127] : memref<88x128xf32, #tpu.memory_space<vmem>>, vector<72x128xf32>
    %c11 = arith.constant 11 : index
    %c0_128 = arith.constant 0 : index
    %c0_129 = arith.constant 0 : index
    %126 = vector.load %arg5[%c11, %c0_128, %c0_129] : memref<18x128x128xf32, #tpu.memory_space<vmem>>, vector<1x128x128xf32>
    %127 = vector.shape_cast %126 : vector<1x128x128xf32> to vector<128x128xf32>
    %cst_130 = arith.constant dense<0.000000e+00> : vector<72x128xf32>
    %128 = tpu.matmul %125, %127, %cst_130 {dimension_numbers = #tpu.dot_dimension_numbers<[1], [0], [0], [1], [0, 0, 1, 1], [], []>} : vector<72x128xf32>, vector<128x128xf32>, vector<72x128xf32> -> vector<72x128xf32>
    %129 = arith.addf %124, %128 : vector<72x128xf32>
    %c7_131 = arith.constant 7 : index
    %c0_132 = arith.constant 0 : index
    %130 = vector.load %arg8[%c7_131, %c0_132] : memref<88x128xf32, #tpu.memory_space<vmem>>, vector<72x128xf32>
    %c12 = arith.constant 12 : index
    %c0_133 = arith.constant 0 : index
    %c0_134 = arith.constant 0 : index
    %131 = vector.load %arg5[%c12, %c0_133, %c0_134] : memref<18x128x128xf32, #tpu.memory_space<vmem>>, vector<1x128x128xf32>
    %132 = vector.shape_cast %131 : vector<1x128x128xf32> to vector<128x128xf32>
    %cst_135 = arith.constant dense<0.000000e+00> : vector<72x128xf32>
    %133 = tpu.matmul %130, %132, %cst_135 {dimension_numbers = #tpu.dot_dimension_numbers<[1], [0], [0], [1], [0, 0, 1, 1], [], []>} : vector<72x128xf32>, vector<128x128xf32>, vector<72x128xf32> -> vector<72x128xf32>
    %134 = arith.addf %129, %133 : vector<72x128xf32>
    %c8_136 = arith.constant 8 : index
    %c0_137 = arith.constant 0 : index
    %135 = vector.load %arg8[%c8_136, %c0_137] : memref<88x128xf32, #tpu.memory_space<vmem>>, vector<72x128xf32>
    %c13_138 = arith.constant 13 : index
    %c0_139 = arith.constant 0 : index
    %c0_140 = arith.constant 0 : index
    %136 = vector.load %arg5[%c13_138, %c0_139, %c0_140] : memref<18x128x128xf32, #tpu.memory_space<vmem>>, vector<1x128x128xf32>
    %137 = vector.shape_cast %136 : vector<1x128x128xf32> to vector<128x128xf32>
    %cst_141 = arith.constant dense<0.000000e+00> : vector<72x128xf32>
    %138 = tpu.matmul %135, %137, %cst_141 {dimension_numbers = #tpu.dot_dimension_numbers<[1], [0], [0], [1], [0, 0, 1, 1], [], []>} : vector<72x128xf32>, vector<128x128xf32>, vector<72x128xf32> -> vector<72x128xf32>
    %139 = arith.addf %134, %138 : vector<72x128xf32>
    %c9_142 = arith.constant 9 : index
    %c0_143 = arith.constant 0 : index
    %140 = vector.load %arg8[%c9_142, %c0_143] : memref<88x128xf32, #tpu.memory_space<vmem>>, vector<72x128xf32>
    %c14_144 = arith.constant 14 : index
    %c0_145 = arith.constant 0 : index
    %c0_146 = arith.constant 0 : index
    %141 = vector.load %arg5[%c14_144, %c0_145, %c0_146] : memref<18x128x128xf32, #tpu.memory_space<vmem>>, vector<1x128x128xf32>
    %142 = vector.shape_cast %141 : vector<1x128x128xf32> to vector<128x128xf32>
    %cst_147 = arith.constant dense<0.000000e+00> : vector<72x128xf32>
    %143 = tpu.matmul %140, %142, %cst_147 {dimension_numbers = #tpu.dot_dimension_numbers<[1], [0], [0], [1], [0, 0, 1, 1], [], []>} : vector<72x128xf32>, vector<128x128xf32>, vector<72x128xf32> -> vector<72x128xf32>
    %144 = arith.addf %139, %143 : vector<72x128xf32>
    %c13_148 = arith.constant 13 : index
    %c0_149 = arith.constant 0 : index
    %145 = vector.load %arg8[%c13_148, %c0_149] : memref<88x128xf32, #tpu.memory_space<vmem>>, vector<72x128xf32>
    %c15_150 = arith.constant 15 : index
    %c0_151 = arith.constant 0 : index
    %c0_152 = arith.constant 0 : index
    %146 = vector.load %arg5[%c15_150, %c0_151, %c0_152] : memref<18x128x128xf32, #tpu.memory_space<vmem>>, vector<1x128x128xf32>
    %147 = vector.shape_cast %146 : vector<1x128x128xf32> to vector<128x128xf32>
    %cst_153 = arith.constant dense<0.000000e+00> : vector<72x128xf32>
    %148 = tpu.matmul %145, %147, %cst_153 {dimension_numbers = #tpu.dot_dimension_numbers<[1], [0], [0], [1], [0, 0, 1, 1], [], []>} : vector<72x128xf32>, vector<128x128xf32>, vector<72x128xf32> -> vector<72x128xf32>
    %149 = arith.addf %144, %148 : vector<72x128xf32>
    %c14_154 = arith.constant 14 : index
    %c0_155 = arith.constant 0 : index
    %150 = vector.load %arg8[%c14_154, %c0_155] : memref<88x128xf32, #tpu.memory_space<vmem>>, vector<72x128xf32>
    %c16 = arith.constant 16 : index
    %c0_156 = arith.constant 0 : index
    %c0_157 = arith.constant 0 : index
    %151 = vector.load %arg5[%c16, %c0_156, %c0_157] : memref<18x128x128xf32, #tpu.memory_space<vmem>>, vector<1x128x128xf32>
    %152 = vector.shape_cast %151 : vector<1x128x128xf32> to vector<128x128xf32>
    %cst_158 = arith.constant dense<0.000000e+00> : vector<72x128xf32>
    %153 = tpu.matmul %150, %152, %cst_158 {dimension_numbers = #tpu.dot_dimension_numbers<[1], [0], [0], [1], [0, 0, 1, 1], [], []>} : vector<72x128xf32>, vector<128x128xf32>, vector<72x128xf32> -> vector<72x128xf32>
    %154 = arith.addf %149, %153 : vector<72x128xf32>
    %c15_159 = arith.constant 15 : index
    %c0_160 = arith.constant 0 : index
    %155 = vector.load %arg8[%c15_159, %c0_160] : memref<88x128xf32, #tpu.memory_space<vmem>>, vector<72x128xf32>
    %c17 = arith.constant 17 : index
    %c0_161 = arith.constant 0 : index
    %c0_162 = arith.constant 0 : index
    %156 = vector.load %arg5[%c17, %c0_161, %c0_162] : memref<18x128x128xf32, #tpu.memory_space<vmem>>, vector<1x128x128xf32>
    %157 = vector.shape_cast %156 : vector<1x128x128xf32> to vector<128x128xf32>
    %cst_163 = arith.constant dense<0.000000e+00> : vector<72x128xf32>
    %158 = tpu.matmul %155, %157, %cst_163 {dimension_numbers = #tpu.dot_dimension_numbers<[1], [0], [0], [1], [0, 0, 1, 1], [], []>} : vector<72x128xf32>, vector<128x128xf32>, vector<72x128xf32> -> vector<72x128xf32>
    %159 = arith.addf %154, %158 : vector<72x128xf32>
    %cst_164 = arith.constant 0.000000e+00 : f32
    %160 = vector.broadcast %cst_164 : f32 to vector<72x128xf32>
    %161 = arith.maximumf %159, %160 : vector<72x128xf32>
    %c1_165 = arith.constant 1 : index
    %c0_166 = arith.constant 0 : index
    %c0_167 = arith.constant 0 : index
    %162 = vector.load %arg6[%c1_165, %c0_166, %c0_167] : memref<2x128x128xf32, #tpu.memory_space<vmem>>, vector<1x128x128xf32>
    %163 = vector.shape_cast %162 : vector<1x128x128xf32> to vector<128x128xf32>
    %cst_168 = arith.constant dense<0.000000e+00> : vector<72x128xf32>
    %164 = tpu.matmul %161, %163, %cst_168 {dimension_numbers = #tpu.dot_dimension_numbers<[1], [0], [0], [1], [0, 0, 1, 1], [], []>} : vector<72x128xf32>, vector<128x128xf32>, vector<72x128xf32> -> vector<72x128xf32>
    %165 = arith.addf %108, %164 : vector<72x128xf32>
    %cst_169 = arith.constant 0.000000e+00 : f32
    %166 = vector.broadcast %cst_169 : f32 to vector<72x128xf32>
    %167 = arith.maximumf %165, %166 : vector<72x128xf32>
    %c0_170 = arith.constant 0 : index
    %c0_171 = arith.constant 0 : index
    %168 = vector.load %arg7[%c0_170, %c0_171] : memref<72x128xf32, #tpu.memory_space<vmem>>, vector<72x128xf32>
    tpu.vector_store %arg7[%c0_170, %c0_171], %167 {strides = array<i32>} : memref<72x128xf32, #tpu.memory_space<vmem>>, vector<72x128xf32>,
    return
  }
  func.func @transform_0(%arg0: i32) -> (i32, i32) {
    %c0_i32 = arith.constant 0 : i32
    %c0_i32_0 = arith.constant 0 : i32
    %c0_i32_1 = arith.constant 0 : i32
    return %c0_i32, %c0_i32_0 : i32, i32
  }
  func.func @transform_1(%arg0: i32) -> (i32, i32) {
    %c0_i32 = arith.constant 0 : i32
    %c0_i32_0 = arith.constant 0 : i32
    %c0_i32_1 = arith.constant 0 : i32
    return %c0_i32, %c0_i32_0 : i32, i32
  }
  func.func @transform_2(%arg0: i32) -> (i32, i32, i32) {
    %c0_i32 = arith.constant 0 : i32
    %c0_i32_0 = arith.constant 0 : i32
    %c0_i32_1 = arith.constant 0 : i32
    %c0_i32_2 = arith.constant 0 : i32
    return %c0_i32, %c0_i32_0, %c0_i32_1 : i32, i32, i32
  }
  func.func @transform_3(%arg0: i32) -> (i32, i32) {
    %c0_i32 = arith.constant 0 : i32
    %c0_i32_0 = arith.constant 0 : i32
    %c0_i32_1 = arith.constant 0 : i32
    return %c0_i32, %c0_i32_0 : i32, i32
  }
  func.func @transform_4(%arg0: i32) -> (i32, i32, i32) {
    %c0_i32 = arith.constant 0 : i32
    %c0_i32_0 = arith.constant 0 : i32
    %c0_i32_1 = arith.constant 0 : i32
    %c0_i32_2 = arith.constant 0 : i32
    return %c0_i32, %c0_i32_0, %c0_i32_1 : i32, i32, i32
  }
  func.func @transform_5(%arg0: i32) -> (i32, i32, i32) {
    %c0_i32 = arith.constant 0 : i32
    %c0_i32_0 = arith.constant 0 : i32
    %c0_i32_1 = arith.constant 0 : i32
    %c0_i32_2 = arith.constant 0 : i32
    return %c0_i32, %c0_i32_0, %c0_i32_1 : i32, i32, i32
  }
  func.func @transform_6(%arg0: i32) -> (i32, i32) {
    %c0_i32 = arith.constant 0 : i32
    %c0_i32_0 = arith.constant 0 : i32
    %c0_i32_1 = arith.constant 0 : i32
    return %c0_i32, %c0_i32_0 : i32, i32
  }
}

</mosaic_0001>

<bundles_post_ra>
// kernel: encoder_forward.3
= control target key start
LH: loop header
LB: loop body
LE: loop exit
PB: predicated region body
PF: predicated region fallthrough
CT: control target
= control target key end

     0   :  { %s1140_s1 = inlined_call_operand.vmem [shape: f32[4,128,128], index: 1, kind: input, shape index: {}]   ;;  %s1141_s0 = inlined_call_operand.vmem [shape: f32[184,128], index: 0, kind: input, shape index: {}]   ;;  %s1142_s2 = inlined_call_operand.vmem [shape: f32[1,128], index: 2, kind: input, shape index: {}]   ;;  %s1143_s3 = inlined_call_operand.vmem [shape: f32[168,128], index: 3, kind: output, shape index: {}]  }
   0x1   :  { %v629_v0 = vld [vmem:[%s1140_s1 + $0x178] sm:$0xff]  ;;  %v628_v1 = vld [vmem:[%s1140_s1 + $0x170] sm:$0xff]  ;;  %v627_v5 = vld [vmem:[%s1140_s1 + $0x168] sm:$0xff] }
   0x2   :  { %v645_v2 = vld [vmem:[%s1140_s1 + $0x1f8] sm:$0xff]  ;;  %287 = vmatpush.msra.mxu2 %v629_v0  ;;  %v644_v6 = vld [vmem:[%s1140_s1 + $0x1f0] sm:$0xff]  ;;  %v643_v9 = vld [vmem:[%s1140_s1 + $0x1e8] sm:$0xff] }
   0x3   :  { %426 = vmatpush.msra.mxu3 %v645_v2  ;;  %v613_v3 = vld [vmem:[%s1140_s1 + $0xf8] sm:$0xff]  ;;  %v612_v7 = vld [vmem:[%s1140_s1 + $0xf0] sm:$0xff]  ;;  %v611_v10 = vld [vmem:[%s1140_s1 + $0xe8] sm:$0xff] }
   0x4   :  { %v50_v4 = vld [vmem:[%s1140_s1 + $0x78] sm:$0xff]  ;;  %89 = vmatpush.msra.mxu0 %v613_v3  ;;  %v49_v8 = vld [vmem:[%s1140_s1 + $0x70] sm:$0xff]  ;;  %288 = vmatpush.msra.mxu2 %v628_v1  ;;  %v626_v11 = vld [vmem:[%s1140_s1 + $0x160] sm:$0xff] }
   0x5   :  { %169 = vmatpush.msra.mxu1 %v50_v4  ;;  %427 = vmatpush.msra.mxu3 %v644_v6  ;;  %v48_v12 = vld [vmem:[%s1140_s1 + $0x68] sm:$0xff]  ;;  %v642_v13 = vld [vmem:[%s1140_s1 + $0x1e0] sm:$0xff]  ;;  %v625_v16 = vld [vmem:[%s1140_s1 + $0x158] sm:$0xff] }
   0x6   :  { %90 = vmatpush.msra.mxu0 %v612_v7  ;;  %289 = vmatpush.msra.mxu2 %v627_v5  ;;  %v610_v14 = vld [vmem:[%s1140_s1 + $0xe0] sm:$0xff]  ;;  %v641_v17 = vld [vmem:[%s1140_s1 + $0x1d8] sm:$0xff]  ;;  %v624_v20 = vld [vmem:[%s1140_s1 + $0x150] sm:$0xff] }
   0x7   :  { %170 = vmatpush.msra.mxu1 %v49_v8  ;;  %428 = vmatpush.msra.mxu3 %v643_v9  ;;  %v47_v15 = vld [vmem:[%s1140_s1 + $0x60] sm:$0xff]  ;;  %v609_v18 = vld [vmem:[%s1140_s1 + $0xd8] sm:$0xff]  ;;  %v640_v21 = vld [vmem:[%s1140_s1 + $0x1d0] sm:$0xff] }
   0x8   :  { %91 = vmatpush.msra.mxu0 %v611_v10  ;;  %290 = vmatpush.msra.mxu2 %v626_v11  ;;  %v46_v19 = vld [vmem:[%s1140_s1 + $0x58] sm:$0xff]  ;;  %v608_v22 = vld [vmem:[%s1140_s1 + $0xd0] sm:$0xff]  ;;  %v623_v24 = vld [vmem:[%s1140_s1 + $0x148] sm:$0xff] }
   0x9   :  { %171 = vmatpush.msra.mxu1 %v48_v12  ;;  %429 = vmatpush.msra.mxu3 %v642_v13  ;;  %v45_v23 = vld [vmem:[%s1140_s1 + $0x50] sm:$0xff]  ;;  %v639_v25 = vld [vmem:[%s1140_s1 + $0x1c8] sm:$0xff]  ;;  %v622_v28 = vld [vmem:[%s1140_s1 + $0x140] sm:$0xff] }
   0xa   :  { %92 = vmatpush.msra.mxu0 %v610_v14  ;;  %291 = vmatpush.msra.mxu2 %v625_v16  ;;  %v607_v26 = vld [vmem:[%s1140_s1 + $0xc8] sm:$0xff]  ;;  %v638_v29 = vld [vmem:[%s1140_s1 + $0x1c0] sm:$0xff]  ;;  %v621_v32 = vld [vmem:[%s1140_s1 + $0x138] sm:$0xff] }
   0xb   :  { %172 = vmatpush.msra.mxu1 %v47_v15  ;;  %430 = vmatpush.msra.mxu3 %v641_v17  ;;  %v44_v27 = vld [vmem:[%s1140_s1 + $0x48] sm:$0xff]  ;;  %v606_v30 = vld [vmem:[%s1140_s1 + $0xc0] sm:$0xff]  ;;  %v637_v33 = vld [vmem:[%s1140_s1 + $0x1b8] sm:$0xff] }
   0xc   :  { %93 = vmatpush.msra.mxu0 %v609_v18  ;;  %292 = vmatpush.msra.mxu2 %v624_v20  ;;  %v43_v31 = vld [vmem:[%s1140_s1 + $0x40] sm:$0xff]  ;;  %v605_v34 = vld [vmem:[%s1140_s1 + $0xb8] sm:$0xff]  ;;  %v620_v36 = vld [vmem:[%s1140_s1 + $0x130] sm:$0xff] }
   0xd   :  { %173 = vmatpush.msra.mxu1 %v46_v19  ;;  %431 = vmatpush.msra.mxu3 %v640_v21  ;;  %v42_v35 = vld [vmem:[%s1140_s1 + $0x38] sm:$0xff]  ;;  %v636_v37 = vld [vmem:[%s1140_s1 + $0x1b0] sm:$0xff]  ;;  %v619_v40 = vld [vmem:[%s1140_s1 + $0x128] sm:$0xff] }
   0xe   :  { %94 = vmatpush.msra.mxu0 %v608_v22  ;;  %293 = vmatpush.msra.mxu2 %v623_v24  ;;  %v604_v38 = vld [vmem:[%s1140_s1 + $0xb0] sm:$0xff]  ;;  %v635_v41 = vld [vmem:[%s1140_s1 + $0x1a8] sm:$0xff]  ;;  %v618_v44 = vld [vmem:[%s1140_s1 + $0x120] sm:$0xff] }
   0xf   :  { %174 = vmatpush.msra.mxu1 %v45_v23  ;;  %432 = vmatpush.msra.mxu3 %v639_v25  ;;  %v41_v39 = vld [vmem:[%s1140_s1 + $0x30] sm:$0xff]  ;;  %v603_v42 = vld [vmem:[%s1140_s1 + $0xa8] sm:$0xff]  ;;  %v634_v45 = vld [vmem:[%s1140_s1 + $0x1a0] sm:$0xff] }
  0x10   :  { %95 = vmatpush.msra.mxu0 %v607_v26  ;;  %294 = vmatpush.msra.mxu2 %v622_v28  ;;  %v40_v43 = vld [vmem:[%s1140_s1 + $0x28] sm:$0xff]  ;;  %v602_v46 = vld [vmem:[%s1140_s1 + $0xa0] sm:$0xff]  ;;  %v617_v48 = vld [vmem:[%s1140_s1 + $0x118] sm:$0xff] }
  0x11   :  { %175 = vmatpush.msra.mxu1 %v44_v27  ;;  %433 = vmatpush.msra.mxu3 %v638_v29  ;;  %v39_v47 = vld [vmem:[%s1140_s1 + $0x20] sm:$0xff]  ;;  %v633_v49 = vld [vmem:[%s1140_s1 + $0x198] sm:$0xff]  ;;  %v616_v52 = vld [vmem:[%s1140_s1 + $0x110] sm:$0xff] }
  0x12   :  { %96 = vmatpush.msra.mxu0 %v606_v30  ;;  %295 = vmatpush.msra.mxu2 %v621_v32  ;;  %v601_v50 = vld [vmem:[%s1140_s1 + $0x98] sm:$0xff]  ;;  %v632_v53 = vld [vmem:[%s1140_s1 + $0x190] sm:$0xff]  ;;  %v615_v56 = vld [vmem:[%s1140_s1 + $0x108] sm:$0xff] }
  0x13   :  { %176 = vmatpush.msra.mxu1 %v43_v31  ;;  %434 = vmatpush.msra.mxu3 %v637_v33  ;;  %v38_v51 = vld [vmem:[%s1140_s1 + $0x18] sm:$0xff]  ;;  %v600_v54 = vld [vmem:[%s1140_s1 + $0x90] sm:$0xff]  ;;  %v631_v57 = vld [vmem:[%s1140_s1 + $0x188] sm:$0xff] }
  0x14   :  { %97 = vmatpush.msra.mxu0 %v605_v34  ;;  %296 = vmatpush.msra.mxu2 %v620_v36  ;;  %v37_v55 = vld [vmem:[%s1140_s1 + $0x10] sm:$0xff]  ;;  %v599_v58 = vld [vmem:[%s1140_s1 + $0x88] sm:$0xff]  ;;  %v614_v60 = vld [vmem:[%s1140_s1 + $0x100] sm:$0xff] }
  0x15   :  { %177 = vmatpush.msra.mxu1 %v42_v35  ;;  %435 = vmatpush.msra.mxu3 %v636_v37  ;;  %v36_v59 = vld [vmem:[%s1140_s1 + $0x8] sm:$0xff]  ;;  %v630_v61 = vld [vmem:[%s1140_s1 + $0x180] sm:$0xff]  ;;  %v250_v4 = vld [vmem:[%s1141_s0 + $0x11] sm:$0xff] }
  0x16   :  { %98 = vmatpush.msra.mxu0 %v604_v38  ;;  %297 = vmatpush.msra.mxu2 %v619_v40  ;;  %v249_v62 = vld [vmem:[%s1141_s0 + $0x9] sm:$0xff]  ;;  %v598_v0 = vld [vmem:[%s1140_s1 + $0x80] sm:$0xff]  ;;  %v389_v5 = vld [vmem:[%s1141_s0 + $0x12] sm:$0xff] }
  0x17   :  { %178 = vmatpush.msra.mxu1 %v41_v39  ;;  %436 = vmatpush.msra.mxu3 %v635_v41  ;;  %v388_v63 = vld [vmem:[%s1141_s0 + $0xa] sm:$0xff]  ;;  %v35_v1 = vld [vmem:[%s1140_s1] sm:$0xff]  ;;  %v17_v12 = vld [vmem:[%s1141_s0 + $0x18] sm:$0xff] }
  0x18   :  { %99 = vmatpush.msra.mxu0 %v603_v42  ;;  %298 = vmatpush.msra.mxu2 %v618_v44  ;;  %v51_v2 = vld [vmem:[%s1141_s0 + $0x1] sm:$0xff]  ;;  %v251_v7 = vld [vmem:[%s1141_s0 + $0x19] sm:$0xff]  ;;  %v16_v9 = vld [vmem:[%s1141_s0 + $0x10] sm:$0xff] }
  0x19   :  { %179 = vmatpush.msra.mxu1 %v40_v43  ;;  %437 = vmatpush.msra.mxu3 %v634_v45  ;;  %v14_v3 = vld [vmem:[%s1141_s0] sm:$0xff]  ;;  %v15_v6 = vld [vmem:[%s1141_s0 + $0x8] sm:$0xff]  ;;  %v254_v16 = vld [vmem:[%s1141_s0 + $0x31] sm:$0xff] }
  0x1a   :  { %100 = vmatpush.msra.mxu0 %v602_v46  ;;  %299 = vmatpush.msra.mxu2 %v617_v48  ;;  %v390_v8 = vld [vmem:[%s1141_s0 + $0x1a] sm:$0xff]  ;;  %v391_v11 = vld [vmem:[%s1141_s0 + $0x22] sm:$0xff]  ;;  %v392_v14 = vld [vmem:[%s1141_s0 + $0x2a] sm:$0xff] }
  0x1b   :  { %180 = vmatpush.msra.mxu1 %v39_v47  ;;  %438 = vmatpush.msra.mxu3 %v633_v49  ;;  %v252_v10 = vld [vmem:[%s1141_s0 + $0x21] sm:$0xff]  ;;  %v253_v13 = vld [vmem:[%s1141_s0 + $0x29] sm:$0xff]  ;;  %v393_v17 = vld [vmem:[%s1141_s0 + $0x32] sm:$0xff] }
  0x1c   :  { %101 = vmatpush.msra.mxu0 %v601_v50  ;;  %300 = vmatpush.msra.mxu2 %v616_v52  ;;  %v18_v15 = vld [vmem:[%s1141_s0 + $0x20] sm:$0xff]  ;;  %v19_v18 = vld [vmem:[%s1141_s0 + $0x28] sm:$0xff]  ;;  %v20_v21 = vld [vmem:[%s1141_s0 + $0x30] sm:$0xff] }
  0x1d   :  { %181 = vmatpush.msra.mxu1 %v38_v51  ;;  %439 = vmatpush.msra.mxu3 %v632_v53  ;;  %v255_v19 = vld [vmem:[%s1141_s0 + $0x39] sm:$0xff]  ;;  %v256_v22 = vld [vmem:[%s1141_s0 + $0x41] sm:$0xff]  ;;  %v257_v25 = vld [vmem:[%s1141_s0 + $0x49] sm:$0xff] }
  0x1e   :  { %102 = vmatpush.msra.mxu0 %v600_v54  ;;  %301 = vmatpush.msra.mxu2 %v615_v56  ;;  %v394_v20 = vld [vmem:[%s1141_s0 + $0x3a] sm:$0xff]  ;;  %v395_v23 = vld [vmem:[%s1141_s0 + $0x42] sm:$0xff]  ;;  %v396_v26 = vld [vmem:[%s1141_s0 + $0x4a] sm:$0xff] }
  0x1f   :  { %182 = vmatpush.msra.mxu1 %v37_v55  ;;  %440 = vmatpush.msra.mxu3 %v631_v57  ;;  %v21_v24 = vld [vmem:[%s1141_s0 + $0x38] sm:$0xff]  ;;  %v22_v27 = vld [vmem:[%s1141_s0 + $0x40] sm:$0xff]  ;;  %v23_v30 = vld [vmem:[%s1141_s0 + $0x48] sm:$0xff] }
  0x20   :  { %103 = vmatpush.msra.mxu0 %v599_v58  ;;  %302 = vmatpush.msra.mxu2 %v614_v60  ;;  %v258_v28 = vld [vmem:[%s1141_s0 + $0x51] sm:$0xff]  ;;  %v259_v31 = vld [vmem:[%s1141_s0 + $0x59] sm:$0xff]  ;;  %v260_v34 = vld [vmem:[%s1141_s0 + $0x61] sm:$0xff] }
  0x21   :  { %183 = vmatpush.msra.mxu1 %v36_v59  ;;  %441 = vmatpush.msra.mxu3 %v630_v61  ;;  %v397_v29 = vld [vmem:[%s1141_s0 + $0x52] sm:$0xff]  ;;  %v398_v32 = vld [vmem:[%s1141_s0 + $0x5a] sm:$0xff]  ;;  %v399_v35 = vld [vmem:[%s1141_s0 + $0x62] sm:$0xff] }
  0x22   :  { %303 = vmatmul.f32.vlgmr.msra.gmra.mxu2 %v249_v62  ;;  %442 = vmatmul.f32.vlgmr.msra.gmra.mxu3 %v388_v63  ;;  %v24_v33 = vld [vmem:[%s1141_s0 + $0x50] sm:$0xff]  ;;  %v25_v36 = vld [vmem:[%s1141_s0 + $0x58] sm:$0xff]  ;;  %v26_v39 = vld [vmem:[%s1141_s0 + $0x60] sm:$0xff] }
  0x23   :  { %104 = vmatpush.msra.mxu0 %v598_v0  ;;  %184 = vmatpush.msra.mxu1 %v35_v1  ;;  %v261_v37 = vld [vmem:[%s1141_s0 + $0x69] sm:$0xff]  ;;  %v262_v40 = vld [vmem:[%s1141_s0 + $0x71] sm:$0xff]  ;;  %v263_v43 = vld [vmem:[%s1141_s0 + $0x79] sm:$0xff] }
  0x24   :  { %105 = vmatmul.f32.vlgmr.msra.gmra.mxu0 %v51_v2  ;;  %185 = vmatmul.f32.vlgmr.msra.gmra.mxu1 %v14_v3  ;;  %v400_v38 = vld [vmem:[%s1141_s0 + $0x6a] sm:$0xff]  ;;  %v401_v41 = vld [vmem:[%s1141_s0 + $0x72] sm:$0xff]  ;;  %v402_v44 = vld [vmem:[%s1141_s0 + $0x7a] sm:$0xff] }
  0x25   :  { %v27_v42 = vld [vmem:[%s1141_s0 + $0x68] sm:$0xff]  ;;  %v28_v45 = vld [vmem:[%s1141_s0 + $0x70] sm:$0xff]  ;;  %v29_v48 = vld [vmem:[%s1141_s0 + $0x78] sm:$0xff] }
  0x26   :  { %v264_v46 = vld [vmem:[%s1141_s0 + $0x81] sm:$0xff]  ;;  %v265_v49 = vld [vmem:[%s1141_s0 + $0x89] sm:$0xff]  ;;  %v1018_v58 = vld [vmem:[%s1142_s2] ss:$0 sm:$0xff] }
  0x27   :  { %v403_v47 = vld [vmem:[%s1141_s0 + $0x82] sm:$0xff]  ;;  %v404_v50 = vld [vmem:[%s1141_s0 + $0x8a] sm:$0xff]  ;;  %v405_v60 = vld [vmem:[%s1141_s0 + $0x92] sm:$0xff] }
  0x28   :  { %v30_v53 = vld [vmem:[%s1141_s0 + $0x80] sm:$0xff]  ;;  %v266_v59 = vld [vmem:[%s1141_s0 + $0x91] sm:$0xff]  ;;  %v31_v0 = vld [vmem:[%s1141_s0 + $0x88] sm:$0xff] }
  0x2a   :  { %306 = vmatmul.f32.gmra.mxu2 %v250_v4  ;;  %445 = vmatmul.f32.gmra.mxu3 %v389_v5 }
  0x2c   :  { %108 = vmatmul.f32.gmra.mxu0 %v249_v62  ;;  %188 = vmatmul.f32.gmra.mxu1 %v15_v6 }
  0x32   :  { %309 = vmatmul.f32.gmra.mxu2 %v251_v7  ;;  %448 = vmatmul.f32.gmra.mxu3 %v390_v8  ;;  %v406_v8 = vld [vmem:[%s1141_s0 + $0x9a] sm:$0xff] }
  0x34   :  { %111 = vmatmul.f32.gmra.mxu0 %v250_v4  ;;  %191 = vmatmul.f32.gmra.mxu1 %v16_v9 }
  0x3a   :  { %312 = vmatmul.f32.gmra.mxu2 %v252_v10  ;;  %451 = vmatmul.f32.gmra.mxu3 %v391_v11 }
  0x3c   :  { %114 = vmatmul.f32.gmra.mxu0 %v251_v7  ;;  %194 = vmatmul.f32.gmra.mxu1 %v17_v12  ;;  %v267_v7 = vld [vmem:[%s1141_s0 + $0x99] sm:$0xff]  ;;  %v32_v12 = vld [vmem:[%s1141_s0 + $0x90] sm:$0xff] }
  0x42   :  { %315 = vmatmul.f32.gmra.mxu2 %v253_v13  ;;  %454 = vmatmul.f32.gmra.mxu3 %v392_v14 }
  0x44   :  { %117 = vmatmul.f32.gmra.mxu0 %v252_v10  ;;  %197 = vmatmul.f32.gmra.mxu1 %v18_v15 }
  0x4a   :  { %318 = vmatmul.f32.gmra.mxu2 %v254_v16  ;;  %457 = vmatmul.f32.gmra.mxu3 %v393_v17 }
  0x4c   :  { %120 = vmatmul.f32.gmra.mxu0 %v253_v13  ;;  %200 = vmatmul.f32.gmra.mxu1 %v19_v18 }
  0x52   :  { %321 = vmatmul.f32.gmra.mxu2 %v255_v19  ;;  %460 = vmatmul.f32.gmra.mxu3 %v394_v20  ;;  %v407_v20 = vld [vmem:[%s1141_s0 + $0xa2] sm:$0xff] }
  0x54   :  { %123 = vmatmul.f32.gmra.mxu0 %v254_v16  ;;  %203 = vmatmul.f32.gmra.mxu1 %v20_v21 }
  0x5a   :  { %324 = vmatmul.f32.gmra.mxu2 %v256_v22  ;;  %463 = vmatmul.f32.gmra.mxu3 %v395_v23 }
  0x5c   :  { %126 = vmatmul.f32.gmra.mxu0 %v255_v19  ;;  %206 = vmatmul.f32.gmra.mxu1 %v21_v24  ;;  %v268_v19 = vld [vmem:[%s1141_s0 + $0xa1] sm:$0xff]  ;;  %v33_v24 = vld [vmem:[%s1141_s0 + $0x98] sm:$0xff] }
  0x62   :  { %327 = vmatmul.f32.gmra.mxu2 %v257_v25  ;;  %466 = vmatmul.f32.gmra.mxu3 %v396_v26 }
  0x64   :  { %129 = vmatmul.f32.gmra.mxu0 %v256_v22  ;;  %209 = vmatmul.f32.gmra.mxu1 %v22_v27 }
  0x6a   :  { %330 = vmatmul.f32.gmra.mxu2 %v258_v28  ;;  %469 = vmatmul.f32.gmra.mxu3 %v397_v29 }
  0x6c   :  { %132 = vmatmul.f32.gmra.mxu0 %v257_v25  ;;  %212 = vmatmul.f32.gmra.mxu1 %v23_v30 }
  0x72   :  { %333 = vmatmul.f32.gmra.mxu2 %v259_v31  ;;  %472 = vmatmul.f32.gmra.mxu3 %v398_v32  ;;  %v408_v32 = vld [vmem:[%s1141_s0 + $0xaa] sm:$0xff] }
  0x74   :  { %135 = vmatmul.f32.gmra.mxu0 %v258_v28  ;;  %215 = vmatmul.f32.gmra.mxu1 %v24_v33 }
  0x7a   :  { %336 = vmatmul.f32.gmra.mxu2 %v260_v34  ;;  %475 = vmatmul.f32.gmra.mxu3 %v399_v35 }
  0x7c   :  { %138 = vmatmul.f32.gmra.mxu0 %v259_v31  ;;  %218 = vmatmul.f32.gmra.mxu1 %v25_v36  ;;  %v269_v31 = vld [vmem:[%s1141_s0 + $0xa9] sm:$0xff]  ;;  %v34_v36 = vld [vmem:[%s1141_s0 + $0xa0] sm:$0xff] }
  0x82   :  { %339 = vmatmul.f32.gmra.mxu2 %v261_v37  ;;  %478 = vmatmul.f32.gmra.mxu3 %v400_v38 }
  0x84   :  { %141 = vmatmul.f32.gmra.mxu0 %v260_v34  ;;  %221 = vmatmul.f32.gmra.mxu1 %v26_v39 }
  0x8a   :  { %342 = vmatmul.f32.gmra.mxu2 %v262_v40  ;;  %481 = vmatmul.f32.gmra.mxu3 %v401_v41 }
  0x8c   :  { %144 = vmatmul.f32.gmra.mxu0 %v261_v37  ;;  %224 = vmatmul.f32.gmra.mxu1 %v27_v42 }
  0x92   :  { %345 = vmatmul.f32.gmra.mxu2 %v263_v43  ;;  %484 = vmatmul.f32.gmra.mxu3 %v402_v44 }
  0x94   :  { %147 = vmatmul.f32.gmra.mxu0 %v262_v40  ;;  %227 = vmatmul.f32.gmra.mxu1 %v28_v45 }
  0x9a   :  { %348 = vmatmul.f32.gmra.mxu2 %v264_v46  ;;  %487 = vmatmul.f32.gmra.mxu3 %v403_v47 }
  0x9c   :  { %150 = vmatmul.f32.gmra.mxu0 %v263_v43  ;;  %230 = vmatmul.f32.gmra.mxu1 %v29_v48 }
  0xa1   :  { %v106_v51 = vpop.f32.mrf.mxu0  ;;  %v186_v52 = vpop.f32.mrf.mxu1 }
  0xa2   :  { %351 = vmatmul.f32.gmra.mxu2 %v265_v49  ;;  %v187_v54 = vadd.f32 %v186_v52, %v106_v51  ;;  %490 = vmatmul.f32.gmra.mxu3 %v404_v50 }
  0xa4   :  { %153 = vmatmul.f32.gmra.mxu0 %v264_v46  ;;  %233 = vmatmul.f32.gmra.mxu1 %v30_v53 }
  0xa5   :  { %v304_v55 = vpop.f32.mrf.mxu2  ;;  %v443_v56 = vpop.f32.mrf.mxu3 }
  0xa6   :  { %v367_v57 = vadd.f32 %v304_v55, %v187_v54 }
  0xa8   :  { %v506_v61 = vadd.f32 %v443_v56, %v367_v57 }
  0xa9   :  { %v109_v62 = vpop.f32.mrf.mxu0  ;;  %v189_v63 = vpop.f32.mrf.mxu1 }
  0xaa   :  { %v531_v1 = vadd.f32 %v1018_v58, %v506_v61  ;;  %354 = vmatmul.f32.gmra.mxu2 %v266_v59  ;;  %v190_v2 = vadd.f32 %v189_v63, %v109_v62  ;;  %493 = vmatmul.f32.gmra.mxu3 %v405_v60 }
  0xac   :  { %v552_v3 = vmax.f32 %v531_v1, 0.0  ;;  %156 = vmatmul.f32.gmra.mxu0 %v265_v49  ;;  %236 = vmatmul.f32.gmra.mxu1 %v31_v0 }
  0xad   :  { %v307_v4 = vpop.f32.mrf.mxu2  ;;  %v446_v5 = vpop.f32.mrf.mxu3 }
  0xae   :  { %573 = vst [vmem:[%s1143_s3] sm:$0xff] %v552_v3  ;;  %v368_v6 = vadd.f32 %v307_v4, %v190_v2 }
  0xb0   :  { %v507_v9 = vadd.f32 %v446_v5, %v368_v6 }
  0xb1   :  { %v112_v10 = vpop.f32.mrf.mxu0  ;;  %v192_v11 = vpop.f32.mrf.mxu1 }
  0xb2   :  { %v532_v13 = vadd.f32 %v1018_v58, %v507_v9  ;;  %357 = vmatmul.f32.gmra.mxu2 %v267_v7  ;;  %v193_v14 = vadd.f32 %v192_v11, %v112_v10  ;;  %496 = vmatmul.f32.gmra.mxu3 %v406_v8 }
  0xb4   :  { %v553_v15 = vmax.f32 %v532_v13, 0.0  ;;  %159 = vmatmul.f32.gmra.mxu0 %v266_v59  ;;  %239 = vmatmul.f32.gmra.mxu1 %v32_v12 }
  0xb5   :  { %v310_v16 = vpop.f32.mrf.mxu2  ;;  %v449_v17 = vpop.f32.mrf.mxu3 }
  0xb6   :  { %574 = vst [vmem:[%s1143_s3 + $0x8] sm:$0xff] %v553_v15  ;;  %v369_v18 = vadd.f32 %v310_v16, %v193_v14 }
  0xb8   :  { %v508_v21 = vadd.f32 %v449_v17, %v369_v18 }
  0xb9   :  { %v115_v22 = vpop.f32.mrf.mxu0  ;;  %v195_v23 = vpop.f32.mrf.mxu1 }
  0xba   :  { %v533_v25 = vadd.f32 %v1018_v58, %v508_v21  ;;  %360 = vmatmul.f32.gmra.mxu2 %v268_v19  ;;  %v196_v26 = vadd.f32 %v195_v23, %v115_v22  ;;  %499 = vmatmul.f32.gmra.mxu3 %v407_v20 }
  0xbc   :  { %v554_v27 = vmax.f32 %v533_v25, 0.0  ;;  %162 = vmatmul.f32.gmra.mxu0 %v267_v7  ;;  %242 = vmatmul.f32.gmra.mxu1 %v33_v24 }
  0xbd   :  { %v313_v28 = vpop.f32.mrf.mxu2  ;;  %v452_v29 = vpop.f32.mrf.mxu3 }
  0xbe   :  { %575 = vst [vmem:[%s1143_s3 + $0x10] sm:$0xff] %v554_v27  ;;  %v370_v30 = vadd.f32 %v313_v28, %v196_v26 }
  0xc0   :  { %v509_v33 = vadd.f32 %v452_v29, %v370_v30 }
  0xc1   :  { %v118_v34 = vpop.f32.mrf.mxu0  ;;  %v198_v35 = vpop.f32.mrf.mxu1 }
  0xc2   :  { %v534_v37 = vadd.f32 %v1018_v58, %v509_v33  ;;  %363 = vmatmul.f32.gmra.mxu2 %v269_v31  ;;  %v199_v38 = vadd.f32 %v198_v35, %v118_v34  ;;  %502 = vmatmul.f32.gmra.mxu3 %v408_v32 }
  0xc4   :  { %v555_v39 = vmax.f32 %v534_v37, 0.0  ;;  %165 = vmatmul.f32.gmra.mxu0 %v268_v19  ;;  %245 = vmatmul.f32.gmra.mxu1 %v34_v36 }
  0xc5   :  { %v316_v40 = vpop.f32.mrf.mxu2  ;;  %v455_v41 = vpop.f32.mrf.mxu3 }
  0xc6   :  { %576 = vst [vmem:[%s1143_s3 + $0x18] sm:$0xff] %v555_v39  ;;  %v371_v42 = vadd.f32 %v316_v40, %v199_v38 }
  0xc8   :  { %v510_v43 = vadd.f32 %v455_v41, %v371_v42 }
  0xc9   :  { %v121_v44 = vpop.f32.mrf.mxu0  ;;  %v201_v45 = vpop.f32.mrf.mxu1 }
  0xca   :  { %v535_v46 = vadd.f32 %v1018_v58, %v510_v43  ;;  %v202_v47 = vadd.f32 %v201_v45, %v121_v44 }
  0xcc   :  { %v556_v48 = vmax.f32 %v535_v46, 0.0 }
  0xcd   :  { %v319_v49 = vpop.f32.mrf.mxu2  ;;  %v458_v50 = vpop.f32.mrf.mxu3 }
  0xce   :  { %577 = vst [vmem:[%s1143_s3 + $0x20] sm:$0xff] %v556_v48  ;;  %v372_v51 = vadd.f32 %v319_v49, %v202_v47 }
  0xd0   :  { %v511_v52 = vadd.f32 %v458_v50, %v372_v51 }
  0xd1   :  { %v124_v53 = vpop.f32.mrf.mxu0  ;;  %v204_v54 = vpop.f32.mrf.mxu1 }
  0xd2   :  { %v536_v55 = vadd.f32 %v1018_v58, %v511_v52  ;;  %v205_v56 = vadd.f32 %v204_v54, %v124_v53 }
  0xd4   :  { %v557_v57 = vmax.f32 %v536_v55, 0.0 }
  0xd5   :  { %v322_v59 = vpop.f32.mrf.mxu2  ;;  %v461_v60 = vpop.f32.mrf.mxu3 }
  0xd6   :  { %578 = vst [vmem:[%s1143_s3 + $0x28] sm:$0xff] %v557_v57  ;;  %v373_v61 = vadd.f32 %v322_v59, %v205_v56 }
  0xd8   :  { %v512_v62 = vadd.f32 %v461_v60, %v373_v61 }
  0xd9   :  { %v127_v63 = vpop.f32.mrf.mxu0  ;;  %v207_v0 = vpop.f32.mrf.mxu1 }
  0xda   :  { %v537_v1 = vadd.f32 %v1018_v58, %v512_v62  ;;  %v208_v2 = vadd.f32 %v207_v0, %v127_v63 }
  0xdc   :  { %v558_v3 = vmax.f32 %v537_v1, 0.0 }
  0xdd   :  { %v325_v4 = vpop.f32.mrf.mxu2  ;;  %v464_v5 = vpop.f32.mrf.mxu3 }
  0xde   :  { %579 = vst [vmem:[%s1143_s3 + $0x30] sm:$0xff] %v558_v3  ;;  %v374_v6 = vadd.f32 %v325_v4, %v208_v2 }
  0xe0   :  { %v513_v7 = vadd.f32 %v464_v5, %v374_v6 }
  0xe1   :  { %v130_v8 = vpop.f32.mrf.mxu0  ;;  %v210_v9 = vpop.f32.mrf.mxu1 }
  0xe2   :  { %v538_v10 = vadd.f32 %v1018_v58, %v513_v7  ;;  %v211_v11 = vadd.f32 %v210_v9, %v130_v8 }
  0xe4   :  { %v559_v12 = vmax.f32 %v538_v10, 0.0 }
  0xe5   :  { %v328_v13 = vpop.f32.mrf.mxu2  ;;  %v467_v14 = vpop.f32.mrf.mxu3 }
  0xe6   :  { %580 = vst [vmem:[%s1143_s3 + $0x38] sm:$0xff] %v559_v12  ;;  %v375_v15 = vadd.f32 %v328_v13, %v211_v11 }
  0xe8   :  { %v514_v16 = vadd.f32 %v467_v14, %v375_v15 }
  0xe9   :  { %v133_v17 = vpop.f32.mrf.mxu0  ;;  %v213_v18 = vpop.f32.mrf.mxu1 }
  0xea   :  { %v539_v19 = vadd.f32 %v1018_v58, %v514_v16  ;;  %v214_v20 = vadd.f32 %v213_v18, %v133_v17 }
  0xec   :  { %v560_v21 = vmax.f32 %v539_v19, 0.0 }
  0xed   :  { %v331_v22 = vpop.f32.mrf.mxu2  ;;  %v470_v23 = vpop.f32.mrf.mxu3 }
  0xee   :  { %581 = vst [vmem:[%s1143_s3 + $0x40] sm:$0xff] %v560_v21  ;;  %v376_v24 = vadd.f32 %v331_v22, %v214_v20 }
  0xf0   :  { %v515_v25 = vadd.f32 %v470_v23, %v376_v24 }
  0xf1   :  { %v136_v26 = vpop.f32.mrf.mxu0  ;;  %v216_v27 = vpop.f32.mrf.mxu1 }
  0xf2   :  { %v540_v28 = vadd.f32 %v1018_v58, %v515_v25  ;;  %v217_v29 = vadd.f32 %v216_v27, %v136_v26 }
  0xf4   :  { %v561_v30 = vmax.f32 %v540_v28, 0.0 }
  0xf5   :  { %v334_v31 = vpop.f32.mrf.mxu2  ;;  %v473_v32 = vpop.f32.mrf.mxu3 }
  0xf6   :  { %582 = vst [vmem:[%s1143_s3 + $0x48] sm:$0xff] %v561_v30  ;;  %v377_v33 = vadd.f32 %v334_v31, %v217_v29 }
  0xf8   :  { %v516_v34 = vadd.f32 %v473_v32, %v377_v33 }
  0xf9   :  { %v139_v35 = vpop.f32.mrf.mxu0  ;;  %v219_v36 = vpop.f32.mrf.mxu1 }
  0xfa   :  { %v541_v37 = vadd.f32 %v1018_v58, %v516_v34  ;;  %v220_v38 = vadd.f32 %v219_v36, %v139_v35 }
  0xfc   :  { %v562_v39 = vmax.f32 %v541_v37, 0.0 }
  0xfd   :  { %v337_v40 = vpop.f32.mrf.mxu2  ;;  %v476_v41 = vpop.f32.mrf.mxu3 }
  0xfe   :  { %583 = vst [vmem:[%s1143_s3 + $0x50] sm:$0xff] %v562_v39  ;;  %v378_v42 = vadd.f32 %v337_v40, %v220_v38 }
 0x100   :  { %v517_v43 = vadd.f32 %v476_v41, %v378_v42 }
 0x101   :  { %v142_v44 = vpop.f32.mrf.mxu0  ;;  %v222_v45 = vpop.f32.mrf.mxu1 }
 0x102   :  { %v542_v46 = vadd.f32 %v1018_v58, %v517_v43  ;;  %v223_v47 = vadd.f32 %v222_v45, %v142_v44 }
 0x104   :  { %v563_v48 = vmax.f32 %v542_v46, 0.0 }
 0x105   :  { %v340_v49 = vpop.f32.mrf.mxu2  ;;  %v479_v50 = vpop.f32.mrf.mxu3 }
 0x106   :  { %584 = vst [vmem:[%s1143_s3 + $0x58] sm:$0xff] %v563_v48  ;;  %v379_v51 = vadd.f32 %v340_v49, %v223_v47 }
 0x108   :  { %v518_v52 = vadd.f32 %v479_v50, %v379_v51 }
 0x109   :  { %v145_v53 = vpop.f32.mrf.mxu0  ;;  %v225_v54 = vpop.f32.mrf.mxu1 }
 0x10a   :  { %v543_v55 = vadd.f32 %v1018_v58, %v518_v52  ;;  %v226_v56 = vadd.f32 %v225_v54, %v145_v53 }
 0x10c   :  { %v564_v57 = vmax.f32 %v543_v55, 0.0 }
 0x10d   :  { %v343_v59 = vpop.f32.mrf.mxu2  ;;  %v482_v60 = vpop.f32.mrf.mxu3 }
 0x10e   :  { %585 = vst [vmem:[%s1143_s3 + $0x60] sm:$0xff] %v564_v57  ;;  %v380_v61 = vadd.f32 %v343_v59, %v226_v56 }
 0x110   :  { %v519_v62 = vadd.f32 %v482_v60, %v380_v61 }
 0x111   :  { %v148_v63 = vpop.f32.mrf.mxu0  ;;  %v228_v0 = vpop.f32.mrf.mxu1 }
 0x112   :  { %v544_v1 = vadd.f32 %v1018_v58, %v519_v62  ;;  %v229_v2 = vadd.f32 %v228_v0, %v148_v63 }
 0x114   :  { %v565_v3 = vmax.f32 %v544_v1, 0.0 }
 0x115   :  { %v346_v4 = vpop.f32.mrf.mxu2  ;;  %v485_v5 = vpop.f32.mrf.mxu3 }
 0x116   :  { %586 = vst [vmem:[%s1143_s3 + $0x68] sm:$0xff] %v565_v3  ;;  %v381_v6 = vadd.f32 %v346_v4, %v229_v2 }
 0x118   :  { %v520_v7 = vadd.f32 %v485_v5, %v381_v6 }
 0x119   :  { %v151_v8 = vpop.f32.mrf.mxu0  ;;  %v231_v9 = vpop.f32.mrf.mxu1 }
 0x11a   :  { %v545_v10 = vadd.f32 %v1018_v58, %v520_v7  ;;  %v232_v11 = vadd.f32 %v231_v9, %v151_v8 }
 0x11c   :  { %v566_v12 = vmax.f32 %v545_v10, 0.0 }
 0x11d   :  { %v349_v13 = vpop.f32.mrf.mxu2  ;;  %v488_v14 = vpop.f32.mrf.mxu3 }
 0x11e   :  { %587 = vst [vmem:[%s1143_s3 + $0x70] sm:$0xff] %v566_v12  ;;  %v382_v15 = vadd.f32 %v349_v13, %v232_v11 }
 0x120   :  { %v521_v16 = vadd.f32 %v488_v14, %v382_v15 }
 0x121   :  { %v154_v17 = vpop.f32.mrf.mxu0  ;;  %v234_v18 = vpop.f32.mrf.mxu1 }
 0x122   :  { %v546_v19 = vadd.f32 %v1018_v58, %v521_v16  ;;  %v235_v20 = vadd.f32 %v234_v18, %v154_v17 }
 0x124   :  { %v567_v21 = vmax.f32 %v546_v19, 0.0 }
 0x125   :  { %v352_v22 = vpop.f32.mrf.mxu2  ;;  %v491_v23 = vpop.f32.mrf.mxu3 }
 0x126   :  { %588 = vst [vmem:[%s1143_s3 + $0x78] sm:$0xff] %v567_v21  ;;  %v383_v24 = vadd.f32 %v352_v22, %v235_v20 }
 0x128   :  { %v522_v25 = vadd.f32 %v491_v23, %v383_v24 }
 0x129   :  { %v157_v26 = vpop.f32.mrf.mxu0  ;;  %v237_v27 = vpop.f32.mrf.mxu1 }
 0x12a   :  { %v547_v28 = vadd.f32 %v1018_v58, %v522_v25  ;;  %v238_v29 = vadd.f32 %v237_v27, %v157_v26 }
 0x12c   :  { %v568_v30 = vmax.f32 %v547_v28, 0.0 }
 0x12d   :  { %v355_v31 = vpop.f32.mrf.mxu2  ;;  %v494_v32 = vpop.f32.mrf.mxu3 }
 0x12e   :  { %589 = vst [vmem:[%s1143_s3 + $0x80] sm:$0xff] %v568_v30  ;;  %v384_v33 = vadd.f32 %v355_v31, %v238_v29 }
 0x130   :  { %v523_v34 = vadd.f32 %v494_v32, %v384_v33 }
 0x131   :  { %v160_v35 = vpop.f32.mrf.mxu0  ;;  %v240_v36 = vpop.f32.mrf.mxu1 }
 0x132   :  { %v548_v37 = vadd.f32 %v1018_v58, %v523_v34  ;;  %v241_v38 = vadd.f32 %v240_v36, %v160_v35 }
 0x134   :  { %v569_v39 = vmax.f32 %v548_v37, 0.0 }
 0x135   :  { %v358_v40 = vpop.f32.mrf.mxu2  ;;  %v497_v41 = vpop.f32.mrf.mxu3 }
 0x136   :  { %590 = vst [vmem:[%s1143_s3 + $0x88] sm:$0xff] %v569_v39  ;;  %v385_v42 = vadd.f32 %v358_v40, %v241_v38 }
 0x138   :  { %v524_v43 = vadd.f32 %v497_v41, %v385_v42 }
 0x139   :  { %v163_v44 = vpop.f32.mrf.mxu0  ;;  %v243_v45 = vpop.f32.mrf.mxu1 }
 0x13a   :  { %v549_v46 = vadd.f32 %v1018_v58, %v524_v43  ;;  %v244_v47 = vadd.f32 %v243_v45, %v163_v44 }
 0x13c   :  { %v570_v48 = vmax.f32 %v549_v46, 0.0 }
 0x13d   :  { %v361_v49 = vpop.f32.mrf.mxu2  ;;  %v500_v50 = vpop.f32.mrf.mxu3 }
 0x13e   :  { %591 = vst [vmem:[%s1143_s3 + $0x90] sm:$0xff] %v570_v48  ;;  %v386_v51 = vadd.f32 %v361_v49, %v244_v47 }
 0x140   :  { %v525_v52 = vadd.f32 %v500_v50, %v386_v51 }
 0x141   :  { %v166_v53 = vpop.f32.mrf.mxu0  ;;  %v246_v54 = vpop.f32.mrf.mxu1 }
 0x142   :  { %v550_v55 = vadd.f32 %v1018_v58, %v525_v52  ;;  %v247_v56 = vadd.f32 %v246_v54, %v166_v53 }
 0x144   :  { %v571_v57 = vmax.f32 %v550_v55, 0.0 }
 0x145   :  { %v364_v59 = vpop.f32.mrf.mxu2  ;;  %v503_v60 = vpop.f32.mrf.mxu3 }
 0x146   :  { %592 = vst [vmem:[%s1143_s3 + $0x98] sm:$0xff] %v571_v57  ;;  %v387_v61 = vadd.f32 %v364_v59, %v247_v56 }
 0x148   :  { %v526_v62 = vadd.f32 %v503_v60, %v387_v61 }
 0x14a   :  { %v551_v63 = vadd.f32 %v1018_v58, %v526_v62 }
 0x14c   :  { %v572_v0 = vmax.f32 %v551_v63, 0.0 }
 0x14e   :  { %593 = vst [vmem:[%s1143_s3 + $0xa0] sm:$0xff] %v572_v0 }

// kernel: encoder_forward.4
= control target key start
LH: loop header
LB: loop body
LE: loop exit
PB: predicated region body
PF: predicated region fallthrough
CT: control target
= control target key end

     0   :  { %s682_s1 = inlined_call_operand.vmem [shape: f32[4,128,128], index: 1, kind: input, shape index: {}]   ;;  %s683_s0 = inlined_call_operand.vmem [shape: f32[64,128], index: 0, kind: input, shape index: {}]   ;;  %s684_s2 = inlined_call_operand.vmem [shape: f32[1,128], index: 2, kind: input, shape index: {}]   ;;  %s685_s3 = inlined_call_operand.vmem [shape: f32[56,128], index: 3, kind: output, shape index: {}]  }
   0x1   :  { %v335_v0 = vld [vmem:[%s682_s1 + $0x178] sm:$0xff]  ;;  %v334_v1 = vld [vmem:[%s682_s1 + $0x170] sm:$0xff]  ;;  %v333_v5 = vld [vmem:[%s682_s1 + $0x168] sm:$0xff] }
   0x2   :  { %v351_v2 = vld [vmem:[%s682_s1 + $0x1f8] sm:$0xff]  ;;  %161 = vmatpush.msra.mxu2 %v335_v0  ;;  %v350_v6 = vld [vmem:[%s682_s1 + $0x1f0] sm:$0xff]  ;;  %v349_v9 = vld [vmem:[%s682_s1 + $0x1e8] sm:$0xff] }
   0x3   :  { %230 = vmatpush.msra.mxu3 %v351_v2  ;;  %v319_v3 = vld [vmem:[%s682_s1 + $0xf8] sm:$0xff]  ;;  %v318_v7 = vld [vmem:[%s682_s1 + $0xf0] sm:$0xff]  ;;  %v317_v10 = vld [vmem:[%s682_s1 + $0xe8] sm:$0xff] }
   0x4   :  { %v36_v4 = vld [vmem:[%s682_s1 + $0x78] sm:$0xff]  ;;  %61 = vmatpush.msra.mxu0 %v319_v3  ;;  %v35_v8 = vld [vmem:[%s682_s1 + $0x70] sm:$0xff]  ;;  %162 = vmatpush.msra.mxu2 %v334_v1  ;;  %v332_v11 = vld [vmem:[%s682_s1 + $0x160] sm:$0xff] }
   0x5   :  { %99 = vmatpush.msra.mxu1 %v36_v4  ;;  %231 = vmatpush.msra.mxu3 %v350_v6  ;;  %v34_v12 = vld [vmem:[%s682_s1 + $0x68] sm:$0xff]  ;;  %v348_v13 = vld [vmem:[%s682_s1 + $0x1e0] sm:$0xff]  ;;  %v331_v16 = vld [vmem:[%s682_s1 + $0x158] sm:$0xff] }
   0x6   :  { %62 = vmatpush.msra.mxu0 %v318_v7  ;;  %163 = vmatpush.msra.mxu2 %v333_v5  ;;  %v316_v14 = vld [vmem:[%s682_s1 + $0xe0] sm:$0xff]  ;;  %v347_v17 = vld [vmem:[%s682_s1 + $0x1d8] sm:$0xff]  ;;  %v330_v20 = vld [vmem:[%s682_s1 + $0x150] sm:$0xff] }
   0x7   :  { %100 = vmatpush.msra.mxu1 %v35_v8  ;;  %232 = vmatpush.msra.mxu3 %v349_v9  ;;  %v33_v15 = vld [vmem:[%s682_s1 + $0x60] sm:$0xff]  ;;  %v315_v18 = vld [vmem:[%s682_s1 + $0xd8] sm:$0xff]  ;;  %v346_v21 = vld [vmem:[%s682_s1 + $0x1d0] sm:$0xff] }
   0x8   :  { %63 = vmatpush.msra.mxu0 %v317_v10  ;;  %164 = vmatpush.msra.mxu2 %v332_v11  ;;  %v32_v19 = vld [vmem:[%s682_s1 + $0x58] sm:$0xff]  ;;  %v314_v22 = vld [vmem:[%s682_s1 + $0xd0] sm:$0xff]  ;;  %v329_v24 = vld [vmem:[%s682_s1 + $0x148] sm:$0xff] }
   0x9   :  { %101 = vmatpush.msra.mxu1 %v34_v12  ;;  %233 = vmatpush.msra.mxu3 %v348_v13  ;;  %v31_v23 = vld [vmem:[%s682_s1 + $0x50] sm:$0xff]  ;;  %v345_v25 = vld [vmem:[%s682_s1 + $0x1c8] sm:$0xff]  ;;  %v328_v28 = vld [vmem:[%s682_s1 + $0x140] sm:$0xff] }
   0xa   :  { %64 = vmatpush.msra.mxu0 %v316_v14  ;;  %165 = vmatpush.msra.mxu2 %v331_v16  ;;  %v313_v26 = vld [vmem:[%s682_s1 + $0xc8] sm:$0xff]  ;;  %v344_v29 = vld [vmem:[%s682_s1 + $0x1c0] sm:$0xff]  ;;  %v327_v32 = vld [vmem:[%s682_s1 + $0x138] sm:$0xff] }
   0xb   :  { %102 = vmatpush.msra.mxu1 %v33_v15  ;;  %234 = vmatpush.msra.mxu3 %v347_v17  ;;  %v30_v27 = vld [vmem:[%s682_s1 + $0x48] sm:$0xff]  ;;  %v312_v30 = vld [vmem:[%s682_s1 + $0xc0] sm:$0xff]  ;;  %v343_v33 = vld [vmem:[%s682_s1 + $0x1b8] sm:$0xff] }
   0xc   :  { %65 = vmatpush.msra.mxu0 %v315_v18  ;;  %166 = vmatpush.msra.mxu2 %v330_v20  ;;  %v29_v31 = vld [vmem:[%s682_s1 + $0x40] sm:$0xff]  ;;  %v311_v34 = vld [vmem:[%s682_s1 + $0xb8] sm:$0xff]  ;;  %v326_v36 = vld [vmem:[%s682_s1 + $0x130] sm:$0xff] }
   0xd   :  { %103 = vmatpush.msra.mxu1 %v32_v19  ;;  %235 = vmatpush.msra.mxu3 %v346_v21  ;;  %v28_v35 = vld [vmem:[%s682_s1 + $0x38] sm:$0xff]  ;;  %v342_v37 = vld [vmem:[%s682_s1 + $0x1b0] sm:$0xff]  ;;  %v325_v40 = vld [vmem:[%s682_s1 + $0x128] sm:$0xff] }
   0xe   :  { %66 = vmatpush.msra.mxu0 %v314_v22  ;;  %167 = vmatpush.msra.mxu2 %v329_v24  ;;  %v310_v38 = vld [vmem:[%s682_s1 + $0xb0] sm:$0xff]  ;;  %v341_v41 = vld [vmem:[%s682_s1 + $0x1a8] sm:$0xff]  ;;  %v324_v44 = vld [vmem:[%s682_s1 + $0x120] sm:$0xff] }
   0xf   :  { %104 = vmatpush.msra.mxu1 %v31_v23  ;;  %236 = vmatpush.msra.mxu3 %v345_v25  ;;  %v27_v39 = vld [vmem:[%s682_s1 + $0x30] sm:$0xff]  ;;  %v309_v42 = vld [vmem:[%s682_s1 + $0xa8] sm:$0xff]  ;;  %v340_v45 = vld [vmem:[%s682_s1 + $0x1a0] sm:$0xff] }
  0x10   :  { %67 = vmatpush.msra.mxu0 %v313_v26  ;;  %168 = vmatpush.msra.mxu2 %v328_v28  ;;  %v26_v43 = vld [vmem:[%s682_s1 + $0x28] sm:$0xff]  ;;  %v308_v46 = vld [vmem:[%s682_s1 + $0xa0] sm:$0xff]  ;;  %v323_v48 = vld [vmem:[%s682_s1 + $0x118] sm:$0xff] }
  0x11   :  { %105 = vmatpush.msra.mxu1 %v30_v27  ;;  %237 = vmatpush.msra.mxu3 %v344_v29  ;;  %v25_v47 = vld [vmem:[%s682_s1 + $0x20] sm:$0xff]  ;;  %v339_v49 = vld [vmem:[%s682_s1 + $0x198] sm:$0xff]  ;;  %v322_v52 = vld [vmem:[%s682_s1 + $0x110] sm:$0xff] }
  0x12   :  { %68 = vmatpush.msra.mxu0 %v312_v30  ;;  %169 = vmatpush.msra.mxu2 %v327_v32  ;;  %v307_v50 = vld [vmem:[%s682_s1 + $0x98] sm:$0xff]  ;;  %v338_v53 = vld [vmem:[%s682_s1 + $0x190] sm:$0xff]  ;;  %v321_v56 = vld [vmem:[%s682_s1 + $0x108] sm:$0xff] }
  0x13   :  { %106 = vmatpush.msra.mxu1 %v29_v31  ;;  %238 = vmatpush.msra.mxu3 %v343_v33  ;;  %v24_v51 = vld [vmem:[%s682_s1 + $0x18] sm:$0xff]  ;;  %v306_v54 = vld [vmem:[%s682_s1 + $0x90] sm:$0xff]  ;;  %v337_v57 = vld [vmem:[%s682_s1 + $0x188] sm:$0xff] }
  0x14   :  { %69 = vmatpush.msra.mxu0 %v311_v34  ;;  %170 = vmatpush.msra.mxu2 %v326_v36  ;;  %v23_v55 = vld [vmem:[%s682_s1 + $0x10] sm:$0xff]  ;;  %v305_v58 = vld [vmem:[%s682_s1 + $0x88] sm:$0xff]  ;;  %v320_v60 = vld [vmem:[%s682_s1 + $0x100] sm:$0xff] }
  0x15   :  { %107 = vmatpush.msra.mxu1 %v28_v35  ;;  %239 = vmatpush.msra.mxu3 %v342_v37  ;;  %v22_v59 = vld [vmem:[%s682_s1 + $0x8] sm:$0xff]  ;;  %v336_v61 = vld [vmem:[%s682_s1 + $0x180] sm:$0xff]  ;;  %v139_v8 = vld [vmem:[%s683_s0 + $0x15] sm:$0xff] }
  0x16   :  { %70 = vmatpush.msra.mxu0 %v310_v38  ;;  %171 = vmatpush.msra.mxu2 %v325_v40  ;;  %v137_v62 = vld [vmem:[%s683_s0 + $0x5] sm:$0xff]  ;;  %v138_v4 = vld [vmem:[%s683_s0 + $0xd] sm:$0xff]  ;;  %v208_v9 = vld [vmem:[%s683_s0 + $0x16] sm:$0xff] }
  0x17   :  { %108 = vmatpush.msra.mxu1 %v27_v39  ;;  %240 = vmatpush.msra.mxu3 %v341_v41  ;;  %v206_v63 = vld [vmem:[%s683_s0 + $0x6] sm:$0xff]  ;;  %v207_v5 = vld [vmem:[%s683_s0 + $0xe] sm:$0xff]  ;;  %v140_v12 = vld [vmem:[%s683_s0 + $0x1d] sm:$0xff] }
  0x18   :  { %71 = vmatpush.msra.mxu0 %v309_v42  ;;  %172 = vmatpush.msra.mxu2 %v324_v44  ;;  %v304_v0 = vld [vmem:[%s682_s1 + $0x80] sm:$0xff]  ;;  %v38_v6 = vld [vmem:[%s683_s0 + $0x9] sm:$0xff]  ;;  %v39_v10 = vld [vmem:[%s683_s0 + $0x11] sm:$0xff] }
  0x19   :  { %109 = vmatpush.msra.mxu1 %v26_v43  ;;  %241 = vmatpush.msra.mxu3 %v340_v45  ;;  %v21_v1 = vld [vmem:[%s682_s1] sm:$0xff]  ;;  %v15_v7 = vld [vmem:[%s683_s0 + $0x8] sm:$0xff]  ;;  %v16_v11 = vld [vmem:[%s683_s0 + $0x10] sm:$0xff] }
  0x1a   :  { %72 = vmatpush.msra.mxu0 %v308_v46  ;;  %173 = vmatpush.msra.mxu2 %v323_v48  ;;  %v37_v2 = vld [vmem:[%s683_s0 + $0x1] sm:$0xff]  ;;  %v40_v14 = vld [vmem:[%s683_s0 + $0x19] sm:$0xff]  ;;  %v142_v20 = vld [vmem:[%s683_s0 + $0x2d] sm:$0xff] }
  0x1b   :  { %110 = vmatpush.msra.mxu1 %v25_v47  ;;  %242 = vmatpush.msra.mxu3 %v339_v49  ;;  %v14_v3 = vld [vmem:[%s683_s0] sm:$0xff]  ;;  %v17_v15 = vld [vmem:[%s683_s0 + $0x18] sm:$0xff]  ;;  %v211_v21 = vld [vmem:[%s683_s0 + $0x2e] sm:$0xff] }
  0x1c   :  { %73 = vmatpush.msra.mxu0 %v307_v50  ;;  %174 = vmatpush.msra.mxu2 %v322_v52  ;;  %v209_v13 = vld [vmem:[%s683_s0 + $0x1e] sm:$0xff]  ;;  %v210_v17 = vld [vmem:[%s683_s0 + $0x26] sm:$0xff]  ;;  %v143_v24 = vld [vmem:[%s683_s0 + $0x35] sm:$0xff] }
  0x1d   :  { %111 = vmatpush.msra.mxu1 %v24_v51  ;;  %243 = vmatpush.msra.mxu3 %v338_v53  ;;  %v141_v16 = vld [vmem:[%s683_s0 + $0x25] sm:$0xff]  ;;  %v212_v25 = vld [vmem:[%s683_s0 + $0x36] sm:$0xff]  ;;  %v652_v34 = vld [vmem:[%s684_s2] ss:$0 sm:$0xff] }
  0x1e   :  { %74 = vmatpush.msra.mxu0 %v306_v54  ;;  %175 = vmatpush.msra.mxu2 %v321_v56  ;;  %v41_v18 = vld [vmem:[%s683_s0 + $0x21] sm:$0xff]  ;;  %v42_v22 = vld [vmem:[%s683_s0 + $0x29] sm:$0xff]  ;;  %v43_v26 = vld [vmem:[%s683_s0 + $0x31] sm:$0xff] }
  0x1f   :  { %112 = vmatpush.msra.mxu1 %v23_v55  ;;  %244 = vmatpush.msra.mxu3 %v337_v57  ;;  %v18_v19 = vld [vmem:[%s683_s0 + $0x20] sm:$0xff]  ;;  %v19_v23 = vld [vmem:[%s683_s0 + $0x28] sm:$0xff]  ;;  %v20_v27 = vld [vmem:[%s683_s0 + $0x30] sm:$0xff] }
  0x20   :  { %75 = vmatpush.msra.mxu0 %v305_v58  ;;  %176 = vmatpush.msra.mxu2 %v320_v60 }
  0x21   :  { %113 = vmatpush.msra.mxu1 %v22_v59  ;;  %245 = vmatpush.msra.mxu3 %v336_v61 }
  0x22   :  { %177 = vmatmul.f32.vlgmr.msra.gmra.mxu2 %v137_v62  ;;  %246 = vmatmul.f32.vlgmr.msra.gmra.mxu3 %v206_v63 }
  0x23   :  { %76 = vmatpush.msra.mxu0 %v304_v0  ;;  %114 = vmatpush.msra.mxu1 %v21_v1 }
  0x24   :  { %77 = vmatmul.f32.vlgmr.msra.gmra.mxu0 %v37_v2  ;;  %115 = vmatmul.f32.vlgmr.msra.gmra.mxu1 %v14_v3 }
  0x2a   :  { %180 = vmatmul.f32.gmra.mxu2 %v138_v4  ;;  %249 = vmatmul.f32.gmra.mxu3 %v207_v5 }
  0x2c   :  { %80 = vmatmul.f32.gmra.mxu0 %v38_v6  ;;  %118 = vmatmul.f32.gmra.mxu1 %v15_v7 }
  0x32   :  { %183 = vmatmul.f32.gmra.mxu2 %v139_v8  ;;  %252 = vmatmul.f32.gmra.mxu3 %v208_v9 }
  0x34   :  { %83 = vmatmul.f32.gmra.mxu0 %v39_v10  ;;  %121 = vmatmul.f32.gmra.mxu1 %v16_v11 }
  0x3a   :  { %186 = vmatmul.f32.gmra.mxu2 %v140_v12  ;;  %255 = vmatmul.f32.gmra.mxu3 %v209_v13 }
  0x3c   :  { %86 = vmatmul.f32.gmra.mxu0 %v40_v14  ;;  %124 = vmatmul.f32.gmra.mxu1 %v17_v15 }
  0x42   :  { %189 = vmatmul.f32.gmra.mxu2 %v141_v16  ;;  %258 = vmatmul.f32.gmra.mxu3 %v210_v17 }
  0x44   :  { %89 = vmatmul.f32.gmra.mxu0 %v41_v18  ;;  %127 = vmatmul.f32.gmra.mxu1 %v18_v19 }
  0x4a   :  { %192 = vmatmul.f32.gmra.mxu2 %v142_v20  ;;  %261 = vmatmul.f32.gmra.mxu3 %v211_v21 }
  0x4c   :  { %92 = vmatmul.f32.gmra.mxu0 %v42_v22  ;;  %130 = vmatmul.f32.gmra.mxu1 %v19_v23 }
  0x52   :  { %195 = vmatmul.f32.gmra.mxu2 %v143_v24  ;;  %264 = vmatmul.f32.gmra.mxu3 %v212_v25 }
  0x54   :  { %95 = vmatmul.f32.gmra.mxu0 %v43_v26  ;;  %133 = vmatmul.f32.gmra.mxu1 %v20_v27 }
  0xa1   :  { %v78_v28 = vpop.f32.mrf.mxu0  ;;  %v116_v29 = vpop.f32.mrf.mxu1 }
  0xa2   :  { %v117_v30 = vadd.f32 %v116_v29, %v78_v28 }
  0xa5   :  { %v178_v31 = vpop.f32.mrf.mxu2  ;;  %v247_v32 = vpop.f32.mrf.mxu3 }
  0xa6   :  { %v199_v33 = vadd.f32 %v178_v31, %v117_v30 }
  0xa8   :  { %v268_v35 = vadd.f32 %v247_v32, %v199_v33 }
  0xa9   :  { %v81_v36 = vpop.f32.mrf.mxu0  ;;  %v119_v37 = vpop.f32.mrf.mxu1 }
  0xaa   :  { %v279_v38 = vadd.f32 %v652_v34, %v268_v35  ;;  %v120_v39 = vadd.f32 %v119_v37, %v81_v36 }
  0xac   :  { %v286_v40 = vmax.f32 %v279_v38, 0.0 }
  0xad   :  { %v181_v41 = vpop.f32.mrf.mxu2  ;;  %v250_v42 = vpop.f32.mrf.mxu3 }
  0xae   :  { %293 = vst [vmem:[%s685_s3] sm:$0xff] %v286_v40  ;;  %v200_v43 = vadd.f32 %v181_v41, %v120_v39 }
  0xb0   :  { %v269_v44 = vadd.f32 %v250_v42, %v200_v43 }
  0xb1   :  { %v84_v45 = vpop.f32.mrf.mxu0  ;;  %v122_v46 = vpop.f32.mrf.mxu1 }
  0xb2   :  { %v280_v47 = vadd.f32 %v652_v34, %v269_v44  ;;  %v123_v48 = vadd.f32 %v122_v46, %v84_v45 }
  0xb4   :  { %v287_v49 = vmax.f32 %v280_v47, 0.0 }
  0xb5   :  { %v184_v50 = vpop.f32.mrf.mxu2  ;;  %v253_v51 = vpop.f32.mrf.mxu3 }
  0xb6   :  { %294 = vst [vmem:[%s685_s3 + $0x8] sm:$0xff] %v287_v49  ;;  %v201_v52 = vadd.f32 %v184_v50, %v123_v48 }
  0xb8   :  { %v270_v53 = vadd.f32 %v253_v51, %v201_v52 }
  0xb9   :  { %v87_v54 = vpop.f32.mrf.mxu0  ;;  %v125_v55 = vpop.f32.mrf.mxu1 }
  0xba   :  { %v281_v56 = vadd.f32 %v652_v34, %v270_v53  ;;  %v126_v57 = vadd.f32 %v125_v55, %v87_v54 }
  0xbc   :  { %v288_v58 = vmax.f32 %v281_v56, 0.0 }
  0xbd   :  { %v187_v59 = vpop.f32.mrf.mxu2  ;;  %v256_v60 = vpop.f32.mrf.mxu3 }
  0xbe   :  { %295 = vst [vmem:[%s685_s3 + $0x10] sm:$0xff] %v288_v58  ;;  %v202_v61 = vadd.f32 %v187_v59, %v126_v57 }
  0xc0   :  { %v271_v62 = vadd.f32 %v256_v60, %v202_v61 }
  0xc1   :  { %v90_v63 = vpop.f32.mrf.mxu0  ;;  %v128_v0 = vpop.f32.mrf.mxu1 }
  0xc2   :  { %v282_v1 = vadd.f32 %v652_v34, %v271_v62  ;;  %v129_v2 = vadd.f32 %v128_v0, %v90_v63 }
  0xc4   :  { %v289_v3 = vmax.f32 %v282_v1, 0.0 }
  0xc5   :  { %v190_v4 = vpop.f32.mrf.mxu2  ;;  %v259_v5 = vpop.f32.mrf.mxu3 }
  0xc6   :  { %296 = vst [vmem:[%s685_s3 + $0x18] sm:$0xff] %v289_v3  ;;  %v203_v6 = vadd.f32 %v190_v4, %v129_v2 }
  0xc8   :  { %v272_v7 = vadd.f32 %v259_v5, %v203_v6 }
  0xc9   :  { %v93_v8 = vpop.f32.mrf.mxu0  ;;  %v131_v9 = vpop.f32.mrf.mxu1 }
  0xca   :  { %v283_v10 = vadd.f32 %v652_v34, %v272_v7  ;;  %v132_v11 = vadd.f32 %v131_v9, %v93_v8 }
  0xcc   :  { %v290_v12 = vmax.f32 %v283_v10, 0.0 }
  0xcd   :  { %v193_v13 = vpop.f32.mrf.mxu2  ;;  %v262_v14 = vpop.f32.mrf.mxu3 }
  0xce   :  { %297 = vst [vmem:[%s685_s3 + $0x20] sm:$0xff] %v290_v12  ;;  %v204_v15 = vadd.f32 %v193_v13, %v132_v11 }
  0xd0   :  { %v273_v16 = vadd.f32 %v262_v14, %v204_v15 }
  0xd1   :  { %v96_v17 = vpop.f32.mrf.mxu0  ;;  %v134_v18 = vpop.f32.mrf.mxu1 }
  0xd2   :  { %v284_v19 = vadd.f32 %v652_v34, %v273_v16  ;;  %v135_v20 = vadd.f32 %v134_v18, %v96_v17 }
  0xd4   :  { %v291_v21 = vmax.f32 %v284_v19, 0.0 }
  0xd5   :  { %v196_v22 = vpop.f32.mrf.mxu2  ;;  %v265_v23 = vpop.f32.mrf.mxu3 }
  0xd6   :  { %298 = vst [vmem:[%s685_s3 + $0x28] sm:$0xff] %v291_v21  ;;  %v205_v24 = vadd.f32 %v196_v22, %v135_v20 }
  0xd8   :  { %v274_v25 = vadd.f32 %v265_v23, %v205_v24 }
  0xda   :  { %v285_v26 = vadd.f32 %v652_v34, %v274_v25 }
  0xdc   :  { %v292_v27 = vmax.f32 %v285_v26, 0.0 }
  0xde   :  { %299 = vst [vmem:[%s685_s3 + $0x30] sm:$0xff] %v292_v27 }

// kernel: encoder_forward.5
= control target key start
LH: loop header
LB: loop body
LE: loop exit
PB: predicated region body
PF: predicated region fallthrough
CT: control target
= control target key end

     0   :  { %s5254_s2 = inlined_call_operand.vmem [shape: f32[9,128,128], index: 2, kind: input, shape index: {}]   ;;  %s5255_s0 = inlined_call_operand.vmem [shape: f32[88,128], index: 0, kind: input, shape index: {}]   ;;  %s5256_s1 = inlined_call_operand.vmem [shape: f32[72,1], index: 1, kind: input, shape index: {}]   ;;  %s5257_s3 = inlined_call_operand.vmem [shape: f32[1,128], index: 3, kind: input, shape index: {}]   ;;  %s5258_s4 = inlined_call_operand.vmem [shape: f32[18,128,128], index: 4, kind: input, shape index: {}]   ;;  %s5259_s5 = inlined_call_operand.vmem [shape: f32[2,128,128], index: 5, kind: input, shape index: {}]   ;;  %s5260_s6 = inlined_call_operand.vmem [shape: f32[72,128], index: 6, kind: output, shape index: {}]  }
   0x1   :  { %v2426_v0 = vld [vmem:[%s5254_s2 + $0xf8] sm:$0xff]  ;;  %v2425_v1 = vld [vmem:[%s5254_s2 + $0xf0] sm:$0xff]  ;;  %v2424_v2 = vld [vmem:[%s5254_s2 + $0xe8] sm:$0xff] }
   0x2   :  { %2827 = vmatpush.msra.mxu1 %v2426_v0  ;;  %2828 = vmatpush.msra.mxu2 %v2426_v0  ;;  %v2423_v3 = vld [vmem:[%s5254_s2 + $0xe0] sm:$0xff]  ;;  %v2422_v4 = vld [vmem:[%s5254_s2 + $0xd8] sm:$0xff]  ;;  %v2457_v6 = vld [vmem:[%s5254_s2 + $0x1f0] sm:$0xff] }
   0x3   :  { %74 = vmatpush.msra.mxu0 %v2426_v0  ;;  %v2458_v5 = vld [vmem:[%s5254_s2 + $0x1f8] sm:$0xff]  ;;  %v2421_v7 = vld [vmem:[%s5254_s2 + $0xd0] sm:$0xff]  ;;  %v2456_v8 = vld [vmem:[%s5254_s2 + $0x1e8] sm:$0xff] }
   0x4   :  { %2829 = vmatpush.msra.mxu1 %v2425_v1  ;;  %2830 = vmatpush.msra.mxu2 %v2425_v1  ;;  %v2420_v9 = vld [vmem:[%s5254_s2 + $0xc8] sm:$0xff]  ;;  %v2455_v10 = vld [vmem:[%s5254_s2 + $0x1e0] sm:$0xff]  ;;  %v2454_v12 = vld [vmem:[%s5254_s2 + $0x1d8] sm:$0xff] }
   0x5   :  { %75 = vmatpush.msra.mxu0 %v2425_v1  ;;  %267 = vmatpush.msra.mxu3 %v2458_v5  ;;  %v2419_v11 = vld [vmem:[%s5254_s2 + $0xc0] sm:$0xff]  ;;  %v2418_v13 = vld [vmem:[%s5254_s2 + $0xb8] sm:$0xff]  ;;  %v2453_v14 = vld [vmem:[%s5254_s2 + $0x1d0] sm:$0xff] }
   0x6   :  { %2831 = vmatpush.msra.mxu1 %v2424_v2  ;;  %2832 = vmatpush.msra.mxu2 %v2424_v2  ;;  %v2417_v15 = vld [vmem:[%s5254_s2 + $0xb0] sm:$0xff]  ;;  %v2452_v16 = vld [vmem:[%s5254_s2 + $0x1c8] sm:$0xff]  ;;  %v2451_v18 = vld [vmem:[%s5254_s2 + $0x1c0] sm:$0xff] }
   0x7   :  { %76 = vmatpush.msra.mxu0 %v2424_v2  ;;  %268 = vmatpush.msra.mxu3 %v2457_v6  ;;  %v2416_v17 = vld [vmem:[%s5254_s2 + $0xa8] sm:$0xff]  ;;  %v2415_v19 = vld [vmem:[%s5254_s2 + $0xa0] sm:$0xff]  ;;  %v2450_v20 = vld [vmem:[%s5254_s2 + $0x1b8] sm:$0xff] }
   0x8   :  { %2833 = vmatpush.msra.mxu1 %v2423_v3  ;;  %2834 = vmatpush.msra.mxu2 %v2423_v3  ;;  %v2414_v21 = vld [vmem:[%s5254_s2 + $0x98] sm:$0xff]  ;;  %v2449_v22 = vld [vmem:[%s5254_s2 + $0x1b0] sm:$0xff]  ;;  %v2448_v24 = vld [vmem:[%s5254_s2 + $0x1a8] sm:$0xff] }
   0x9   :  { %77 = vmatpush.msra.mxu0 %v2423_v3  ;;  %269 = vmatpush.msra.mxu3 %v2456_v8  ;;  %v2413_v23 = vld [vmem:[%s5254_s2 + $0x90] sm:$0xff]  ;;  %v2412_v25 = vld [vmem:[%s5254_s2 + $0x88] sm:$0xff]  ;;  %v2447_v26 = vld [vmem:[%s5254_s2 + $0x1a0] sm:$0xff] }
   0xa   :  { %2835 = vmatpush.msra.mxu1 %v2422_v4  ;;  %2836 = vmatpush.msra.mxu2 %v2422_v4  ;;  %v2411_v27 = vld [vmem:[%s5254_s2 + $0x80] sm:$0xff]  ;;  %v2442_v29 = vld [vmem:[%s5254_s2 + $0x178] sm:$0xff]  ;;  %v2441_v31 = vld [vmem:[%s5254_s2 + $0x170] sm:$0xff] }
   0xb   :  { %78 = vmatpush.msra.mxu0 %v2422_v4  ;;  %270 = vmatpush.msra.mxu3 %v2455_v10  ;;  %v52_v28 = vld [vmem:[%s5255_s0 + $0x22] sm:$0xff]  ;;  %v47_v30 = vld [vmem:[%s5254_s2 + $0x78] sm:$0xff]  ;;  %v46_v33 = vld [vmem:[%s5254_s2 + $0x70] sm:$0xff] }
   0xc   :  { %2837 = vmatpush.msra.mxu1 %v2421_v7  ;;  %2838 = vmatpush.msra.mxu2 %v2421_v7  ;;  %v48_v32 = vld [vmem:[%s5255_s0 + $0x2] sm:$0xff]  ;;  %v2474_v34 = vld [vmem:[%s5254_s2 + $0x278] sm:$0xff]  ;;  %v2473_v38 = vld [vmem:[%s5254_s2 + $0x270] sm:$0xff] }
   0xd   :  { %79 = vmatpush.msra.mxu0 %v2421_v7  ;;  %271 = vmatpush.msra.mxu3 %v2454_v12  ;;  %v2440_v35 = vld [vmem:[%s5254_s2 + $0x168] sm:$0xff]  ;;  %v2446_v36 = vld [vmem:[%s5254_s2 + $0x198] sm:$0xff]  ;;  %v2439_v39 = vld [vmem:[%s5254_s2 + $0x160] sm:$0xff] }
   0xe   :  { %2839 = vmatpush.msra.mxu1 %v2420_v9  ;;  %2840 = vmatpush.msra.mxu2 %v2420_v9  ;;  %v45_v37 = vld [vmem:[%s5254_s2 + $0x68] sm:$0xff]  ;;  %v2445_v40 = vld [vmem:[%s5254_s2 + $0x190] sm:$0xff]  ;;  %v44_v41 = vld [vmem:[%s5254_s2 + $0x60] sm:$0xff] }
   0xf   :  { %80 = vmatpush.msra.mxu0 %v2420_v9  ;;  %272 = vmatpush.msra.mxu3 %v2453_v14  ;;  %v2472_v42 = vld [vmem:[%s5254_s2 + $0x268] sm:$0xff]  ;;  %v2438_v44 = vld [vmem:[%s5254_s2 + $0x158] sm:$0xff]  ;;  %v2471_v46 = vld [vmem:[%s5254_s2 + $0x260] sm:$0xff] }
  0x10   :  { %2841 = vmatpush.msra.mxu1 %v2419_v11  ;;  %2842 = vmatpush.msra.mxu2 %v2419_v11  ;;  %v53_v43 = vld [vmem:[%s5255_s0 + $0x2a] sm:$0xff]  ;;  %v43_v45 = vld [vmem:[%s5254_s2 + $0x58] sm:$0xff]  ;;  %v2435_v55 = vld [vmem:[%s5254_s2 + $0x140] sm:$0xff] }
  0x11   :  { %81 = vmatpush.msra.mxu0 %v2419_v11  ;;  %273 = vmatpush.msra.mxu3 %v2452_v16  ;;  %v2437_v47 = vld [vmem:[%s5254_s2 + $0x150] sm:$0xff]  ;;  %v2470_v50 = vld [vmem:[%s5254_s2 + $0x258] sm:$0xff]  ;;  %v2436_v51 = vld [vmem:[%s5254_s2 + $0x148] sm:$0xff] }
  0x12   :  { %2843 = vmatpush.msra.mxu1 %v2418_v13  ;;  %2844 = vmatpush.msra.mxu2 %v2418_v13  ;;  %v49_v48 = vld [vmem:[%s5255_s0 + $0xa] sm:$0xff]  ;;  %v2443_v56 = vld [vmem:[%s5254_s2 + $0x180] sm:$0xff]  ;;  %v54_v59 = vld [vmem:[%s5255_s0 + $0x32] sm:$0xff] }
  0x13   :  { %82 = vmatpush.msra.mxu0 %v2418_v13  ;;  %274 = vmatpush.msra.mxu3 %v2451_v18  ;;  %v42_v49 = vld [vmem:[%s5254_s2 + $0x50] sm:$0xff]  ;;  %v2444_v52 = vld [vmem:[%s5254_s2 + $0x188] sm:$0xff]  ;;  %v40_v57 = vld [vmem:[%s5254_s2 + $0x40] sm:$0xff] }
  0x14   :  { %2845 = vmatpush.msra.mxu1 %v2417_v15  ;;  %2846 = vmatpush.msra.mxu2 %v2417_v15  ;;  %v41_v53 = vld [vmem:[%s5254_s2 + $0x48] sm:$0xff]  ;;  %v2469_v54 = vld [vmem:[%s5254_s2 + $0x250] sm:$0xff]  ;;  %v2434_v60 = vld [vmem:[%s5254_s2 + $0x138] sm:$0xff] }
  0x15   :  { %83 = vmatpush.msra.mxu0 %v2417_v15  ;;  %275 = vmatpush.msra.mxu3 %v2450_v20  ;;  %v2468_v58 = vld [vmem:[%s5254_s2 + $0x248] sm:$0xff]  ;;  %v39_v61 = vld [vmem:[%s5254_s2 + $0x38] sm:$0xff]  ;;  %v2433_v63 = vld [vmem:[%s5254_s2 + $0x130] sm:$0xff] }
  0x16   :  { %2847 = vmatpush.msra.mxu1 %v2416_v17  ;;  %2848 = vmatpush.msra.mxu2 %v2416_v17  ;;  %v56_v62 = vld [vmem:[%s5255_s0 + $0x42] sm:$0xff]  ;;  %v38_v1 = vld [vmem:[%s5254_s2 + $0x30] sm:$0xff]  ;;  %v2466_v4 = vld [vmem:[%s5254_s2 + $0x238] sm:$0xff] }
  0x17   :  { %84 = vmatpush.msra.mxu0 %v2416_v17  ;;  %276 = vmatpush.msra.mxu3 %v2449_v22  ;;  %v2467_v0 = vld [vmem:[%s5254_s2 + $0x240] sm:$0xff]  ;;  %v50_v2 = vld [vmem:[%s5255_s0 + $0x12] sm:$0xff]  ;;  %v2432_v3 = vld [vmem:[%s5254_s2 + $0x128] sm:$0xff] }
  0x18   :  { %2849 = vmatpush.msra.mxu1 %v2415_v19  ;;  %2850 = vmatpush.msra.mxu2 %v2415_v19  ;;  %v37_v5 = vld [vmem:[%s5254_s2 + $0x28] sm:$0xff]  ;;  %v2431_v7 = vld [vmem:[%s5254_s2 + $0x120] sm:$0xff]  ;;  %v2465_v8 = vld [vmem:[%s5254_s2 + $0x230] sm:$0xff] }
  0x19   :  { %85 = vmatpush.msra.mxu0 %v2415_v19  ;;  %277 = vmatpush.msra.mxu3 %v2448_v24  ;;  %v241_v6 = vld [vmem:[%s5255_s0 + $0x7] sm:$0xff]  ;;  %v2522_v10 = vld [vmem:[%s5254_s2 + $0x3f8] sm:$0xff]  ;;  %v2429_v15 = vld [vmem:[%s5254_s2 + $0x110] sm:$0xff] }
  0x1a   :  { %2851 = vmatpush.msra.mxu1 %v2414_v21  ;;  %2852 = vmatpush.msra.mxu2 %v2414_v21  ;;  %v36_v9 = vld [vmem:[%s5254_s2 + $0x20] sm:$0xff]  ;;  %v2430_v12 = vld [vmem:[%s5254_s2 + $0x118] sm:$0xff]  ;;  %v2464_v14 = vld [vmem:[%s5254_s2 + $0x228] sm:$0xff] }
  0x1b   :  { %86 = vmatpush.msra.mxu0 %v2414_v21  ;;  %278 = vmatpush.msra.mxu3 %v2447_v26  ;;  %v55_v11 = vld [vmem:[%s5255_s0 + $0x3a] sm:$0xff]  ;;  %v2521_v16 = vld [vmem:[%s5254_s2 + $0x3f0] sm:$0xff]  ;;  %v2428_v19 = vld [vmem:[%s5254_s2 + $0x108] sm:$0xff] }
  0x1c   :  { %2853 = vmatpush.msra.mxu1 %v2413_v23  ;;  %2854 = vmatpush.msra.mxu2 %v2413_v23  ;;  %v35_v13 = vld [vmem:[%s5254_s2 + $0x18] sm:$0xff]  ;;  %v34_v17 = vld [vmem:[%s5254_s2 + $0x10] sm:$0xff]  ;;  %v2463_v18 = vld [vmem:[%s5254_s2 + $0x220] sm:$0xff] }
  0x1d   :  { %87 = vmatpush.msra.mxu0 %v2413_v23  ;;  %279 = vmatpush.msra.mxu3 %v2446_v36  ;;  %v51_v20 = vld [vmem:[%s5255_s0 + $0x1a] sm:$0xff]  ;;  %v33_v21 = vld [vmem:[%s5254_s2 + $0x8] sm:$0xff] }
  0x1e   :  { %2855 = vmatpush.msra.mxu1 %v2412_v25  ;;  %2856 = vmatpush.msra.mxu2 %v2412_v25  ;;  %v2462_v22 = vld [vmem:[%s5254_s2 + $0x218] sm:$0xff]  ;;  %v2427_v23 = vld [vmem:[%s5254_s2 + $0x100] sm:$0xff]  ;;  %v3185_v24 = vld [vmem:[%s5255_s0 + $0xf] sm:$0xff] }
  0x1f   :  { %88 = vmatpush.msra.mxu0 %v2412_v25  ;;  %280 = vmatpush.msra.mxu3 %v2445_v40  ;;  %v32_v25 = vld [vmem:[%s5254_s2] sm:$0xff] }
  0x20   :  { %2857 = vmatpush.msra.mxu1 %v2411_v27  ;;  %2858 = vmatpush.msra.mxu2 %v2411_v27  ;;  %v162_v26 = vld [vmem:[%s5255_s0 + $0x3] sm:$0xff] }
  0x21   :  { %102 = vmatmul.f32.vlgmr.msra.gmra.mxu1 %v52_v28  ;;  %89 = vmatpush.msra.mxu0 %v2411_v27  ;;  %v2506_v27 = vld [vmem:[%s5254_s2 + $0x378] sm:$0xff]  ;;  %v23_v28 = vld [vmem:[%s5255_s0 + $0x1] sm:$0xff] }
  0x22   :  { %188 = vmatpush.msrb.mxu2 %v2442_v29  ;;  %118 = vmatpush.msrb.mxu1 %v47_v30  ;;  %v2461_v29 = vld [vmem:[%s5254_s2 + $0x210] sm:$0xff]  ;;  %v2490_v30 = vld [vmem:[%s5254_s2 + $0x2f8] sm:$0xff]  ;;  %v2519_v36 = vld [vmem:[%s5254_s2 + $0x3e0] sm:$0xff] }
  0x23   :  { %90 = vmatmul.f32.vlgmr.msra.gmra.mxu0 %v48_v32  ;;  %281 = vmatpush.msra.mxu3 %v2444_v52  ;;  %v2520_v32 = vld [vmem:[%s5254_s2 + $0x3e8] sm:$0xff]  ;;  %v2503_v40 = vld [vmem:[%s5254_s2 + $0x360] sm:$0xff]  ;;  %v2517_v52 = vld [vmem:[%s5254_s2 + $0x3d0] sm:$0xff] }
  0x24   :  { %189 = vmatpush.msrb.mxu2 %v2441_v31  ;;  %119 = vmatpush.msrb.mxu1 %v46_v33  ;;  %v2505_v31 = vld [vmem:[%s5254_s2 + $0x370] sm:$0xff]  ;;  %v2460_v33 = vld [vmem:[%s5254_s2 + $0x208] sm:$0xff] }
  0x25   :  { %346 = vmatpush.msrb.mxu0 %v2474_v34  ;;  %282 = vmatpush.msra.mxu3 %v2443_v56  ;;  %v2489_v34 = vld [vmem:[%s5254_s2 + $0x2f0] sm:$0xff]  ;;  %v2500_v56 = vld [vmem:[%s5254_s2 + $0x348] sm:$0xff] }
  0x26   :  { %190 = vmatpush.msrb.mxu2 %v2440_v35  ;;  %120 = vmatpush.msrb.mxu1 %v45_v37  ;;  %v2504_v35 = vld [vmem:[%s5254_s2 + $0x368] sm:$0xff]  ;;  %v2459_v37 = vld [vmem:[%s5254_s2 + $0x200] sm:$0xff] }
  0x27   :  { %347 = vmatpush.msrb.mxu0 %v2473_v38  ;;  %114 = vmatmul.f32.vlgmr.msra.gmra.mxu2 %v56_v62  ;;  %v2488_v38 = vld [vmem:[%s5254_s2 + $0x2e8] sm:$0xff] }
  0x28   :  { %191 = vmatpush.msrb.mxu2 %v2439_v39  ;;  %121 = vmatpush.msrb.mxu1 %v44_v41  ;;  %v320_v39 = vld [vmem:[%s5255_s0 + $0x8] sm:$0xff] }
  0x29   :  { %348 = vmatpush.msrb.mxu0 %v2472_v42  ;;  %105 = vmatmul.f32.gmra.mxu1 %v53_v43  ;;  %v163_v41 = vld [vmem:[%s5255_s0 + $0xb] sm:$0xff]  ;;  %v2538_v42 = vld [vmem:[%s5254_s2 + $0x478] sm:$0xff] }
  0x2a   :  { %192 = vmatpush.msrb.mxu2 %v2438_v44  ;;  %122 = vmatpush.msrb.mxu1 %v43_v45  ;;  %v3245_v43 = vld [vmem:[%s5255_s0 + $0x9] sm:$0xff]  ;;  %v3250_v44 = vld [vmem:[%s5255_s0 + $0x17] sm:$0xff] }
  0x2b   :  { %349 = vmatpush.msrb.mxu0 %v2471_v46  ;;  %283 = vmatmul.f32.vlgmr.msra.gmra.mxu3 %v241_v6  ;;  %v2537_v45 = vld [vmem:[%s5254_s2 + $0x470] sm:$0xff]  ;;  %v2487_v46 = vld [vmem:[%s5254_s2 + $0x2e0] sm:$0xff]  ;;  %v2484_v62 = vld [vmem:[%s5254_s2 + $0x2c8] sm:$0xff] }
  0x2c   :  { %193 = vmatpush.msrb.mxu2 %v2437_v47  ;;  %93 = vmatmul.f32.gmra.mxu0 %v49_v48  ;;  %v2502_v47 = vld [vmem:[%s5254_s2 + $0x358] sm:$0xff] }
  0x2d   :  { %123 = vmatpush.msrb.mxu1 %v42_v49  ;;  %350 = vmatpush.msrb.mxu0 %v2470_v50  ;;  %v2518_v48 = vld [vmem:[%s5254_s2 + $0x3d8] sm:$0xff]  ;;  %v2536_v49 = vld [vmem:[%s5254_s2 + $0x468] sm:$0xff] }
  0x2e   :  { %194 = vmatpush.msrb.mxu2 %v2436_v51  ;;  %583 = vmatpush.msrb.mxu3 %v2522_v10  ;;  %v2486_v50 = vld [vmem:[%s5254_s2 + $0x2d8] sm:$0xff]  ;;  %v2501_v51 = vld [vmem:[%s5254_s2 + $0x350] sm:$0xff]  ;;  %v2531_v10 = vld [vmem:[%s5254_s2 + $0x440] sm:$0xff] }
  0x2f   :  { %124 = vmatpush.msrb.mxu1 %v41_v53  ;;  %351 = vmatpush.msrb.mxu0 %v2469_v54  ;;  %v2535_v53 = vld [vmem:[%s5254_s2 + $0x460] sm:$0xff]  ;;  %v2485_v54 = vld [vmem:[%s5254_s2 + $0x2d0] sm:$0xff]  ;;  %v2482_v6 = vld [vmem:[%s5254_s2 + $0x2b8] sm:$0xff] }
  0x30   :  { %195 = vmatpush.msrb.mxu2 %v2435_v55  ;;  %584 = vmatpush.msrb.mxu3 %v2521_v16  ;;  %v321_v55 = vld [vmem:[%s5255_s0 + $0x10] sm:$0xff]  ;;  %v2530_v16 = vld [vmem:[%s5254_s2 + $0x438] sm:$0xff] }
  0x31   :  { %125 = vmatpush.msrb.mxu1 %v40_v57  ;;  %352 = vmatpush.msrb.mxu0 %v2468_v58  ;;  %v164_v57 = vld [vmem:[%s5255_s0 + $0x13] sm:$0xff] }
  0x32   :  { %108 = vmatmul.f32.gmra.mxu1 %v54_v59  ;;  %196 = vmatpush.msrb.mxu2 %v2434_v60  ;;  %v2534_v58 = vld [vmem:[%s5254_s2 + $0x458] sm:$0xff] }
  0x33   :  { %126 = vmatpush.msrb.mxu1 %v39_v61  ;;  %353 = vmatpush.msrb.mxu0 %v2467_v0  ;;  %v3299_v59 = vld [vmem:[%s5255_s0 + $0x11] sm:$0xff]  ;;  %v3304_v60 = vld [vmem:[%s5255_s0 + $0x1f] sm:$0xff]  ;;  %v2516_v61 = vld [vmem:[%s5254_s2 + $0x3c8] sm:$0xff] }
  0x34   :  { %197 = vmatpush.msrb.mxu2 %v2433_v63  ;;  %96 = vmatmul.f32.gmra.mxu0 %v50_v2  ;;  %v2499_v63 = vld [vmem:[%s5254_s2 + $0x340] sm:$0xff]  ;;  %v2533_v0 = vld [vmem:[%s5254_s2 + $0x450] sm:$0xff] }
  0x35   :  { %127 = vmatpush.msrb.mxu1 %v38_v1  ;;  %354 = vmatpush.msrb.mxu0 %v2466_v4  ;;  %v2515_v1 = vld [vmem:[%s5254_s2 + $0x3c0] sm:$0xff]  ;;  %v2532_v4 = vld [vmem:[%s5254_s2 + $0x448] sm:$0xff] }
  0x36   :  { %198 = vmatpush.msrb.mxu2 %v2432_v3  ;;  %286 = vmatmul.f32.gmra.mxu3 %v3185_v24  ;;  %v2483_v2 = vld [vmem:[%s5254_s2 + $0x2c0] sm:$0xff]  ;;  %v2498_v3 = vld [vmem:[%s5254_s2 + $0x338] sm:$0xff] }
  0x37   :  { %128 = vmatpush.msrb.mxu1 %v37_v5  ;;  %355 = vmatpush.msrb.mxu0 %v2465_v8  ;;  %v2514_v5 = vld [vmem:[%s5254_s2 + $0x3b8] sm:$0xff]  ;;  %v2497_v8 = vld [vmem:[%s5254_s2 + $0x330] sm:$0xff] }
  0x38   :  { %199 = vmatpush.msrb.mxu2 %v2431_v7  ;;  %585 = vmatpush.msrb.mxu3 %v2520_v32  ;;  %v322_v7 = vld [vmem:[%s5255_s0 + $0x18] sm:$0xff]  ;;  %v2493_v32 = vld [vmem:[%s5254_s2 + $0x310] sm:$0xff] }
  0x39   :  { %129 = vmatpush.msrb.mxu1 %v36_v9  ;;  %356 = vmatpush.msrb.mxu0 %v2464_v14  ;;  %v165_v9 = vld [vmem:[%s5255_s0 + $0x1b] sm:$0xff]  ;;  %v2481_v14 = vld [vmem:[%s5254_s2 + $0x2b0] sm:$0xff] }
  0x3a   :  { %111 = vmatmul.f32.gmra.mxu1 %v55_v11  ;;  %200 = vmatpush.msrb.mxu2 %v2430_v12  ;;  %v3353_v11 = vld [vmem:[%s5255_s0 + $0x19] sm:$0xff]  ;;  %v3358_v12 = vld [vmem:[%s5255_s0 + $0x27] sm:$0xff] }
  0x3b   :  { %130 = vmatpush.msrb.mxu1 %v35_v13  ;;  %357 = vmatpush.msrb.mxu0 %v2463_v18  ;;  %v2513_v13 = vld [vmem:[%s5254_s2 + $0x3b0] sm:$0xff]  ;;  %v2480_v18 = vld [vmem:[%s5254_s2 + $0x2a8] sm:$0xff] }
  0x3c   :  { %201 = vmatpush.msrb.mxu2 %v2429_v15  ;;  %99 = vmatmul.f32.gmra.mxu0 %v51_v20  ;;  %v2496_v15 = vld [vmem:[%s5254_s2 + $0x328] sm:$0xff]  ;;  %v2529_v20 = vld [vmem:[%s5254_s2 + $0x430] sm:$0xff] }
  0x3d   :  { %131 = vmatpush.msrb.mxu1 %v34_v17  ;;  %358 = vmatpush.msrb.mxu0 %v2462_v22  ;;  %v2512_v17 = vld [vmem:[%s5254_s2 + $0x3a8] sm:$0xff]  ;;  %v2479_v22 = vld [vmem:[%s5254_s2 + $0x2a0] sm:$0xff] }
  0x3e   :  { %202 = vmatpush.msrb.mxu2 %v2428_v19  ;;  %586 = vmatpush.msrb.mxu3 %v2519_v36  ;;  %v2495_v19 = vld [vmem:[%s5254_s2 + $0x320] sm:$0xff]  ;;  %v2492_v36 = vld [vmem:[%s5254_s2 + $0x308] sm:$0xff] }
  0x3f   :  { %132 = vmatpush.msrb.mxu1 %v33_v21  ;;  %359 = vmatpush.msrb.mxu0 %v2461_v29  ;;  %v2511_v21 = vld [vmem:[%s5254_s2 + $0x3a0] sm:$0xff]  ;;  %v3412_v29 = vld [vmem:[%s5255_s0 + $0x2f] sm:$0xff] }
  0x40   :  { %203 = vmatpush.msrb.mxu2 %v2427_v23  ;;  %289 = vmatmul.f32.gmra.mxu3 %v3250_v44  ;;  %v323_v23 = vld [vmem:[%s5255_s0 + $0x20] sm:$0xff] }
  0x41   :  { %133 = vmatpush.msrb.mxu1 %v32_v25  ;;  %204 = vmatmul.f32.vlgmr.msrb.gmra.mxu2 %v162_v26  ;;  %v2494_v25 = vld [vmem:[%s5254_s2 + $0x318] sm:$0xff]  ;;  %v166_v26 = vld [vmem:[%s5255_s0 + $0x23] sm:$0xff] }
  0x42   :  { %504 = vmatpush.msra.mxu2 %v2506_v27  ;;  %134 = vmatmul.f32.vlgmr.msrb.gmra.mxu1 %v23_v28  ;;  %v2528_v27 = vld [vmem:[%s5254_s2 + $0x428] sm:$0xff] }
  0x43   :  { %425 = vmatpush.msra.mxu1 %v2490_v30  ;;  %360 = vmatpush.msrb.mxu0 %v2460_v33  ;;  %v3407_v28 = vld [vmem:[%s5255_s0 + $0x21] sm:$0xff]  ;;  %v2510_v30 = vld [vmem:[%s5254_s2 + $0x398] sm:$0xff] }
  0x44   :  { %505 = vmatpush.msra.mxu2 %v2505_v31  ;;  %587 = vmatpush.msrb.mxu3 %v2518_v48  ;;  %v2478_v31 = vld [vmem:[%s5254_s2 + $0x298] sm:$0xff]  ;;  %v2527_v33 = vld [vmem:[%s5254_s2 + $0x420] sm:$0xff] }
  0x45   :  { %426 = vmatpush.msra.mxu1 %v2489_v34  ;;  %361 = vmatpush.msrb.mxu0 %v2459_v37  ;;  %v2509_v34 = vld [vmem:[%s5254_s2 + $0x390] sm:$0xff]  ;;  %v2526_v37 = vld [vmem:[%s5254_s2 + $0x418] sm:$0xff]  ;;  %v2507_v48 = vld [vmem:[%s5254_s2 + $0x380] sm:$0xff] }
  0x46   :  { %506 = vmatpush.msra.mxu2 %v2504_v35  ;;  %362 = vmatmul.f32.vlgmr.msrb.gmra.mxu0 %v320_v39  ;;  %v2477_v35 = vld [vmem:[%s5254_s2 + $0x290] sm:$0xff]  ;;  %v2476_v39 = vld [vmem:[%s5254_s2 + $0x288] sm:$0xff] }
  0x47   :  { %427 = vmatpush.msra.mxu1 %v2488_v38  ;;  %662 = vmatpush.msra.mxu0 %v2538_v42  ;;  %v2508_v38 = vld [vmem:[%s5254_s2 + $0x388] sm:$0xff] }
  0x48   :  { %507 = vmatpush.msra.mxu2 %v2503_v40  ;;  %588 = vmatpush.msrb.mxu3 %v2517_v52  ;;  %v324_v40 = vld [vmem:[%s5255_s0 + $0x28] sm:$0xff]  ;;  %v325_v52 = vld [vmem:[%s5255_s0 + $0x30] sm:$0xff] }
  0x49   :  { %207 = vmatmul.f32.gmra.mxu2 %v163_v41  ;;  %663 = vmatpush.msra.mxu0 %v2537_v45  ;;  %v2491_v41 = vld [vmem:[%s5254_s2 + $0x300] sm:$0xff]  ;;  %v167_v42 = vld [vmem:[%s5255_s0 + $0x2b] sm:$0xff] }
  0x4a   :  { %137 = vmatmul.f32.gmra.mxu1 %v3245_v43  ;;  %508 = vmatpush.msra.mxu2 %v2502_v47  ;;  %v2525_v45 = vld [vmem:[%s5254_s2 + $0x410] sm:$0xff] }
  0x4b   :  { %428 = vmatpush.msra.mxu1 %v2487_v46  ;;  %664 = vmatpush.msra.mxu0 %v2536_v49  ;;  %v3461_v46 = vld [vmem:[%s5255_s0 + $0x29] sm:$0xff]  ;;  %v3466_v47 = vld [vmem:[%s5255_s0 + $0x37] sm:$0xff]  ;;  %v2475_v49 = vld [vmem:[%s5254_s2 + $0x280] sm:$0xff] }
  0x4c   :  { %509 = vmatpush.msra.mxu2 %v2501_v51  ;;  %292 = vmatmul.f32.gmra.mxu3 %v3304_v60  ;;  %v2523_v51 = vld [vmem:[%s5254_s2 + $0x400] sm:$0xff] }
  0x4d   :  { %429 = vmatpush.msra.mxu1 %v2486_v50  ;;  %665 = vmatpush.msra.mxu0 %v2535_v53  ;;  %v2524_v50 = vld [vmem:[%s5254_s2 + $0x408] sm:$0xff]  ;;  %v168_v53 = vld [vmem:[%s5255_s0 + $0x33] sm:$0xff] }
  0x4e   :  { %365 = vmatmul.f32.gmra.mxu0 %v321_v55  ;;  %510 = vmatpush.msra.mxu2 %v2500_v56  ;;  %v3496_v55 = vld [vmem:[%s5255_s0 + $0x3f] sm:$0xff] }
  0x4f   :  { %430 = vmatpush.msra.mxu1 %v2485_v54  ;;  %666 = vmatpush.msra.mxu0 %v2534_v58  ;;  %v3491_v54 = vld [vmem:[%s5255_s0 + $0x31] sm:$0xff]  ;;  %v728_v56 = vld [vmem:[%s5256_s1] sm:$0xff] }
  0x50   :  { %589 = vmatpush.msrb.mxu3 %v2516_v61  ;;  %511 = vmatpush.msra.mxu2 %v2499_v63  ;;  %v326_v58 = vld [vmem:[%s5255_s0 + $0x38] sm:$0xff]  ;;  %v3517_v63 = vld [vmem:[%s5255_s0 + $0x47] sm:$0xff] }
  0x51   :  { %210 = vmatmul.f32.gmra.mxu2 %v164_v57  ;;  %431 = vmatpush.msra.mxu1 %v2484_v62  ;;  %v2881_v57 = vmov 0   ;;  %v169_v61 = vld [vmem:[%s5255_s0 + $0x3b] sm:$0xff] }
  0x52   :  { %140 = vmatmul.f32.gmra.mxu1 %v3299_v59  ;;  %667 = vmatpush.msra.mxu0 %v2533_v0  ;;  %v3512_v62 = vld [vmem:[%s5255_s0 + $0x39] sm:$0xff]  ;;  %v729_v0 = vld [vmem:[%s5256_s1 + $0x8] sm:$0xff] }
  0x53   :  { %590 = vmatpush.msrb.mxu3 %v2515_v1  ;;  %432 = vmatpush.msra.mxu1 %v2483_v2  ;;  %v327_v1 = vld [vmem:[%s5255_s0 + $0x40] sm:$0xff] }
  0x54   :  { %512 = vmatpush.msra.mxu2 %v2498_v3  ;;  %668 = vmatpush.msra.mxu0 %v2532_v4  ;;  %v170_v2 = vld [vmem:[%s5255_s0 + $0x43] sm:$0xff]  ;;  %v557_v4 = vld [vmem:[%s5255_s0 + $0xe] sm:$0xff] }
  0x55   :  { %591 = vmatpush.msrb.mxu3 %v2514_v5  ;;  %433 = vmatpush.msra.mxu1 %v2482_v6  ;;  %v3533_v3 = vld [vmem:[%s5255_s0 + $0x41] sm:$0xff]  ;;  %v730_v5 = vld [vmem:[%s5256_s1 + $0x10] sm:$0xff] }
  0x56   :  { %368 = vmatmul.f32.gmra.mxu0 %v322_v7  ;;  %513 = vmatpush.msra.mxu2 %v2497_v8  ;;  %v734_v6 = vld [vmem:[%s5256_s1 + $0x30] sm:$0xff]  ;;  %v328_v7 = vld [vmem:[%s5255_s0 + $0x48] sm:$0xff] }
  0x57   :  { %669 = vmatpush.msra.mxu0 %v2531_v10  ;;  %295 = vmatmul.f32.gmra.mxu3 %v3358_v12  ;;  %v478_v8 = vld [vmem:[%s5255_s0 + $0xd] sm:$0xff]  ;;  %v731_v10 = vld [vmem:[%s5256_s1 + $0x18] sm:$0xff] }
  0x58   :  { %592 = vmatpush.msrb.mxu3 %v2513_v13  ;;  %434 = vmatpush.msra.mxu1 %v2481_v14  ;;  %v479_v13 = vld [vmem:[%s5255_s0 + $0x15] sm:$0xff]  ;;  %v559_v14 = vld [vmem:[%s5255_s0 + $0x1e] sm:$0xff] }
  0x59   :  { %213 = vmatmul.f32.gmra.mxu2 %v165_v9  ;;  %670 = vmatpush.msra.mxu0 %v2530_v16  ;;  %v558_v9 = vld [vmem:[%s5255_s0 + $0x16] sm:$0xff]  ;;  %v560_v16 = vld [vmem:[%s5255_s0 + $0x26] sm:$0xff] }
  0x5a   :  { %143 = vmatmul.f32.gmra.mxu1 %v3353_v11  ;;  %514 = vmatpush.msra.mxu2 %v2496_v15  ;;  %v480_v15 = vld [vmem:[%s5255_s0 + $0x1d] sm:$0xff] }
  0x5b   :  { %593 = vmatpush.msrb.mxu3 %v2512_v17  ;;  %435 = vmatpush.msra.mxu1 %v2480_v18  ;;  %v561_v17 = vld [vmem:[%s5255_s0 + $0x2e] sm:$0xff] }
  0x5c   :  { %515 = vmatpush.msra.mxu2 %v2495_v19  ;;  %671 = vmatpush.msra.mxu0 %v2529_v20  ;;  %v562_v19 = vld [vmem:[%s5255_s0 + $0x36] sm:$0xff]  ;;  %v732_v20 = vld [vmem:[%s5256_s1 + $0x20] sm:$0xff] }
  0x5d   :  { %594 = vmatpush.msrb.mxu3 %v2511_v21  ;;  %436 = vmatpush.msra.mxu1 %v2479_v22  ;;  %v483_v21 = vld [vmem:[%s5255_s0 + $0x35] sm:$0xff] }
  0x5e   :  { %371 = vmatmul.f32.gmra.mxu0 %v323_v23  ;;  %516 = vmatpush.msra.mxu2 %v2494_v25  ;;  %v733_v23 = vld [vmem:[%s5256_s1 + $0x28] sm:$0xff] }
  0x5f   :  { %672 = vmatpush.msra.mxu0 %v2528_v27  ;;  %298 = vmatmul.f32.gmra.mxu3 %v3412_v29 }
  0x60   :  { %595 = vmatpush.msrb.mxu3 %v2510_v30  ;;  %437 = vmatpush.msra.mxu1 %v2478_v31  ;;  %v736_v30 = vld [vmem:[%s5256_s1 + $0x40] sm:$0xff] }
  0x61   :  { %216 = vmatmul.f32.gmra.mxu2 %v166_v26  ;;  %673 = vmatpush.msra.mxu0 %v2527_v33  ;;  %v484_v26 = vld [vmem:[%s5255_s0 + $0x3d] sm:$0xff] }
  0x62   :  { %146 = vmatmul.f32.gmra.mxu1 %v3407_v28  ;;  %517 = vmatpush.msra.mxu2 %v2493_v32 }
  0x63   :  { %596 = vmatpush.msrb.mxu3 %v2509_v34  ;;  %438 = vmatpush.msra.mxu1 %v2477_v35  ;;  %v485_v34 = vld [vmem:[%s5255_s0 + $0x45] sm:$0xff] }
  0x64   :  { %518 = vmatpush.msra.mxu2 %v2492_v36  ;;  %674 = vmatpush.msra.mxu0 %v2526_v37  ;;  %v565_v36 = vld [vmem:[%s5255_s0 + $0x4e] sm:$0xff] }
  0x65   :  { %597 = vmatpush.msrb.mxu3 %v2508_v38  ;;  %439 = vmatpush.msra.mxu1 %v2476_v39  ;;  %v2553_v37 = vld [vmem:[%s5258_s4 + $0xf0] sm:$0xff]  ;;  %v2552_v38 = vld [vmem:[%s5258_s4 + $0xe8] sm:$0xff] }
  0x66   :  { %374 = vmatmul.f32.gmra.mxu0 %v324_v40  ;;  %519 = vmatpush.msra.mxu2 %v2491_v41 }
  0x67   :  { %675 = vmatpush.msra.mxu0 %v2525_v45  ;;  %301 = vmatmul.f32.gmra.mxu3 %v3466_v47 }
  0x68   :  { %598 = vmatpush.msrb.mxu3 %v2507_v48  ;;  %440 = vmatpush.msra.mxu1 %v2475_v49  ;;  %v2550_v48 = vld [vmem:[%s5258_s4 + $0xd8] sm:$0xff] }
  0x69   :  { %219 = vmatmul.f32.gmra.mxu2 %v167_v42  ;;  %676 = vmatpush.msra.mxu0 %v2524_v50  ;;  %v486_v42 = vld [vmem:[%s5255_s0 + $0x4d] sm:$0xff] }
  0x6a   :  { %149 = vmatmul.f32.gmra.mxu1 %v3461_v46  ;;  %2877 = vset.pattern.permute.xlu0 %v2881_v57 }
  0x6b   :  { %677 = vmatpush.msra.mxu0 %v2523_v51  ;;  %2878 = vset.pattern.permute.xlu1 %v2881_v57  ;;  %v644_v51 = vld [vmem:[%s5255_s0 + $0x4f] sm:$0xff] }
  0x6c   :  { %759 = vperm.xlu0 %2877, %v728_v56   ;;  %2879 = vset.pattern.permute.xlu2 %v2881_v57 }
  0x6d   :  { %769 = vperm.xlu1 %2878, %v730_v5   ;;  %779 = vperm.xlu2 %2879, %v732_v20   ;;  %v844_v5 = vld [vmem:[%s5258_s4 + $0x78] sm:$0xff]  ;;  %v2567_v20 = vld [vmem:[%s5258_s4 + $0x160] sm:$0xff] }
  0x6e   :  { %377 = vmatmul.f32.gmra.mxu0 %v325_v52  ;;  %915 = vmatpush.msrb.mxu2 %v844_v5  ;;  %v2578_v5 = vld [vmem:[%s5258_s4 + $0x1b8] sm:$0xff] }
  0x6f   :  { %304 = vmatmul.f32.gmra.mxu3 %v3496_v55 }
  0x71   :  { %222 = vmatmul.f32.gmra.mxu2 %v168_v53 }
  0x72   :  { %152 = vmatmul.f32.gmra.mxu1 %v3491_v54 }
  0x74   :  { %764 = vperm.xlu0 %2877, %v729_v0  }
  0x75   :  { %774 = vperm.xlu1 %2878, %v731_v10   ;;  %784 = vperm.xlu2 %2879, %v733_v23   ;;  %v2585_v10 = vld [vmem:[%s5258_s4 + $0x1f0] sm:$0xff]  ;;  %v2566_v23 = vld [vmem:[%s5258_s4 + $0x158] sm:$0xff] }
  0x76   :  { %380 = vmatmul.f32.gmra.mxu0 %v326_v58  ;;  %v2548_v58 = vld [vmem:[%s5258_s4 + $0xc8] sm:$0xff] }
  0x77   :  { %307 = vmatmul.f32.gmra.mxu3 %v3517_v63 }
  0x79   :  { %225 = vmatmul.f32.gmra.mxu2 %v169_v61 }
  0x7a   :  { %155 = vmatmul.f32.gmra.mxu1 %v3512_v62 }
  0x7c   :  { %789 = vperm.xlu0 %2877, %v734_v6   ;;  %v2570_v6 = vld [vmem:[%s5258_s4 + $0x178] sm:$0xff] }
  0x7d   :  { %799 = vperm.xlu2 %2879, %v736_v30   ;;  %985 = vmatpush.msra.mxu3 %v2570_v6  ;;  %v2565_v30 = vld [vmem:[%s5258_s4 + $0x150] sm:$0xff] }
  0x7e   :  { %383 = vmatmul.f32.gmra.mxu0 %v327_v1  ;;  %v835_v6 = vld [vmem:[%s5258_s4 + $0x30] sm:$0xff] }
  0x7f   :  { %599 = vmatmul.f32.vlgmr.msrb.gmra.mxu3 %v557_v4  ;;  %v2545_v4 = vld [vmem:[%s5258_s4 + $0xb0] sm:$0xff] }
  0x81   :  { %228 = vmatmul.f32.gmra.mxu2 %v170_v2  ;;  %v2546_v2 = vld [vmem:[%s5258_s4 + $0xb8] sm:$0xff] }
  0x82   :  { %158 = vmatmul.f32.gmra.mxu1 %v3533_v3 }
  0x86   :  { %386 = vmatmul.f32.gmra.mxu0 %v328_v7  ;;  %v2586_v7 = vld [vmem:[%s5258_s4 + $0x1f8] sm:$0xff] }
  0x87   :  { %602 = vmatmul.f32.gmra.mxu3 %v558_v9  ;;  %1064 = vmatpush.msrb.mxu0 %v2586_v7  ;;  %v2569_v9 = vld [vmem:[%s5258_s4 + $0x170] sm:$0xff] }
  0x88   :  { %986 = vmatpush.msra.mxu3 %v2569_v9  ;;  %v2561_v7 = vld [vmem:[%s5258_s4 + $0x130] sm:$0xff] }
  0x89   :  { %520 = vmatmul.f32.vlgmr.msra.gmra.mxu2 %v478_v8  ;;  %v843_v8 = vld [vmem:[%s5258_s4 + $0x70] sm:$0xff]  ;;  %1065 = vmatpush.msrb.mxu0 %v2585_v10  ;;  %v2882_v10 = vmov 0.0  }
  0x8a   :  { %441 = vmatmul.f32.vlgmr.msra.gmra.mxu1 %v3245_v43  ;;  %v735_v43 = vld [vmem:[%s5256_s1 + $0x38] sm:$0xff]  ;;  %916 = vmatpush.msrb.mxu2 %v843_v8  ;;  %v2577_v8 = vld [vmem:[%s5258_s4 + $0x1b0] sm:$0xff]  ;;  %737 = vst [vmem:[#allocation2] sm:$0xff] %v2882_v10 }
  0x8b   :  { %794 = vperm.xlu1 %2878, %v735_v43   ;;  %747 = vst [vmem:[#allocation2 + $0x50] sm:$0xff] %v2882_v10  ;;  %v2555_v10 = vld [vmem:[%s5258_s4 + $0x100] sm:$0xff] }
  0x8e   :  { %678 = vmatmul.f32.vlgmr.msra.gmra.mxu0 %v3185_v24  ;;  %v481_v24 = vld [vmem:[%s5255_s0 + $0x25] sm:$0xff] }
  0x8f   :  { %605 = vmatmul.f32.gmra.mxu3 %v559_v14 }
  0x91   :  { %523 = vmatmul.f32.gmra.mxu2 %v479_v13 }
  0x92   :  { %444 = vmatmul.f32.gmra.mxu1 %v3299_v59 }
  0x96   :  { %681 = vmatmul.f32.gmra.mxu0 %v3250_v44  ;;  %v482_v44 = vld [vmem:[%s5255_s0 + $0x2d] sm:$0xff] }
  0x97   :  { %608 = vmatmul.f32.gmra.mxu3 %v560_v16  ;;  %v2568_v16 = vld [vmem:[%s5258_s4 + $0x168] sm:$0xff] }
  0x98   :  { %987 = vmatpush.msra.mxu3 %v2568_v16 }
  0x99   :  { %526 = vmatmul.f32.gmra.mxu2 %v480_v15  ;;  %v842_v15 = vld [vmem:[%s5258_s4 + $0x68] sm:$0xff] }
  0x9a   :  { %447 = vmatmul.f32.gmra.mxu1 %v3353_v11  ;;  %917 = vmatpush.msrb.mxu2 %v842_v15 }
  0x9b   :  { %988 = vmatpush.msra.mxu3 %v2567_v20 }
  0x9d   :  { %989 = vmatpush.msra.mxu3 %v2566_v23  ;;  %v2575_v23 = vld [vmem:[%s5258_s4 + $0x1a0] sm:$0xff] }
  0x9e   :  { %v3580_v59 = vpop.f32.mrf.mxu1  ;;  %684 = vmatmul.f32.gmra.mxu0 %v3304_v60 }
  0x9f   :  { %611 = vmatmul.f32.gmra.mxu3 %v561_v17 }
  0xa0   :  { %v3586_v18 = vpop.f32.mrf.mxu0  ;;  %990 = vmatpush.msra.mxu3 %v2565_v30  ;;  %v2574_v30 = vld [vmem:[%s5258_s4 + $0x198] sm:$0xff] }
  0xa1   :  { %529 = vmatmul.f32.gmra.mxu2 %v481_v24  ;;  %v2584_v24 = vld [vmem:[%s5258_s4 + $0x1e8] sm:$0xff] }
  0xa2   :  { %450 = vmatmul.f32.gmra.mxu1 %v3407_v28  ;;  %v564_v28 = vld [vmem:[%s5255_s0 + $0x46] sm:$0xff]  ;;  %1066 = vmatpush.msrb.mxu0 %v2584_v24 }
  0xa3   :  { %v834_v24 = vld [vmem:[%s5258_s4 + $0x28] sm:$0xff] }
  0xa6   :  { %v3592_v11 = vpop.f32.mrf.mxu1  ;;  %687 = vmatmul.f32.gmra.mxu0 %v3358_v12  ;;  %v563_v12 = vld [vmem:[%s5255_s0 + $0x3e] sm:$0xff] }
  0xa7   :  { %614 = vmatmul.f32.gmra.mxu3 %v562_v19  ;;  %v841_v19 = vld [vmem:[%s5258_s4 + $0x60] sm:$0xff] }
  0xa8   :  { %918 = vmatpush.msrb.mxu2 %v841_v19  ;;  %v2576_v19 = vld [vmem:[%s5258_s4 + $0x1a8] sm:$0xff] }
  0xa9   :  { %532 = vmatmul.f32.gmra.mxu2 %v482_v44  ;;  %v3598_v60 = vpop.f32.mrf.mxu0  ;;  %v2544_v44 = vld [vmem:[%s5258_s4 + $0xa8] sm:$0xff] }
  0xaa   :  { %453 = vmatmul.f32.gmra.mxu1 %v3461_v46  ;;  %v3635_v31 = vpop.f32.mrf.mxu2  ;;  %v407_v46 = vld [vmem:[%s5255_s0 + $0x49] sm:$0xff] }
  0xae   :  { %690 = vmatmul.f32.gmra.mxu0 %v3412_v29  ;;  %v2554_v29 = vld [vmem:[%s5258_s4 + $0xf8] sm:$0xff]  ;;  %v3637_v32 = vpop.f32.mrf.mxu3 }
  0xaf   :  { %v3607_v22 = vpop.f32.mrf.mxu1  ;;  %617 = vmatmul.f32.gmra.mxu3 %v563_v12  ;;  %871 = vmatpush.msrb.mxu1 %v2554_v29  ;;  %v840_v12 = vld [vmem:[%s5258_s4 + $0x58] sm:$0xff]  ;;  %v839_v29 = vld [vmem:[%s5258_s4 + $0x50] sm:$0xff] }
  0xb0   :  { %919 = vmatpush.msrb.mxu2 %v840_v12  ;;  %v2559_v12 = vld [vmem:[%s5258_s4 + $0x120] sm:$0xff] }
  0xb1   :  { %535 = vmatmul.f32.gmra.mxu2 %v483_v21  ;;  %v3617_v25 = vpop.f32.mrf.mxu0  ;;  %872 = vmatpush.msrb.mxu1 %v2553_v37  ;;  %v2583_v21 = vld [vmem:[%s5258_s4 + $0x1e0] sm:$0xff] }
  0xb2   :  { %456 = vmatmul.f32.gmra.mxu1 %v3491_v54  ;;  %v2549_v54 = vld [vmem:[%s5258_s4 + $0xd0] sm:$0xff]  ;;  %1067 = vmatpush.msrb.mxu0 %v2583_v21  ;;  %v833_v21 = vld [vmem:[%s5258_s4 + $0x20] sm:$0xff] }
  0xb3   :  { %873 = vmatpush.msrb.mxu1 %v2552_v38  ;;  %920 = vmatpush.msrb.mxu2 %v839_v29  ;;  %v2558_v29 = vld [vmem:[%s5258_s4 + $0x118] sm:$0xff] }
  0xb6   :  { %693 = vmatmul.f32.gmra.mxu0 %v3466_v47  ;;  %v2551_v47 = vld [vmem:[%s5258_s4 + $0xe0] sm:$0xff] }
  0xb7   :  { %v3622_v27 = vpop.f32.mrf.mxu1  ;;  %620 = vmatmul.f32.gmra.mxu3 %v564_v28  ;;  %874 = vmatpush.msrb.mxu1 %v2551_v47  ;;  %v2543_v28 = vld [vmem:[%s5258_s4 + $0xa0] sm:$0xff]  ;;  %v2580_v47 = vld [vmem:[%s5258_s4 + $0x1c8] sm:$0xff] }
  0xb9   :  { %538 = vmatmul.f32.gmra.mxu2 %v484_v26  ;;  %v3639_v33 = vpop.f32.mrf.mxu0  ;;  %v3657_v39 = vpop.f32.mrf.mxu3  ;;  %875 = vmatpush.msrb.mxu1 %v2550_v48  ;;  %v2582_v26 = vld [vmem:[%s5258_s4 + $0x1d8] sm:$0xff] }
  0xba   :  { %459 = vmatmul.f32.gmra.mxu1 %v3512_v62  ;;  %v2547_v62 = vld [vmem:[%s5258_s4 + $0xc0] sm:$0xff]  ;;  %1068 = vmatpush.msrb.mxu0 %v2582_v26  ;;  %v2541_v26 = vld [vmem:[%s5258_s4 + $0x90] sm:$0xff] }
  0xbb   :  { %876 = vmatpush.msrb.mxu1 %v2549_v54  ;;  %v2563_v54 = vld [vmem:[%s5258_s4 + $0x140] sm:$0xff] }
  0xbd   :  { %877 = vmatpush.msrb.mxu1 %v2548_v58  ;;  %v2579_v58 = vld [vmem:[%s5258_s4 + $0x1c0] sm:$0xff] }
  0xbe   :  { %696 = vmatmul.f32.gmra.mxu0 %v3496_v55 }
  0xbf   :  { %v3644_v35 = vpop.f32.mrf.mxu1  ;;  %623 = vmatmul.f32.gmra.mxu3 %v565_v36  ;;  %878 = vmatpush.msrb.mxu1 %v2547_v62  ;;  %v2542_v62 = vld [vmem:[%s5258_s4 + $0x98] sm:$0xff] }
  0xc1   :  { %541 = vmatmul.f32.gmra.mxu2 %v485_v34  ;;  %879 = vmatpush.msrb.mxu1 %v2546_v2  ;;  %v2581_v34 = vld [vmem:[%s5258_s4 + $0x1d0] sm:$0xff]  ;;  %v836_v2 = vld [vmem:[%s5258_s4 + $0x38] sm:$0xff] }
  0xc2   :  { %462 = vmatmul.f32.gmra.mxu1 %v3533_v3  ;;  %1069 = vmatpush.msrb.mxu0 %v2581_v34  ;;  %v831_v34 = vld [vmem:[%s5258_s4 + $0x10] sm:$0xff] }
  0xc3   :  { %v3661_v41 = vpop.f32.mrf.mxu0  ;;  %v3685_v52 = vpop.f32.mrf.mxu3  ;;  %880 = vmatpush.msrb.mxu1 %v2545_v4  ;;  %v2562_v4 = vld [vmem:[%s5258_s4 + $0x138] sm:$0xff] }
  0xc4   :  { %v3659_v40 = vpop.f32.mrf.mxu2  ;;  %1070 = vmatpush.msrb.mxu0 %v2580_v47 }
  0xc5   :  { %881 = vmatpush.msrb.mxu1 %v2544_v44  ;;  %v2560_v44 = vld [vmem:[%s5258_s4 + $0x128] sm:$0xff] }
  0xc6   :  { %699 = vmatmul.f32.gmra.mxu0 %v3517_v63 }
  0xc7   :  { %v3666_v45 = vpop.f32.mrf.mxu1  ;;  %882 = vmatpush.msrb.mxu1 %v2543_v28  ;;  %1071 = vmatpush.msrb.mxu0 %v2579_v58  ;;  %v832_v28 = vld [vmem:[%s5258_s4 + $0x18] sm:$0xff]  ;;  %v2540_v58 = vld [vmem:[%s5258_s4 + $0x88] sm:$0xff] }
  0xc9   :  { %544 = vmatmul.f32.gmra.mxu2 %v486_v42  ;;  %v838_v42 = vld [vmem:[%s5258_s4 + $0x48] sm:$0xff]  ;;  %883 = vmatpush.msrb.mxu1 %v2542_v62 }
  0xca   :  { %465 = vmatmul.f32.gmra.mxu1 %v407_v46  ;;  %v2564_v46 = vld [vmem:[%s5258_s4 + $0x148] sm:$0xff]  ;;  %921 = vmatpush.msrb.mxu2 %v838_v42  ;;  %v2557_v42 = vld [vmem:[%s5258_s4 + $0x110] sm:$0xff] }
  0xcb   :  { %v3680_v50 = vpop.f32.mrf.mxu0  ;;  %991 = vmatpush.msra.mxu3 %v2564_v46  ;;  %1072 = vmatpush.msrb.mxu0 %v2578_v5  ;;  %v2573_v46 = vld [vmem:[%s5258_s4 + $0x190] sm:$0xff]  ;;  %v830_v62 = vld [vmem:[%s5258_s4 + $0x8] sm:$0xff]  ;;  %v136_v5 = vadd.f32 %v3644_v35, %v3586_v18  ;;  %v2571_v18 = vld [vmem:[%s5258_s4 + $0x180] sm:$0xff] }
  0xcc   :  { %v3678_v49 = vpop.f32.mrf.mxu2  ;;  %884 = vmatpush.msrb.mxu1 %v2541_v26 }
  0xcd   :  { %992 = vmatpush.msra.mxu3 %v2563_v54  ;;  %1073 = vmatpush.msrb.mxu0 %v2577_v8  ;;  %v829_v8 = vld [vmem:[%s5258_s4] sm:$0xff]  ;;  %v232_v35 = vadd.f32 %v3659_v40, %v136_v5  ;;  %v2602_v40 = vld [vmem:[%s5258_s4 + $0x278] sm:$0xff] }
  0xce   :  { %702 = vmatmul.f32.gmra.mxu0 %v644_v51  ;;  %v837_v51 = vld [vmem:[%s5258_s4 + $0x40] sm:$0xff]  ;;  %885 = vmatpush.msrb.mxu1 %v2540_v58 }
  0xcf   :  { %v3687_v53 = vpop.f32.mrf.mxu1  ;;  %v3696_v57 = vpop.f32.mrf.mxu3  ;;  %922 = vmatpush.msrb.mxu2 %v837_v51  ;;  %993 = vmatpush.msra.mxu3 %v2562_v4  ;;  %v2572_v4 = vld [vmem:[%s5258_s4 + $0x188] sm:$0xff]  ;;  %v3938_v58 = vld [vmem:[%s5257_s3] ss:$0 sm:$0xff] }
  0xd0   :  { %1074 = vmatpush.msrb.mxu0 %v2576_v19 }
  0xd1   :  { %923 = vmatpush.msrb.mxu2 %v836_v2  ;;  %994 = vmatpush.msra.mxu3 %v2561_v7  ;;  %v2556_v2 = vld [vmem:[%s5258_s4 + $0x108] sm:$0xff]  ;;  %v2539_v7 = vld [vmem:[%s5258_s4 + $0x80] sm:$0xff] }
  0xd2   :  { %1075 = vmatpush.msrb.mxu0 %v2575_v23  ;;  %886 = vmatpush.msrb.mxu1 %v2539_v7 }
  0xd3   :  { %v3694_v56 = vpop.f32.mrf.mxu0  ;;  %924 = vmatpush.msrb.mxu2 %v835_v6  ;;  %995 = vmatpush.msra.mxu3 %v2560_v44  ;;  %v311_v44 = vadd.f32 %v3637_v32, %v232_v35 }
  0xd4   :  { %v3692_v55 = vpop.f32.mrf.mxu2  ;;  %1076 = vmatpush.msrb.mxu0 %v2574_v30  ;;  %1143 = vmatpush.msra.mxu1 %v2602_v40  ;;  %v2598_v40 = vld [vmem:[%s5258_s4 + $0x258] sm:$0xff] }
  0xd5   :  { %925 = vmatpush.msrb.mxu2 %v834_v24  ;;  %996 = vmatpush.msra.mxu3 %v2559_v12  ;;  %v139_v12 = vadd.f32 %v3666_v45, %v3598_v60  ;;  %v390_v26 = vadd.f32 %v3661_v41, %v311_v44  ;;  %v142_v41 = vadd.f32 %v3687_v53, %v3617_v25  ;;  %v2599_v25 = vld [vmem:[%s5258_s4 + $0x260] sm:$0xff] }
  0xd6   :  { %1077 = vmatpush.msrb.mxu0 %v2573_v46 }
  0xd7   :  { %v3701_v61 = vpop.f32.mrf.mxu1  ;;  %926 = vmatpush.msrb.mxu2 %v833_v21  ;;  %997 = vmatpush.msra.mxu3 %v2558_v29  ;;  %v2601_v29 = vld [vmem:[%s5258_s4 + $0x270] sm:$0xff] }
  0xd8   :  { %1078 = vmatpush.msrb.mxu0 %v2572_v4  ;;  %1144 = vmatpush.msra.mxu1 %v2601_v29  ;;  %v145_v44 = vadd.f32 %v3701_v61, %v3639_v33 }
  0xd9   :  { %927 = vmatpush.msrb.mxu2 %v832_v28  ;;  %998 = vmatpush.msra.mxu3 %v2557_v42  ;;  %v233_v28 = vadd.f32 %v3678_v49, %v139_v12 }
  0xda   :  { %v3710_v1 = vpop.f32.mrf.mxu3  ;;  %1079 = vmatpush.msrb.mxu0 %v2571_v18 }
  0xdb   :  { %v3708_v0 = vpop.f32.mrf.mxu0  ;;  %928 = vmatpush.msrb.mxu2 %v831_v34  ;;  %999 = vmatpush.msra.mxu3 %v2556_v2  ;;  %v312_v34 = vadd.f32 %v3657_v39, %v233_v28  ;;  %v234_v2 = vadd.f32 %v3692_v55, %v142_v41  ;;  %v2600_v39 = vld [vmem:[%s5258_s4 + $0x268] sm:$0xff] }
  0xdc   :  { %v3706_v63 = vpop.f32.mrf.mxu2  ;;  %1145 = vmatpush.msra.mxu1 %v2600_v39 }
  0xdd   :  { %929 = vmatpush.msrb.mxu2 %v830_v62  ;;  %1000 = vmatpush.msra.mxu3 %v2555_v10  ;;  %v391_v62 = vadd.f32 %v3680_v50, %v312_v34  ;;  %v313_v50 = vadd.f32 %v3685_v52, %v234_v2  ;;  %v235_v28 = vadd.f32 %v3706_v63, %v145_v44 }
  0xde   :  { %v3951_v7 = vpop.permute.xlu0 %759  ;;  %1146 = vmatpush.msra.mxu1 %v2599_v25 }
  0xdf   :  { %v3715_v3 = vpop.f32.mrf.mxu1  ;;  %930 = vmatpush.msrb.mxu2 %v829_v8 }
  0xe0   :  { %1147 = vmatpush.msra.mxu1 %v2598_v40 }
  0xe2   :  { %v3742_v43 = vpop.f32.mrf.mxu3 }
  0xe3   :  { %v3740_v14 = vpop.f32.mrf.mxu0 }
  0xe4   :  { %v3738_v13 = vpop.f32.mrf.mxu2 }
  0xe7   :  { %v3753_v17 = vpop.f32.mrf.mxu1 }
  0xe8   :  { %v151_v44 = vadd.f32 %v3753_v17, %v3592_v11  ;;  %v2595_v17 = vld [vmem:[%s5258_s4 + $0x240] sm:$0xff] }
  0xea   :  { %v3792_v38 = vpop.f32.mrf.mxu3 }
  0xeb   :  { %v3790_v37 = vpop.f32.mrf.mxu0 }
  0xec   :  { %v3788_v36 = vpop.f32.mrf.mxu2 }
  0xef   :  { %v3803_v48 = vpop.f32.mrf.mxu1 }
  0xf2   :  { %v3839_v16 = vpop.f32.mrf.mxu3 }
  0xf3   :  { %v3837_v15 = vpop.f32.mrf.mxu0 }
  0xf4   :  { %v3835_v9 = vpop.f32.mrf.mxu2 }
  0xf7   :  { %v3850_v20 = vpop.f32.mrf.mxu1 }
  0xfa   :  { %v3886_v54 = vpop.f32.mrf.mxu3 }
  0xfb   :  { %v3884_v51 = vpop.f32.mrf.mxu0 }
  0xfc   :  { %v3882_v47 = vpop.f32.mrf.mxu2 }
  0xff   :  { %v3902_v6 = vpop.f32.mrf.mxu1 }
 0x102   :  { %v600_v21 = vpop.f32.mrf.mxu3 }
 0x103   :  { %v3920_v19 = vpop.f32.mrf.mxu0 }
 0x104   :  { %v3917_v24 = vpop.f32.mrf.mxu2 }
 0x107   :  { %v442_v23 = vpop.f32.mrf.mxu1 }
 0x108   :  { %v469_v32 = vadd.f32 %v442_v23, %v390_v26  ;;  %v392_v26 = vadd.f32 %v3694_v56, %v313_v50 }
 0x10a   :  { %v603_v42 = vpop.f32.mrf.mxu3 }
 0x10b   :  { %v679_v45 = vpop.f32.mrf.mxu0 }
 0x10c   :  { %v521_v30 = vpop.f32.mrf.mxu2 }
 0x10d   :  { %v548_v60 = vadd.f32 %v521_v30, %v469_v32  ;;  %v314_v32 = vadd.f32 %v3696_v57, %v235_v28 }
 0x10f   :  { %v627_v49 = vadd.f32 %v600_v21, %v548_v60  ;;  %v445_v46 = vpop.f32.mrf.mxu1  ;;  %v3971_v60 = vpop.permute.xlu0 %764  ;;  %v393_v57 = vadd.f32 %v3708_v0, %v314_v32  ;;  %v2594_v32 = vld [vmem:[%s5258_s4 + $0x238] sm:$0xff] }
 0x110   :  { %v470_v53 = vadd.f32 %v445_v46, %v391_v62 }
 0x111   :  { %v706_v4 = vadd.f32 %v679_v45, %v627_v49  ;;  %v148_v45 = vadd.f32 %v3715_v3, %v3580_v59  ;;  %v2597_v59 = vld [vmem:[%s5258_s4 + $0x250] sm:$0xff]  ;;  %v2596_v3 = vld [vmem:[%s5258_s4 + $0x248] sm:$0xff] }
 0x112   :  { %v606_v35 = vpop.f32.mrf.mxu3  ;;  %1148 = vmatpush.msra.mxu1 %v2597_v59  ;;  %v2632_v59 = vld [vmem:[%s5258_s4 + $0x368] sm:$0xff] }
 0x113   :  { %v3949_v5 = vadd.f32 %v3938_v58, %v706_v4  ;;  %v682_v18 = vpop.f32.mrf.mxu0  ;;  %v236_v4 = vadd.f32 %v3738_v13, %v148_v45  ;;  %v3990_v13 = vpop.permute.xlu1 %769  ;;  %v2617_v45 = vld [vmem:[%s5258_s4 + $0x2f0] sm:$0xff] }
 0x114   :  { %v524_v8 = vpop.f32.mrf.mxu2  ;;  %5276 = vst [vmem:[#allocation4_spill] sm:$0xff] %v3990_v13  ;;  %1149 = vmatpush.msra.mxu1 %v2596_v3  ;;  %v154_v3 = vadd.f32 %v3803_v48, %v3607_v22  ;;  %v2593_v48 = vld [vmem:[%s5258_s4 + $0x230] sm:$0xff] }
 0x115   :  { %v748_v55 = vmax.f32 %v3949_v5, 0.0  ;;  %v549_v10 = vadd.f32 %v524_v8, %v470_v53  ;;  %v315_v50 = vadd.f32 %v3710_v1, %v236_v4 }
 0x116   :  { %1150 = vmatpush.msra.mxu1 %v2595_v17  ;;  %v2646_v17 = vld [vmem:[%s5258_s4 + $0x3d8] sm:$0xff] }
 0x117   :  { %v3958_v21 = vmul.f32 %v3951_v7, %v748_v55  ;;  %v628_v12 = vadd.f32 %v603_v42, %v549_v10  ;;  %v448_v23 = vpop.f32.mrf.mxu1  ;;  %v394_v1 = vadd.f32 %v3740_v14, %v315_v50  ;;  %v2618_v14 = vld [vmem:[%s5258_s4 + $0x2f8] sm:$0xff] }
 0x118   :  { %v471_v29 = vadd.f32 %v448_v23, %v392_v26  ;;  %1222 = vmatpush.msra.mxu2 %v2618_v14  ;;  %1151 = vmatpush.msra.mxu1 %v2594_v32  ;;  %v4089_v32 = vpop.permute.xlu2 %779 }
 0x119   :  { %811 = vst [vmem:[#allocation2 + $0x8] sm:$0xff] %v3958_v21  ;;  %v707_v52 = vadd.f32 %v682_v18, %v628_v12 }
 0x11a   :  { %v609_v63 = vpop.f32.mrf.mxu3  ;;  %1223 = vmatpush.msra.mxu2 %v2617_v45  ;;  %1152 = vmatpush.msra.mxu1 %v2593_v48  ;;  %5280 = vst [vmem:[#allocation8_spill] sm:$0xff] %v4089_v32  ;;  %v2643_v48 = vld [vmem:[%s5258_s4 + $0x3c0] sm:$0xff] }
 0x11b   :  { %v3967_v33 = vadd.f32 %v3938_v58, %v707_v52  ;;  %v685_v34 = vpop.f32.mrf.mxu0  ;;  %v4037_v4 = vpop.permute.xlu1 %774 }
 0x11c   :  { %v527_v61 = vpop.f32.mrf.mxu2  ;;  %5278 = vst [vmem:[#allocation6_spill] sm:$0xff] %v4037_v4 }
 0x11d   :  { %v749_v30 = vmax.f32 %v3967_v33, 0.0  ;;  %v550_v56 = vadd.f32 %v527_v61, %v471_v29  ;;  %v237_v29 = vadd.f32 %v3788_v36, %v151_v44  ;;  %v2634_v36 = vld [vmem:[%s5258_s4 + $0x378] sm:$0xff] }
 0x11e   :  { %1301 = vmatpush.msrb.mxu3 %v2634_v36  ;;  %v2613_v36 = vld [vmem:[%s5258_s4 + $0x2d0] sm:$0xff] }
 0x11f   :  { %v3976_v42 = vmul.f32 %v3971_v60, %v749_v30  ;;  %v629_v41 = vadd.f32 %v606_v35, %v550_v56  ;;  %v451_v49 = vpop.f32.mrf.mxu1  ;;  %v2650_v30 = vld [vmem:[%s5258_s4 + $0x3f8] sm:$0xff] }
 0x120   :  { %v845_v46 = vld [vmem:[#allocation2 + $0x2] sm:$0xff]  ;;  %v472_v53 = vadd.f32 %v451_v49, %v393_v57  ;;  %1380 = vmatpush.msra.mxu0 %v2650_v30  ;;  %v2649_v49 = vld [vmem:[%s5258_s4 + $0x3f0] sm:$0xff] }
 0x121   :  { %v820_v62 = vld [vmem:[#allocation2 + $0x1] sm:$0xff]  ;;  %812 = vst [vmem:[#allocation2 + $0x10] sm:$0xff] %v3976_v42  ;;  %v708_v39 = vadd.f32 %v685_v34, %v629_v41  ;;  %887 = vmatmul.f32.vlgmr.msrb.gmra.mxu1 %v845_v46  ;;  %v2633_v41 = vld [vmem:[%s5258_s4 + $0x370] sm:$0xff]  ;;  %v316_v46 = vadd.f32 %v3742_v43, %v237_v29  ;;  %v2614_v29 = vld [vmem:[%s5258_s4 + $0x2d8] sm:$0xff] }
 0x122   :  { %v959_v2 = vld [vmem:[#allocation2 + $0x3] sm:$0xff]  ;;  %931 = vmatmul.f32.vlgmr.msrb.gmra.mxu2 %v820_v62  ;;  %v612_v35 = vpop.f32.mrf.mxu3  ;;  %1302 = vmatpush.msrb.mxu3 %v2633_v41  ;;  %v2629_v41 = vld [vmem:[%s5258_s4 + $0x350] sm:$0xff] }
 0x123   :  { %v1038_v25 = vld [vmem:[#allocation2 + $0x7] sm:$0xff]  ;;  %1001 = vmatmul.f32.vlgmr.msra.gmra.mxu3 %v959_v2  ;;  %v3988_v0 = vadd.f32 %v3938_v58, %v708_v39  ;;  %v688_v18 = vpop.f32.mrf.mxu0  ;;  %1381 = vmatpush.msra.mxu0 %v2649_v49  ;;  %v395_v44 = vadd.f32 %v3790_v37, %v316_v46  ;;  %v2645_v49 = vld [vmem:[%s5258_s4 + $0x3d0] sm:$0xff]  ;;  %v157_v46 = vadd.f32 %v3850_v20, %v3622_v27 }
 0x124   :  { %1080 = vmatmul.f32.vlgmr.msrb.gmra.mxu0 %v1038_v25  ;;  %v530_v8 = vpop.f32.mrf.mxu2  ;;  %v2616_v25 = vld [vmem:[%s5258_s4 + $0x2e8] sm:$0xff]  ;;  %1303 = vmatpush.msrb.mxu3 %v2632_v59  ;;  %v2615_v37 = vld [vmem:[%s5258_s4 + $0x2e0] sm:$0xff] }
 0x125   :  { %5275 = vst [vmem:[#allocation3_spill] sm:$0xff] %v3988_v0  ;;  %v750_v55 = vmax.f32 %v3988_v0, 0.0  ;;  %v551_v10 = vadd.f32 %v530_v8, %v472_v53  ;;  %v2648_v43 = vld [vmem:[%s5258_s4 + $0x3e8] sm:$0xff]  ;;  %1224 = vmatpush.msra.mxu2 %v2616_v25  ;;  %v239_v20 = vadd.f32 %v3882_v47, %v157_v46  ;;  %v2611_v47 = vld [vmem:[%s5258_s4 + $0x2c0] sm:$0xff] }
 0x126   :  { %1382 = vmatpush.msra.mxu0 %v2648_v43  ;;  %v2628_v25 = vld [vmem:[%s5258_s4 + $0x348] sm:$0xff] }
 0x127   :  { %v3997_v12 = vmul.f32 %v3990_v13, %v750_v55  ;;  %v630_v23 = vadd.f32 %v609_v63, %v551_v10  ;;  %v454_v26 = vpop.f32.mrf.mxu1  ;;  %1225 = vmatpush.msra.mxu2 %v2615_v37  ;;  %v2610_v37 = vld [vmem:[%s5258_s4 + $0x2b8] sm:$0xff] }
 0x128   :  { %v846_v28 = vld [vmem:[#allocation2 + $0xa] sm:$0xff]  ;;  %v473_v56 = vadd.f32 %v454_v26, %v394_v1 }
 0x129   :  { %v3999_v52 = vld [vmem:[#allocation2 + $0x9] sm:$0xff]  ;;  %813 = vst [vmem:[#allocation2 + $0x18] sm:$0xff] %v3997_v12  ;;  %v709_v61 = vadd.f32 %v688_v18, %v630_v23  ;;  %890 = vmatmul.f32.gmra.mxu1 %v846_v28  ;;  %v238_v23 = vadd.f32 %v3835_v9, %v154_v3  ;;  %v2631_v9 = vld [vmem:[%s5258_s4 + $0x360] sm:$0xff]  ;;  %1226 = vmatpush.msra.mxu2 %v2614_v29 }
 0x12a   :  { %v960_v40 = vld [vmem:[#allocation2 + $0xb] sm:$0xff]  ;;  %934 = vmatmul.f32.gmra.mxu2 %v3999_v52  ;;  %v615_v39 = vpop.f32.mrf.mxu3  ;;  %v2647_v28 = vld [vmem:[%s5258_s4 + $0x3e0] sm:$0xff]  ;;  %1304 = vmatpush.msrb.mxu3 %v2631_v9 }
 0x12b   :  { %v4005_v11 = vld [vmem:[#allocation2 + $0xf] sm:$0xff]  ;;  %1004 = vmatmul.f32.gmra.mxu3 %v960_v40  ;;  %v4024_v34 = vadd.f32 %v3938_v58, %v709_v61  ;;  %v691_v57 = vpop.f32.mrf.mxu0  ;;  %v2630_v61 = vld [vmem:[%s5258_s4 + $0x358] sm:$0xff]  ;;  %1383 = vmatpush.msra.mxu0 %v2647_v28  ;;  %v317_v30 = vadd.f32 %v3792_v38, %v238_v23  ;;  %v318_v28 = vadd.f32 %v3839_v16, %v239_v20 }
 0x12c   :  { %1083 = vmatmul.f32.gmra.mxu0 %v4005_v11  ;;  %v533_v63 = vpop.f32.mrf.mxu2  ;;  %1305 = vmatpush.msrb.mxu3 %v2630_v61  ;;  %v2589_v9 = vld [vmem:[%s5258_s4 + $0x210] sm:$0xff]  ;;  %v160_v16 = vadd.f32 %v3902_v6, %v3635_v31  ;;  %v2640_v20 = vld [vmem:[%s5258_s4 + $0x3a8] sm:$0xff] }
 0x12d   :  { %5277 = vst [vmem:[#allocation5_spill] sm:$0xff] %v4024_v34  ;;  %v751_v62 = vmax.f32 %v4024_v34, 0.0  ;;  %v552_v2 = vadd.f32 %v533_v63, %v473_v56  ;;  %1384 = vmatpush.msra.mxu0 %v2646_v17  ;;  %1227 = vmatpush.msra.mxu2 %v2613_v36  ;;  %v396_v27 = vadd.f32 %v3837_v15, %v317_v30  ;;  %v2590_v15 = vld [vmem:[%s5258_s4 + $0x218] sm:$0xff]  ;;  %v4157_v36 = vpop.permute.xlu2 %784 }
 0x12e   :  { %1306 = vmatpush.msrb.mxu3 %v2629_v41  ;;  %v2626_v17 = vld [vmem:[%s5258_s4 + $0x338] sm:$0xff]  ;;  %5282 = vst [vmem:[#allocation10_spill] sm:$0xff] %v4157_v36  ;;  %v2625_v41 = vld [vmem:[%s5258_s4 + $0x330] sm:$0xff]  ;;  %v397_v31 = vadd.f32 %v3884_v51, %v318_v28  ;;  %v240_v6 = vadd.f32 %v3917_v24, %v160_v16  ;;  %v2608_v24 = vld [vmem:[%s5258_s4 + $0x2a8] sm:$0xff] }
 0x12f   :  { %v4051_v53 = vmul.f32 %v4037_v4, %v751_v62  ;;  %v631_v8 = vadd.f32 %v612_v35, %v552_v2  ;;  %v457_v50 = vpop.f32.mrf.mxu1  ;;  %v2592_v35 = vld [vmem:[%s5258_s4 + $0x228] sm:$0xff]  ;;  %1385 = vmatpush.msra.mxu0 %v2645_v49 }
 0x130   :  { %v847_v55 = vld [vmem:[#allocation2 + $0x12] sm:$0xff]  ;;  %v474_v40 = vadd.f32 %v457_v50, %v395_v44  ;;  %1153 = vmatpush.msra.mxu1 %v2592_v35  ;;  %1307 = vmatpush.msrb.mxu3 %v2628_v25 }
 0x131   :  { %v4053_v10 = vld [vmem:[#allocation2 + $0x11] sm:$0xff]  ;;  %814 = vst [vmem:[#allocation2 + $0x20] sm:$0xff] %v4051_v53  ;;  %v710_v26 = vadd.f32 %v691_v57, %v631_v8  ;;  %893 = vmatmul.f32.gmra.mxu1 %v847_v55  ;;  %v2612_v57 = vld [vmem:[%s5258_s4 + $0x2c8] sm:$0xff]  ;;  %v2591_v55 = vld [vmem:[%s5258_s4 + $0x220] sm:$0xff] }
 0x132   :  { %v961_v18 = vld [vmem:[#allocation2 + $0x13] sm:$0xff]  ;;  %937 = vmatmul.f32.gmra.mxu2 %v4053_v10  ;;  %v618_v8 = vpop.f32.mrf.mxu3  ;;  %1154 = vmatpush.msra.mxu1 %v2591_v55  ;;  %v2607_v55 = vld [vmem:[%s5258_s4 + $0x2a0] sm:$0xff] }
 0x133   :  { %v4059_v22 = vld [vmem:[#allocation2 + $0x17] sm:$0xff]  ;;  %1007 = vmatmul.f32.gmra.mxu3 %v961_v18  ;;  %v4078_v1 = vadd.f32 %v3938_v58, %v710_v26  ;;  %v694_v45 = vpop.f32.mrf.mxu0  ;;  %v2644_v18 = vld [vmem:[%s5258_s4 + $0x3c8] sm:$0xff]  ;;  %1228 = vmatpush.msra.mxu2 %v2612_v57  ;;  %v2627_v26 = vld [vmem:[%s5258_s4 + $0x340] sm:$0xff] }
 0x134   :  { %1086 = vmatmul.f32.gmra.mxu0 %v4059_v22  ;;  %v536_v14 = vpop.f32.mrf.mxu2  ;;  %1155 = vmatpush.msra.mxu1 %v2590_v15  ;;  %v2641_v25 = vld [vmem:[%s5258_s4 + $0x3b0] sm:$0xff]  ;;  %v2587_v15 = vld [vmem:[%s5258_s4 + $0x200] sm:$0xff] }
 0x135   :  { %5279 = vst [vmem:[#allocation7_spill] sm:$0xff] %v4078_v1  ;;  %v752_v56 = vmax.f32 %v4078_v1, 0.0  ;;  %v553_v63 = vadd.f32 %v536_v14, %v474_v40  ;;  %1386 = vmatpush.msra.mxu0 %v2644_v18  ;;  %1229 = vmatpush.msra.mxu2 %v2611_v47  ;;  %v2642_v14 = vld [vmem:[%s5258_s4 + $0x3b8] sm:$0xff]  ;;  %v2623_v18 = vld [vmem:[%s5258_s4 + $0x320] sm:$0xff]  ;;  %v319_v47 = vadd.f32 %v3886_v54, %v240_v6  ;;  %v2637_v6 = vld [vmem:[%s5258_s4 + $0x390] sm:$0xff] }
 0x136   :  { %1308 = vmatpush.msrb.mxu3 %v2627_v26  ;;  %1156 = vmatpush.msra.mxu1 %v2589_v9  ;;  %v2606_v54 = vld [vmem:[%s5258_s4 + $0x298] sm:$0xff] }
 0x137   :  { %v4105_v38 = vmul.f32 %v4089_v32, %v752_v56  ;;  %v632_v62 = vadd.f32 %v615_v39, %v553_v63  ;;  %v460_v2 = vpop.f32.mrf.mxu1  ;;  %1387 = vmatpush.msra.mxu0 %v2643_v48  ;;  %1230 = vmatpush.msra.mxu2 %v2610_v37  ;;  %v4211_v37 = vpop.permute.xlu0 %789  ;;  %v398_v16 = vadd.f32 %v3920_v19, %v319_v47  ;;  %v2621_v19 = vld [vmem:[%s5258_s4 + $0x310] sm:$0xff]  ;;  %v2603_v47 = vld [vmem:[%s5258_s4 + $0x280] sm:$0xff] }
 0x138   :  { %v848_v59 = vld [vmem:[#allocation2 + $0x1a] sm:$0xff]  ;;  %v475_v44 = vadd.f32 %v460_v2, %v396_v27  ;;  %1309 = vmatpush.msrb.mxu3 %v2626_v17  ;;  %5284 = vst [vmem:[#allocation12_spill] sm:$0xff] %v4211_v37 }
 0x139   :  { %v4113_v43 = vld [vmem:[#allocation2 + $0x19] sm:$0xff]  ;;  %815 = vst [vmem:[#allocation2 + $0x28] sm:$0xff] %v4105_v38  ;;  %v711_v39 = vadd.f32 %v694_v45, %v632_v62  ;;  %896 = vmatmul.f32.gmra.mxu1 %v848_v59  ;;  %v2609_v45 = vld [vmem:[%s5258_s4 + $0x2b0] sm:$0xff]  ;;  %1388 = vmatpush.msra.mxu0 %v2642_v14  ;;  %v2588_v59 = vld [vmem:[%s5258_s4 + $0x208] sm:$0xff] }
 0x13a   :  { %v962_v3 = vld [vmem:[#allocation2 + $0x1b] sm:$0xff]  ;;  %940 = vmatmul.f32.gmra.mxu2 %v4113_v43  ;;  %v621_v51 = vpop.f32.mrf.mxu3  ;;  %1310 = vmatpush.msrb.mxu3 %v2625_v41  ;;  %v2605_v41 = vld [vmem:[%s5258_s4 + $0x290] sm:$0xff] }
 0x13b   :  { %v4119_v50 = vld [vmem:[#allocation2 + $0x1f] sm:$0xff]  ;;  %1010 = vmatmul.f32.gmra.mxu3 %v962_v3  ;;  %v4135_v23 = vadd.f32 %v3938_v58, %v711_v39  ;;  %v697_v61 = vpop.f32.mrf.mxu0  ;;  %v2624_v3 = vld [vmem:[%s5258_s4 + $0x328] sm:$0xff]  ;;  %1231 = vmatpush.msra.mxu2 %v2609_v45 }
 0x13c   :  { %1089 = vmatmul.f32.gmra.mxu0 %v4119_v50  ;;  %v539_v35 = vpop.f32.mrf.mxu2  ;;  %1157 = vmatpush.msra.mxu1 %v2588_v59  ;;  %v2638_v45 = vld [vmem:[%s5258_s4 + $0x398] sm:$0xff] }
 0x13d   :  { %5281 = vst [vmem:[#allocation9_spill] sm:$0xff] %v4135_v23  ;;  %v753_v40 = vmax.f32 %v4135_v23, 0.0  ;;  %v554_v29 = vadd.f32 %v539_v35, %v475_v44  ;;  %1389 = vmatpush.msra.mxu0 %v2641_v25  ;;  %1232 = vmatpush.msra.mxu2 %v2608_v24  ;;  %v2639_v35 = vld [vmem:[%s5258_s4 + $0x3a0] sm:$0xff]  ;;  %v2620_v24 = vld [vmem:[%s5258_s4 + $0x308] sm:$0xff] }
 0x13e   :  { %1311 = vmatpush.msrb.mxu3 %v2624_v3  ;;  %1158 = vmatpush.msra.mxu1 %v2587_v15 }
 0x13f   :  { %v4162_v30 = vmul.f32 %v4157_v36, %v753_v40  ;;  %v633_v56 = vadd.f32 %v618_v8, %v554_v29  ;;  %v463_v63 = vpop.f32.mrf.mxu1  ;;  %1390 = vmatpush.msra.mxu0 %v2640_v20  ;;  %1233 = vmatpush.msra.mxu2 %v2607_v55  ;;  %v2622_v40 = vld [vmem:[%s5258_s4 + $0x318] sm:$0xff]  ;;  %v2636_v20 = vld [vmem:[%s5258_s4 + $0x388] sm:$0xff] }
 0x140   :  { %v849_v49 = vld [vmem:[#allocation2 + $0x22] sm:$0xff]  ;;  %v476_v8 = vadd.f32 %v463_v63, %v397_v31  ;;  %1312 = vmatpush.msrb.mxu3 %v2623_v18 }
 0x141   :  { %v4170_v46 = vld [vmem:[#allocation2 + $0x21] sm:$0xff]  ;;  %816 = vst [vmem:[#allocation2 + $0x30] sm:$0xff] %v4162_v30  ;;  %v712_v2 = vadd.f32 %v697_v61, %v633_v56  ;;  %899 = vmatmul.f32.gmra.mxu1 %v849_v49  ;;  %1391 = vmatpush.msra.mxu0 %v2639_v35  ;;  %v2666_v49 = vld [vmem:[%s5258_s4 + $0x478] sm:$0xff] }
 0x142   :  { %v963_v62 = vld [vmem:[#allocation2 + $0x23] sm:$0xff]  ;;  %943 = vmatmul.f32.gmra.mxu2 %v4170_v46  ;;  %1313 = vmatpush.msrb.mxu3 %v2622_v40  ;;  %v624_v59 = vpop.f32.mrf.mxu3 }
 0x143   :  { %v4176_v57 = vld [vmem:[#allocation2 + $0x27] sm:$0xff]  ;;  %1013 = vmatmul.f32.gmra.mxu3 %v963_v62  ;;  %v4192_v27 = vadd.f32 %v3938_v58, %v712_v2  ;;  %v700_v48 = vpop.f32.mrf.mxu0  ;;  %1234 = vmatpush.msra.mxu2 %v2606_v54  ;;  %v2665_v2 = vld [vmem:[%s5258_s4 + $0x470] sm:$0xff] }
 0x144   :  { %1092 = vmatmul.f32.gmra.mxu0 %v4176_v57  ;;  %v542_v39 = vpop.f32.mrf.mxu2  ;;  %1459 = vmatpush.msrb.mxu1 %v2666_v49  ;;  %v2635_v40 = vld [vmem:[%s5258_s4 + $0x380] sm:$0xff] }
 0x145   :  { %5283 = vst [vmem:[#allocation11_spill] sm:$0xff] %v4192_v27  ;;  %v754_v44 = vmax.f32 %v4192_v27, 0.0  ;;  %v555_v26 = vadd.f32 %v542_v39, %v476_v8  ;;  %1392 = vmatpush.msra.mxu0 %v2638_v45  ;;  %1235 = vmatpush.msra.mxu2 %v2605_v41  ;;  %v4261_v39 = vpop.permute.xlu1 %794 }
 0x146   :  { %1314 = vmatpush.msrb.mxu3 %v2621_v19  ;;  %5286 = vst [vmem:[#allocation14_spill] sm:$0xff] %v4261_v39  ;;  %1460 = vmatpush.msrb.mxu1 %v2665_v2 }
 0x147   :  { %v4214_v9 = vmul.f32 %v4211_v37, %v754_v44  ;;  %v634_v28 = vadd.f32 %v621_v51, %v555_v26  ;;  %v466_v29 = vpop.f32.mrf.mxu1  ;;  %v2604_v51 = vld [vmem:[%s5258_s4 + $0x288] sm:$0xff]  ;;  %1393 = vmatpush.msra.mxu0 %v2637_v6  ;;  %v2619_v44 = vld [vmem:[%s5258_s4 + $0x300] sm:$0xff]  ;;  %v2661_v6 = vld [vmem:[%s5258_s4 + $0x450] sm:$0xff] }
 0x148   :  { %v850_v61 = vld [vmem:[#allocation2 + $0x2a] sm:$0xff]  ;;  %v477_v62 = vadd.f32 %v466_v29, %v398_v16  ;;  %1236 = vmatpush.msra.mxu2 %v2604_v51  ;;  %1315 = vmatpush.msrb.mxu3 %v2620_v24 }
 0x149   :  { %v4222_v17 = vld [vmem:[#allocation2 + $0x29] sm:$0xff]  ;;  %817 = vst [vmem:[#allocation2 + $0x38] sm:$0xff] %v4214_v9  ;;  %v713_v56 = vadd.f32 %v700_v48, %v634_v28  ;;  %902 = vmatmul.f32.gmra.mxu1 %v850_v61  ;;  %1394 = vmatpush.msra.mxu0 %v2636_v20  ;;  %v2659_v20 = vld [vmem:[%s5258_s4 + $0x440] sm:$0xff] }
 0x14a   :  { %v964_v14 = vld [vmem:[#allocation2 + $0x2b] sm:$0xff]  ;;  %946 = vmatmul.f32.gmra.mxu2 %v4222_v17  ;;  %1316 = vmatpush.msrb.mxu3 %v2619_v44  ;;  %v2655_v44 = vld [vmem:[%s5258_s4 + $0x420] sm:$0xff] }
 0x14b   :  { %v4227_v63 = vld [vmem:[#allocation2 + $0x2f] sm:$0xff]  ;;  %1016 = vmatmul.f32.gmra.mxu3 %v964_v14  ;;  %v4243_v31 = vadd.f32 %v3938_v58, %v713_v56  ;;  %v703_v55 = vpop.f32.mrf.mxu0  ;;  %1237 = vmatpush.msra.mxu2 %v2603_v47  ;;  %v2663_v14 = vld [vmem:[%s5258_s4 + $0x460] sm:$0xff]  ;;  %v4292_v56 = vpop.permute.xlu2 %799 }
 0x14c   :  { %1095 = vmatmul.f32.gmra.mxu0 %v4227_v63  ;;  %v545_v25 = vpop.f32.mrf.mxu2  ;;  %v2664_v29 = vld [vmem:[%s5258_s4 + $0x468] sm:$0xff]  ;;  %5288 = vst [vmem:[#allocation16_spill] sm:$0xff] %v4292_v56 }
 0x14d   :  { %5285 = vst [vmem:[#allocation13_spill] sm:$0xff] %v4243_v31  ;;  %v755_v3 = vmax.f32 %v4243_v31, 0.0  ;;  %v556_v8 = vadd.f32 %v545_v25, %v477_v62  ;;  %1395 = vmatpush.msra.mxu0 %v2635_v40  ;;  %1461 = vmatpush.msrb.mxu1 %v2664_v29  ;;  %v2662_v62 = vld [vmem:[%s5258_s4 + $0x458] sm:$0xff]  ;;  %v2660_v24 = vld [vmem:[%s5258_s4 + $0x448] sm:$0xff] }
 0x14e   :  { %v2656_v47 = vld [vmem:[%s5258_s4 + $0x428] sm:$0xff] }
 0x14f   :  { %v4264_v18 = vmul.f32 %v4261_v39, %v755_v3  ;;  %v635_v15 = vadd.f32 %v624_v59, %v556_v8  ;;  %1462 = vmatpush.msrb.mxu1 %v2663_v14  ;;  %v1275_v3 = vld [vmem:[#allocation2 + $0xd] sm:$0xff] }
 0x150   :  { %v851_v26 = vld [vmem:[#allocation2 + $0x32] sm:$0xff] }
 0x151   :  { %v4272_v48 = vld [vmem:[#allocation2 + $0x31] sm:$0xff]  ;;  %818 = vst [vmem:[#allocation2 + $0x40] sm:$0xff] %v4264_v18  ;;  %v714_v28 = vadd.f32 %v703_v55, %v635_v15  ;;  %905 = vmatmul.f32.gmra.mxu1 %v851_v26 }
 0x152   :  { %v965_v35 = vld [vmem:[#allocation2 + $0x33] sm:$0xff]  ;;  %949 = vmatmul.f32.gmra.mxu2 %v4272_v48  ;;  %1463 = vmatpush.msrb.mxu1 %v2662_v62 }
 0x153   :  { %v4276_v54 = vld [vmem:[#allocation2 + $0x37] sm:$0xff]  ;;  %1019 = vmatmul.f32.gmra.mxu3 %v965_v35  ;;  %v4286_v61 = vadd.f32 %v3938_v58, %v714_v28  ;;  %v1354_v8 = vld [vmem:[#allocation2 + $0xe] sm:$0xff] }
 0x154   :  { %1098 = vmatmul.f32.gmra.mxu0 %v4276_v54  ;;  %1464 = vmatpush.msrb.mxu1 %v2661_v6  ;;  %v2658_v55 = vld [vmem:[%s5258_s4 + $0x438] sm:$0xff]  ;;  %v2657_v15 = vld [vmem:[%s5258_s4 + $0x430] sm:$0xff]  ;;  %v2652_v28 = vld [vmem:[%s5258_s4 + $0x408] sm:$0xff] }
 0x155   :  { %5287 = vst [vmem:[#allocation15_spill] sm:$0xff] %v4286_v61  ;;  %v756_v16 = vmax.f32 %v4286_v61, 0.0  ;;  %v2654_v26 = vld [vmem:[%s5258_s4 + $0x418] sm:$0xff]  ;;  %v2653_v35 = vld [vmem:[%s5258_s4 + $0x410] sm:$0xff] }
 0x156   :  { %1465 = vmatpush.msrb.mxu1 %v2660_v24  ;;  %v1358_v40 = vld [vmem:[#allocation2 + $0x2e] sm:$0xff]  ;;  %v1359_v14 = vld [vmem:[#allocation2 + $0x36] sm:$0xff] }
 0x157   :  { %v4295_v45 = vmul.f32 %v4292_v56, %v756_v16  ;;  %v1280_v29 = vld [vmem:[#allocation2 + $0x35] sm:$0xff] }
 0x158   :  { %v852_v41 = vld [vmem:[#allocation2 + $0x3a] sm:$0xff]  ;;  %1466 = vmatpush.msrb.mxu1 %v2659_v20 }
 0x159   :  { %v4297_v19 = vld [vmem:[#allocation2 + $0x39] sm:$0xff]  ;;  %819 = vst [vmem:[#allocation2 + $0x48] sm:$0xff] %v4295_v45  ;;  %908 = vmatmul.f32.gmra.mxu1 %v852_v41 }
 0x15a   :  { %v966_v58 = vld [vmem:[#allocation2 + $0x3b] sm:$0xff]  ;;  %952 = vmatmul.f32.gmra.mxu2 %v4297_v19  ;;  %1467 = vmatpush.msrb.mxu1 %v2658_v55 }
 0x15b   :  { %v4301_v49 = vld [vmem:[#allocation2 + $0x3f] sm:$0xff]  ;;  %1022 = vmatmul.f32.gmra.mxu3 %v966_v58 }
 0x15c   :  { %1101 = vmatmul.f32.gmra.mxu0 %v4301_v49  ;;  %1468 = vmatpush.msrb.mxu1 %v2657_v15  ;;  %v1534_v15 = vld [vmem:[%s5259_s5 + $0x68] sm:$0xff] }
 0x15e   :  { %1469 = vmatpush.msrb.mxu1 %v2656_v47  ;;  %v1533_v47 = vld [vmem:[%s5259_s5 + $0x60] sm:$0xff] }
 0x160   :  { %v853_v2 = vld [vmem:[#allocation2 + $0x42] sm:$0xff]  ;;  %1470 = vmatpush.msrb.mxu1 %v2655_v44  ;;  %v1532_v44 = vld [vmem:[%s5259_s5 + $0x58] sm:$0xff] }
 0x161   :  { %v4310_v25 = vld [vmem:[#allocation2 + $0x41] sm:$0xff]  ;;  %911 = vmatmul.f32.gmra.mxu1 %v853_v2  ;;  %v1204_v58 = vld [vmem:[#allocation2 + $0x49] sm:$0xff] }
 0x162   :  { %v967_v59 = vld [vmem:[#allocation2 + $0x43] sm:$0xff]  ;;  %955 = vmatmul.f32.gmra.mxu2 %v4310_v25  ;;  %1471 = vmatpush.msrb.mxu1 %v2654_v26  ;;  %v1531_v26 = vld [vmem:[%s5259_s5 + $0x50] sm:$0xff] }
 0x163   :  { %v4313_v51 = vld [vmem:[#allocation2 + $0x47] sm:$0xff]  ;;  %1025 = vmatmul.f32.gmra.mxu3 %v967_v59 }
 0x164   :  { %1104 = vmatmul.f32.gmra.mxu0 %v4313_v51  ;;  %1472 = vmatpush.msrb.mxu1 %v2653_v35  ;;  %v1530_v35 = vld [vmem:[%s5259_s5 + $0x48] sm:$0xff] }
 0x166   :  { %1473 = vmatpush.msrb.mxu1 %v2652_v28  ;;  %v1529_v28 = vld [vmem:[%s5259_s5 + $0x40] sm:$0xff] }
 0x169   :  { %1159 = vmatmul.f32.vlgmr.msra.gmra.mxu1 %v3958_v21  ;;  %v1276_v21 = vld [vmem:[#allocation2 + $0x15] sm:$0xff] }
 0x16a   :  { %1238 = vmatmul.f32.vlgmr.msra.gmra.mxu2 %v3999_v52  ;;  %v1355_v52 = vld [vmem:[#allocation2 + $0x16] sm:$0xff] }
 0x16b   :  { %1317 = vmatmul.f32.vlgmr.msrb.gmra.mxu3 %v1275_v3 }
 0x16c   :  { %1396 = vmatmul.f32.vlgmr.msra.gmra.mxu0 %v1354_v8 }
 0x171   :  { %1162 = vmatmul.f32.gmra.mxu1 %v3976_v42  ;;  %v1277_v42 = vld [vmem:[#allocation2 + $0x1d] sm:$0xff] }
 0x172   :  { %1241 = vmatmul.f32.gmra.mxu2 %v4053_v10  ;;  %v1356_v10 = vld [vmem:[#allocation2 + $0x1e] sm:$0xff] }
 0x173   :  { %1320 = vmatmul.f32.gmra.mxu3 %v1276_v21 }
 0x174   :  { %1399 = vmatmul.f32.gmra.mxu0 %v1355_v52 }
 0x179   :  { %1165 = vmatmul.f32.gmra.mxu1 %v3997_v12  ;;  %v1278_v12 = vld [vmem:[#allocation2 + $0x25] sm:$0xff] }
 0x17a   :  { %1244 = vmatmul.f32.gmra.mxu2 %v4113_v43  ;;  %v1357_v43 = vld [vmem:[#allocation2 + $0x26] sm:$0xff] }
 0x17b   :  { %1323 = vmatmul.f32.gmra.mxu3 %v1277_v42 }
 0x17c   :  { %1402 = vmatmul.f32.gmra.mxu0 %v1356_v10 }
 0x181   :  { %1168 = vmatmul.f32.gmra.mxu1 %v4051_v53  ;;  %v1279_v53 = vld [vmem:[#allocation2 + $0x2d] sm:$0xff] }
 0x182   :  { %1247 = vmatmul.f32.gmra.mxu2 %v4170_v46  ;;  %v2651_v46 = vld [vmem:[%s5258_s4 + $0x400] sm:$0xff] }
 0x183   :  { %1326 = vmatmul.f32.gmra.mxu3 %v1278_v12  ;;  %1474 = vmatpush.msrb.mxu1 %v2651_v46  ;;  %v1528_v46 = vld [vmem:[%s5259_s5 + $0x38] sm:$0xff] }
 0x184   :  { %1405 = vmatmul.f32.gmra.mxu0 %v1357_v43 }
 0x189   :  { %1171 = vmatmul.f32.gmra.mxu1 %v4105_v38  ;;  %v1281_v38 = vld [vmem:[#allocation2 + $0x3d] sm:$0xff] }
 0x18a   :  { %1250 = vmatmul.f32.gmra.mxu2 %v4222_v17  ;;  %v1360_v17 = vld [vmem:[#allocation2 + $0x3e] sm:$0xff] }
 0x18b   :  { %1329 = vmatmul.f32.gmra.mxu3 %v1279_v53 }
 0x18c   :  { %1408 = vmatmul.f32.gmra.mxu0 %v1358_v40 }
 0x191   :  { %1174 = vmatmul.f32.gmra.mxu1 %v4162_v30  ;;  %v1282_v30 = vld [vmem:[#allocation2 + $0x45] sm:$0xff] }
 0x192   :  { %1253 = vmatmul.f32.gmra.mxu2 %v4272_v48  ;;  %v1361_v48 = vld [vmem:[#allocation2 + $0x46] sm:$0xff] }
 0x193   :  { %1332 = vmatmul.f32.gmra.mxu3 %v1280_v29 }
 0x194   :  { %1411 = vmatmul.f32.gmra.mxu0 %v1359_v14  ;;  %v1441_v14 = vld [vmem:[#allocation2 + $0x4f] sm:$0xff] }
 0x199   :  { %1177 = vmatmul.f32.gmra.mxu1 %v4214_v9  ;;  %v1283_v9 = vld [vmem:[#allocation2 + $0x4d] sm:$0xff] }
 0x19a   :  { %1256 = vmatmul.f32.gmra.mxu2 %v4297_v19  ;;  %v1362_v19 = vld [vmem:[#allocation2 + $0x4e] sm:$0xff] }
 0x19b   :  { %1335 = vmatmul.f32.gmra.mxu3 %v1281_v38 }
 0x19c   :  { %1414 = vmatmul.f32.gmra.mxu0 %v1360_v17 }
 0x19e   :  { %v4360_v16 = vpop.f32.mrf.mxu1 }
 0x1a1   :  { %1180 = vmatmul.f32.gmra.mxu1 %v4264_v18 }
 0x1a2   :  { %1259 = vmatmul.f32.gmra.mxu2 %v4310_v25 }
 0x1a3   :  { %1338 = vmatmul.f32.gmra.mxu3 %v1282_v30 }
 0x1a4   :  { %1417 = vmatmul.f32.gmra.mxu0 %v1361_v48  ;;  %v1526_v48 = vld [vmem:[%s5259_s5 + $0x28] sm:$0xff] }
 0x1a5   :  { %v4372_v6 = vpop.f32.mrf.mxu2 }
 0x1a6   :  { %v4364_v41 = vpop.f32.mrf.mxu1  ;;  %v4375_v2 = vpop.f32.mrf.mxu3  ;;  %v933_v39 = vadd.f32 %v4372_v6, %v4360_v16 }
 0x1a8   :  { %v1029_v31 = vadd.f32 %v4375_v2, %v933_v39 }
 0x1a9   :  { %1183 = vmatmul.f32.gmra.mxu1 %v4295_v45  ;;  %v4379_v45 = vpop.f32.mrf.mxu0 }
 0x1aa   :  { %1262 = vmatmul.f32.gmra.mxu2 %v1204_v58  ;;  %v1108_v36 = vadd.f32 %v4379_v45, %v1029_v31 }
 0x1ab   :  { %1341 = vmatmul.f32.gmra.mxu3 %v1283_v9 }
 0x1ac   :  { %1420 = vmatmul.f32.gmra.mxu0 %v1362_v19 }
 0x1ad   :  { %v4382_v59 = vpop.f32.mrf.mxu2 }
 0x1ae   :  { %v4367_v62 = vpop.f32.mrf.mxu1  ;;  %v4386_v3 = vpop.f32.mrf.mxu3  ;;  %v936_v27 = vadd.f32 %v4382_v59, %v4364_v41 }
 0x1b1   :  { %1475 = vmatmul.f32.vlgmr.msrb.gmra.mxu1 %v4005_v11  ;;  %v1536_v11 = vld [vmem:[%s5259_s5 + $0x78] sm:$0xff] }
 0x1b2   :  { %1537 = vmatpush.msrb.mxu2 %v1536_v11 }
 0x1b5   :  { %v4394_v8 = vpop.f32.mrf.mxu2 }
 0x1b6   :  { %v4370_v18 = vpop.f32.mrf.mxu1  ;;  %v4402_v55 = vpop.f32.mrf.mxu3  ;;  %v939_v16 = vadd.f32 %v4394_v8, %v4367_v62 }
 0x1b8   :  { %v1031_v41 = vadd.f32 %v4402_v55, %v939_v16 }
 0x1b9   :  { %1478 = vmatmul.f32.gmra.mxu1 %v4059_v22  ;;  %v4392_v22 = vpop.f32.mrf.mxu0 }
 0x1bd   :  { %v4406_v21 = vpop.f32.mrf.mxu2 }
 0x1be   :  { %v4377_v25 = vpop.f32.mrf.mxu1 }
 0x1c1   :  { %1481 = vmatmul.f32.gmra.mxu1 %v4119_v50  ;;  %v1535_v50 = vld [vmem:[%s5259_s5 + $0x70] sm:$0xff] }
 0x1c2   :  { %1538 = vmatpush.msrb.mxu2 %v1535_v50  ;;  %v1525_v50 = vld [vmem:[%s5259_s5 + $0x20] sm:$0xff] }
 0x1c4   :  { %1539 = vmatpush.msrb.mxu2 %v1534_v15  ;;  %v1524_v15 = vld [vmem:[%s5259_s5 + $0x18] sm:$0xff] }
 0x1c5   :  { %v4429_v12 = vpop.f32.mrf.mxu2 }
 0x1c6   :  { %v4384_v24 = vpop.f32.mrf.mxu1  ;;  %1540 = vmatpush.msrb.mxu2 %v1533_v47 }
 0x1c8   :  { %1541 = vmatpush.msrb.mxu2 %v1532_v44 }
 0x1c9   :  { %1484 = vmatmul.f32.gmra.mxu1 %v4176_v57  ;;  %v4404_v57 = vpop.f32.mrf.mxu0 }
 0x1ca   :  { %1542 = vmatpush.msrb.mxu2 %v1531_v26 }
 0x1cc   :  { %1543 = vmatpush.msrb.mxu2 %v1530_v35  ;;  %v1523_v35 = vld [vmem:[%s5259_s5 + $0x10] sm:$0xff] }
 0x1cd   :  { %v4443_v40 = vpop.f32.mrf.mxu2 }
 0x1ce   :  { %v4396_v20 = vpop.f32.mrf.mxu1  ;;  %1544 = vmatpush.msrb.mxu2 %v1529_v28  ;;  %v1522_v28 = vld [vmem:[%s5259_s5 + $0x8] sm:$0xff] }
 0x1d0   :  { %1545 = vmatpush.msrb.mxu2 %v1528_v46 }
 0x1d1   :  { %1487 = vmatmul.f32.gmra.mxu1 %v4227_v63  ;;  %v4417_v63 = vpop.f32.mrf.mxu3  ;;  %v4421_v10 = vpop.f32.mrf.mxu0 }
 0x1d5   :  { %v4452_v17 = vpop.f32.mrf.mxu2 }
 0x1d6   :  { %v4408_v52 = vpop.f32.mrf.mxu1 }
 0x1d9   :  { %1490 = vmatmul.f32.gmra.mxu1 %v4276_v54  ;;  %v4432_v54 = vpop.f32.mrf.mxu3  ;;  %v4440_v53 = vpop.f32.mrf.mxu0 }
 0x1dd   :  { %v4464_v19 = vpop.f32.mrf.mxu2 }
 0x1de   :  { %v4419_v42 = vpop.f32.mrf.mxu1 }
 0x1e1   :  { %1493 = vmatmul.f32.gmra.mxu1 %v4301_v49  ;;  %v4448_v29 = vpop.f32.mrf.mxu3  ;;  %v4450_v38 = vpop.f32.mrf.mxu0 }
 0x1e5   :  { %v4486_v46 = vpop.f32.mrf.mxu2 }
 0x1e6   :  { %v1160_v43 = vpop.f32.mrf.mxu1 }
 0x1e7   :  { %v1187_v32 = vadd.f32 %v1160_v43, %v1108_v36 }
 0x1e9   :  { %1496 = vmatmul.f32.gmra.mxu1 %v4313_v51  ;;  %v1527_v51 = vld [vmem:[%s5259_s5 + $0x30] sm:$0xff]  ;;  %v4460_v58 = vpop.f32.mrf.mxu3  ;;  %v4462_v9 = vpop.f32.mrf.mxu0 }
 0x1ea   :  { %1546 = vmatpush.msrb.mxu2 %v1527_v51 }
 0x1ec   :  { %1547 = vmatpush.msrb.mxu2 %v1526_v48 }
 0x1ee   :  { %v1163_v49 = vpop.f32.mrf.mxu1  ;;  %1548 = vmatpush.msrb.mxu2 %v1525_v50  ;;  %v1521_v50 = vld [vmem:[%s5259_s5] sm:$0xff] }
 0x1f0   :  { %1549 = vmatpush.msrb.mxu2 %v1524_v15  ;;  %v1239_v15 = vpop.f32.mrf.mxu2 }
 0x1f1   :  { %1499 = vmatmul.f32.gmra.mxu1 %v1441_v14  ;;  %v4474_v47 = vpop.f32.mrf.mxu3  ;;  %v4478_v26 = vpop.f32.mrf.mxu0  ;;  %v1266_v1 = vadd.f32 %v1239_v15, %v1187_v32  ;;  %v1110_v15 = vadd.f32 %v4404_v57, %v1031_v41 }
 0x1f2   :  { %1550 = vmatpush.msrb.mxu2 %v1523_v35 }
 0x1f4   :  { %1551 = vmatpush.msrb.mxu2 %v1522_v28 }
 0x1f6   :  { %v1166_v30 = vpop.f32.mrf.mxu1  ;;  %1552 = vmatpush.msrb.mxu2 %v1521_v50  ;;  %v1030_v50 = vadd.f32 %v4386_v3, %v936_v27  ;;  %v942_v3 = vadd.f32 %v4406_v21, %v4370_v18 }
 0x1f8   :  { %v1242_v28 = vpop.f32.mrf.mxu2  ;;  %v1109_v6 = vadd.f32 %v4392_v22, %v1030_v50 }
 0x1f9   :  { %v4488_v14 = vpop.f32.mrf.mxu3  ;;  %v4492_v48 = vpop.f32.mrf.mxu0 }
 0x1fa   :  { %v1188_v2 = vadd.f32 %v1163_v49, %v1109_v6 }
 0x1fc   :  { %v1267_v31 = vadd.f32 %v1242_v28, %v1188_v2  ;;  %v945_v28 = vadd.f32 %v4429_v12, %v4377_v25  ;;  %v948_v2 = vadd.f32 %v4443_v40, %v4384_v24 }
 0x1fe   :  { %v4466_v11 = vpop.f32.mrf.mxu1 }
 0x200   :  { %v1245_v34 = vpop.f32.mrf.mxu2 }
 0x201   :  { %v1318_v61 = vpop.f32.mrf.mxu3  ;;  %v1397_v35 = vpop.f32.mrf.mxu0 }
 0x202   :  { %v1345_v39 = vadd.f32 %v1318_v61, %v1266_v1  ;;  %v1189_v1 = vadd.f32 %v1166_v30, %v1110_v15  ;;  %v1032_v61 = vadd.f32 %v4417_v63, %v942_v3  ;;  %v1033_v30 = vadd.f32 %v4432_v54, %v945_v28  ;;  %v2682_v28 = vld [vmem:[%s5258_s4 + $0x4f8] sm:$0xff] }
 0x203   :  { %1713 = vmatpush.msrb.mxu0 %v2682_v28 }
 0x204   :  { %v1424_v45 = vadd.f32 %v1397_v35, %v1345_v39  ;;  %v1268_v22 = vadd.f32 %v1245_v34, %v1189_v1  ;;  %v1111_v16 = vadd.f32 %v4421_v10, %v1032_v61 }
 0x206   :  { %v4476_v44 = vpop.f32.mrf.mxu1  ;;  %v1190_v57 = vadd.f32 %v4466_v11, %v1111_v16  ;;  %v2730_v16 = vld [vmem:[%s5258_s4 + $0x678] sm:$0xff] }
 0x207   :  { %1862 = vmatpush.msra.mxu2 %v2730_v16 }
 0x208   :  { %v1248_v32 = vpop.f32.mrf.mxu2 }
 0x209   :  { %v1321_v23 = vpop.f32.mrf.mxu3  ;;  %v1400_v4 = vpop.f32.mrf.mxu0  ;;  %v1269_v63 = vadd.f32 %v1248_v32, %v1190_v57 }
 0x20a   :  { %v1346_v43 = vadd.f32 %v1321_v23, %v1267_v31  ;;  %v1034_v31 = vadd.f32 %v4448_v29, %v948_v2  ;;  %v2694_v2 = vld [vmem:[%s5258_s4 + $0x558] sm:$0xff] }
 0x20c   :  { %v1425_v8 = vadd.f32 %v1400_v4, %v1346_v43  ;;  %v1113_v24 = vadd.f32 %v4450_v38, %v1034_v31 }
 0x20e   :  { %v4490_v51 = vpop.f32.mrf.mxu1 }
 0x20f   :  { %v1192_v3 = vadd.f32 %v4490_v51, %v1113_v24  ;;  %v2697_v51 = vld [vmem:[%s5258_s4 + $0x570] sm:$0xff]  ;;  %v2691_v24 = vld [vmem:[%s5258_s4 + $0x540] sm:$0xff] }
 0x210   :  { %v1251_v21 = vpop.f32.mrf.mxu2 }
 0x211   :  { %v1324_v0 = vpop.f32.mrf.mxu3  ;;  %v1403_v59 = vpop.f32.mrf.mxu0 }
 0x212   :  { %v1347_v50 = vadd.f32 %v1324_v0, %v1268_v22  ;;  %v1112_v0 = vadd.f32 %v4440_v53, %v1033_v30  ;;  %v954_v22 = vadd.f32 %v4464_v19, %v4408_v52  ;;  %v2729_v30 = vld [vmem:[%s5258_s4 + $0x670] sm:$0xff] }
 0x213   :  { %1863 = vmatpush.msra.mxu2 %v2729_v30  ;;  %v2685_v30 = vld [vmem:[%s5258_s4 + $0x510] sm:$0xff] }
 0x214   :  { %v1426_v34 = vadd.f32 %v1403_v59, %v1347_v50  ;;  %v1191_v12 = vadd.f32 %v4476_v44, %v1112_v0  ;;  %v2693_v0 = vld [vmem:[%s5258_s4 + $0x550] sm:$0xff] }
 0x216   :  { %v4497_v56 = vpop.f32.mrf.mxu1  ;;  %v1270_v54 = vadd.f32 %v1251_v21, %v1191_v12  ;;  %v2727_v12 = vld [vmem:[%s5258_s4 + $0x660] sm:$0xff] }
 0x218   :  { %v1254_v11 = vpop.f32.mrf.mxu2 }
 0x219   :  { %v1327_v55 = vpop.f32.mrf.mxu3  ;;  %v1406_v18 = vpop.f32.mrf.mxu0  ;;  %v1271_v15 = vadd.f32 %v1254_v11, %v1192_v3 }
 0x21a   :  { %v1348_v25 = vadd.f32 %v1327_v55, %v1269_v63  ;;  %v2680_v63 = vld [vmem:[%s5258_s4 + $0x4e8] sm:$0xff] }
 0x21e   :  { %v4502_v37 = vpop.f32.mrf.mxu1 }
 0x221   :  { %v1330_v6 = vpop.f32.mrf.mxu3  ;;  %v1409_v41 = vpop.f32.mrf.mxu0 }
 0x222   :  { %v1349_v32 = vadd.f32 %v1330_v6, %v1270_v54  ;;  %v2692_v54 = vld [vmem:[%s5258_s4 + $0x548] sm:$0xff] }
 0x224   :  { %v1428_v29 = vadd.f32 %v1409_v41, %v1349_v32 }
 0x226   :  { %v4508_v13 = vpop.f32.mrf.mxu1 }
 0x229   :  { %v1333_v53 = vpop.f32.mrf.mxu3  ;;  %v1412_v43 = vpop.f32.mrf.mxu0 }
 0x22e   :  { %v1476_v36 = vpop.f32.mrf.mxu1 }
 0x22f   :  { %v1503_v27 = vadd.f32 %v1476_v36, %v1424_v45  ;;  %v1427_v45 = vadd.f32 %v1406_v18, %v1348_v25  ;;  %v2681_v18 = vld [vmem:[%s5258_s4 + $0x4f0] sm:$0xff]  ;;  %v2712_v25 = vld [vmem:[%s5258_s4 + $0x5e8] sm:$0xff] }
 0x230   :  { %1714 = vmatpush.msrb.mxu0 %v2681_v18 }
 0x231   :  { %v1512_v62 = vmax.f32 %v1503_v27, 0.0  ;;  %v951_v27 = vadd.f32 %v4452_v17, %v4396_v20  ;;  %v1350_v20 = vadd.f32 %v1333_v53, %v1271_v15  ;;  %v1336_v55 = vpop.f32.mrf.mxu3  ;;  %v1415_v21 = vpop.f32.mrf.mxu0  ;;  %v2676_v53 = vld [vmem:[%s5258_s4 + $0x4c8] sm:$0xff]  ;;  %v2690_v15 = vld [vmem:[%s5258_s4 + $0x538] sm:$0xff] }
 0x232   :  { %1715 = vmatpush.msrb.mxu0 %v2680_v63  ;;  %v2673_v63 = vld [vmem:[%s5258_s4 + $0x4b0] sm:$0xff] }
 0x233   :  { %1553 = vmatmul.f32.vlgmr.msrb.gmra.mxu2 %v1512_v62  ;;  %v1035_v44 = vadd.f32 %v4460_v58, %v951_v27  ;;  %v1257_v62 = vpop.f32.mrf.mxu2  ;;  %v2698_v58 = vld [vmem:[%s5258_s4 + $0x578] sm:$0xff]  ;;  %v1429_v19 = vadd.f32 %v1412_v43, %v1350_v20  ;;  %v2677_v27 = vld [vmem:[%s5258_s4 + $0x4d0] sm:$0xff] }
 0x234   :  { %1669 = vmatpush.msra.mxu3 %v2698_v58  ;;  %v2689_v20 = vld [vmem:[%s5258_s4 + $0x530] sm:$0xff] }
 0x235   :  { %v1114_v17 = vadd.f32 %v4462_v9, %v1035_v44  ;;  %v2696_v9 = vld [vmem:[%s5258_s4 + $0x568] sm:$0xff] }
 0x236   :  { %v1479_v49 = vpop.f32.mrf.mxu1  ;;  %1670 = vmatpush.msra.mxu3 %v2697_v51  ;;  %v2723_v51 = vld [vmem:[%s5258_s4 + $0x640] sm:$0xff] }
 0x237   :  { %v1504_v35 = vadd.f32 %v1479_v49, %v1425_v8  ;;  %v1193_v8 = vadd.f32 %v4497_v56, %v1114_v17  ;;  %v1036_v49 = vadd.f32 %v4474_v47, %v954_v22  ;;  %v2714_v47 = vld [vmem:[%s5258_s4 + $0x5f8] sm:$0xff]  ;;  %v2724_v17 = vld [vmem:[%s5258_s4 + $0x648] sm:$0xff] }
 0x238   :  { %1783 = vmatpush.msra.mxu1 %v2714_v47  ;;  %1671 = vmatpush.msra.mxu3 %v2696_v9 }
 0x239   :  { %v1513_v23 = vmax.f32 %v1504_v35, 0.0  ;;  %v1272_v52 = vadd.f32 %v1257_v62, %v1193_v8  ;;  %v2695_v35 = vld [vmem:[%s5258_s4 + $0x560] sm:$0xff]  ;;  %v1418_v62 = vpop.f32.mrf.mxu0 }
 0x23a   :  { %1672 = vmatpush.msra.mxu3 %v2695_v35  ;;  %v2686_v35 = vld [vmem:[%s5258_s4 + $0x518] sm:$0xff] }
 0x23b   :  { %1556 = vmatmul.f32.gmra.mxu2 %v1513_v23  ;;  %v2713_v23 = vld [vmem:[%s5258_s4 + $0x5f0] sm:$0xff]  ;;  %v1260_v57 = vpop.f32.mrf.mxu2 }
 0x23c   :  { %1784 = vmatpush.msra.mxu1 %v2713_v23  ;;  %1673 = vmatpush.msra.mxu3 %v2694_v2  ;;  %v2674_v23 = vld [vmem:[%s5258_s4 + $0x4b8] sm:$0xff]  ;;  %v2720_v2 = vld [vmem:[%s5258_s4 + $0x628] sm:$0xff] }
 0x23e   :  { %v1482_v4 = vpop.f32.mrf.mxu1  ;;  %1785 = vmatpush.msra.mxu1 %v2712_v25  ;;  %1674 = vmatpush.msra.mxu3 %v2693_v0  ;;  %v2684_v25 = vld [vmem:[%s5258_s4 + $0x508] sm:$0xff]  ;;  %v2670_v0 = vld [vmem:[%s5258_s4 + $0x498] sm:$0xff] }
 0x23f   :  { %v1505_v39 = vadd.f32 %v1482_v4, %v1426_v34  ;;  %v957_v34 = vadd.f32 %v4486_v46, %v4419_v42  ;;  %v1351_v4 = vadd.f32 %v1336_v55, %v1272_v52  ;;  %v2728_v42 = vld [vmem:[%s5258_s4 + $0x668] sm:$0xff]  ;;  %v2687_v52 = vld [vmem:[%s5258_s4 + $0x520] sm:$0xff] }
 0x240   :  { %1864 = vmatpush.msra.mxu2 %v2728_v42  ;;  %1675 = vmatpush.msra.mxu3 %v2692_v54  ;;  %v2671_v42 = vld [vmem:[%s5258_s4 + $0x4a0] sm:$0xff]  ;;  %v2668_v54 = vld [vmem:[%s5258_s4 + $0x488] sm:$0xff] }
 0x241   :  { %v1514_v10 = vmax.f32 %v1505_v39, 0.0  ;;  %v1115_v39 = vadd.f32 %v4478_v26, %v1036_v49  ;;  %v2679_v26 = vld [vmem:[%s5258_s4 + $0x4e0] sm:$0xff]  ;;  %v1037_v41 = vadd.f32 %v4488_v14, %v957_v34  ;;  %v1430_v31 = vadd.f32 %v1415_v21, %v1351_v4  ;;  %v2726_v14 = vld [vmem:[%s5258_s4 + $0x658] sm:$0xff]  ;;  %v1421_v28 = vpop.f32.mrf.mxu0  ;;  %v2705_v34 = vld [vmem:[%s5258_s4 + $0x5b0] sm:$0xff] }
 0x242   :  { %1716 = vmatpush.msrb.mxu0 %v2679_v26  ;;  %1865 = vmatpush.msra.mxu2 %v2727_v12  ;;  %v2706_v21 = vld [vmem:[%s5258_s4 + $0x5b8] sm:$0xff]  ;;  %v2721_v4 = vld [vmem:[%s5258_s4 + $0x630] sm:$0xff]  ;;  %v2703_v26 = vld [vmem:[%s5258_s4 + $0x5a0] sm:$0xff] }
 0x243   :  { %1559 = vmatmul.f32.gmra.mxu2 %v1514_v10  ;;  %v1194_v46 = vadd.f32 %v4502_v37, %v1115_v39  ;;  %v2711_v10 = vld [vmem:[%s5258_s4 + $0x5e0] sm:$0xff]  ;;  %v2678_v37 = vld [vmem:[%s5258_s4 + $0x4d8] sm:$0xff]  ;;  %v1116_v44 = vadd.f32 %v4492_v48, %v1037_v41  ;;  %1676 = vmatpush.msra.mxu3 %v2691_v24  ;;  %v2672_v39 = vld [vmem:[%s5258_s4 + $0x4a8] sm:$0xff] }
 0x244   :  { %1786 = vmatpush.msra.mxu1 %v2711_v10  ;;  %1717 = vmatpush.msrb.mxu0 %v2678_v37  ;;  %v2675_v48 = vld [vmem:[%s5258_s4 + $0x4c0] sm:$0xff]  ;;  %v2702_v10 = vld [vmem:[%s5258_s4 + $0x598] sm:$0xff]  ;;  %v2669_v37 = vld [vmem:[%s5258_s4 + $0x490] sm:$0xff] }
 0x245   :  { %v1273_v11 = vadd.f32 %v1260_v57, %v1194_v46  ;;  %1866 = vmatpush.msra.mxu2 %v2726_v14  ;;  %v1195_v22 = vadd.f32 %v4508_v13, %v1116_v44  ;;  %1677 = vmatpush.msra.mxu3 %v2690_v15  ;;  %v2688_v13 = vld [vmem:[%s5258_s4 + $0x528] sm:$0xff]  ;;  %v2722_v57 = vld [vmem:[%s5258_s4 + $0x638] sm:$0xff]  ;;  %v2719_v46 = vld [vmem:[%s5258_s4 + $0x620] sm:$0xff] }
 0x246   :  { %v1485_v36 = vpop.f32.mrf.mxu1  ;;  %1718 = vmatpush.msrb.mxu0 %v2677_v27  ;;  %v2718_v12 = vld [vmem:[%s5258_s4 + $0x618] sm:$0xff]  ;;  %v2701_v41 = vld [vmem:[%s5258_s4 + $0x590] sm:$0xff]  ;;  %v2699_v14 = vld [vmem:[%s5258_s4 + $0x580] sm:$0xff] }
 0x247   :  { %v1506_v59 = vadd.f32 %v1485_v36, %v1427_v45  ;;  %v2710_v45 = vld [vmem:[%s5258_s4 + $0x5d8] sm:$0xff]  ;;  %v1339_v36 = vpop.f32.mrf.mxu3  ;;  %1678 = vmatpush.msra.mxu3 %v2689_v20  ;;  %v2745_v24 = vld [vmem:[%s5258_s4 + $0x6f0] sm:$0xff] }
 0x248   :  { %1787 = vmatpush.msra.mxu1 %v2710_v45  ;;  %v1352_v3 = vadd.f32 %v1339_v36, %v1273_v11  ;;  %1719 = vmatpush.msrb.mxu0 %v2676_v53  ;;  %v2717_v11 = vld [vmem:[%s5258_s4 + $0x610] sm:$0xff]  ;;  %v2700_v45 = vld [vmem:[%s5258_s4 + $0x588] sm:$0xff]  ;;  %v2746_v27 = vld [vmem:[%s5258_s4 + $0x6f8] sm:$0xff] }
 0x249   :  { %v1515_v40 = vmax.f32 %v1506_v59, 0.0  ;;  %1679 = vmatpush.msra.mxu3 %v2688_v13  ;;  %v2716_v36 = vld [vmem:[%s5258_s4 + $0x608] sm:$0xff]  ;;  %v2743_v53 = vld [vmem:[%s5258_s4 + $0x6e0] sm:$0xff] }
 0x24a   :  { %v1431_v58 = vadd.f32 %v1418_v62, %v1352_v3  ;;  %1720 = vmatpush.msrb.mxu0 %v2675_v48  ;;  %v2741_v62 = vld [vmem:[%s5258_s4 + $0x6d0] sm:$0xff] }
 0x24b   :  { %1562 = vmatmul.f32.gmra.mxu2 %v1515_v40  ;;  %v2709_v40 = vld [vmem:[%s5258_s4 + $0x5d0] sm:$0xff]  ;;  %1680 = vmatpush.msra.mxu3 %v2687_v52 }
 0x24c   :  { %1788 = vmatpush.msra.mxu1 %v2709_v40  ;;  %1721 = vmatpush.msrb.mxu0 %v2674_v23  ;;  %v2744_v40 = vld [vmem:[%s5258_s4 + $0x6e8] sm:$0xff] }
 0x24d   :  { %1681 = vmatpush.msra.mxu3 %v2686_v35 }
 0x24e   :  { %v1488_v1 = vpop.f32.mrf.mxu1  ;;  %1722 = vmatpush.msrb.mxu0 %v2673_v63  ;;  %v2737_v63 = vld [vmem:[%s5258_s4 + $0x6b0] sm:$0xff] }
 0x24f   :  { %v1507_v61 = vadd.f32 %v1488_v1, %v1428_v29  ;;  %v2725_v29 = vld [vmem:[%s5258_s4 + $0x650] sm:$0xff]  ;;  %v1263_v1 = vpop.f32.mrf.mxu2  ;;  %1682 = vmatpush.msra.mxu3 %v2685_v30 }
 0x250   :  { %1867 = vmatpush.msra.mxu2 %v2725_v29  ;;  %v1274_v8 = vadd.f32 %v1263_v1, %v1195_v22  ;;  %1723 = vmatpush.msrb.mxu0 %v2672_v39  ;;  %v2742_v29 = vld [vmem:[%s5258_s4 + $0x6d8] sm:$0xff] }
 0x251   :  { %v1516_v38 = vmax.f32 %v1507_v61, 0.0  ;;  %v2708_v61 = vld [vmem:[%s5258_s4 + $0x5c8] sm:$0xff]  ;;  %1683 = vmatpush.msra.mxu3 %v2684_v25  ;;  %v2778_v39 = vld [vmem:[%s5258_s4 + $0x7f8] sm:$0xff] }
 0x252   :  { %1789 = vmatpush.msra.mxu1 %v2708_v61  ;;  %1868 = vmatpush.msra.mxu2 %v2724_v17  ;;  %v5293_v25 = vld [vmem:[#allocation7_spill] sm:$0xff] }
 0x253   :  { %1565 = vmatmul.f32.gmra.mxu2 %v1516_v38  ;;  %v2707_v38 = vld [vmem:[%s5258_s4 + $0x5c0] sm:$0xff]  ;;  %1724 = vmatpush.msrb.mxu0 %v2671_v42 }
 0x254   :  { %1790 = vmatpush.msra.mxu1 %v2707_v38  ;;  %1869 = vmatpush.msra.mxu2 %v2723_v51  ;;  %v2740_v38 = vld [vmem:[%s5258_s4 + $0x6c8] sm:$0xff]  ;;  %v5290_v51 = vld [vmem:[#allocation4_spill] sm:$0xff] }
 0x255   :  { %1725 = vmatpush.msrb.mxu0 %v2670_v0  ;;  %v2736_v0 = vld [vmem:[%s5258_s4 + $0x6a8] sm:$0xff] }
 0x256   :  { %v1491_v56 = vpop.f32.mrf.mxu1  ;;  %1791 = vmatpush.msra.mxu1 %v2706_v21  ;;  %1870 = vmatpush.msra.mxu2 %v2722_v57 }
 0x257   :  { %v1508_v50 = vadd.f32 %v1491_v56, %v1429_v19  ;;  %v1342_v19 = vpop.f32.mrf.mxu3  ;;  %1726 = vmatpush.msrb.mxu0 %v2669_v37  ;;  %v2776_v37 = vld [vmem:[%s5258_s4 + $0x7e8] sm:$0xff] }
 0x258   :  { %v1353_v9 = vadd.f32 %v1342_v19, %v1274_v8  ;;  %1792 = vmatpush.msra.mxu1 %v2705_v34  ;;  %1871 = vmatpush.msra.mxu2 %v2721_v4  ;;  %v5289_v8 = vld [vmem:[#allocation3_spill] sm:$0xff] }
 0x259   :  { %v1517_v6 = vmax.f32 %v1508_v50, 0.0  ;;  %1727 = vmatpush.msrb.mxu0 %v2668_v54  ;;  %v2762_v34 = vld [vmem:[%s5258_s4 + $0x778] sm:$0xff]  ;;  %v2759_v54 = vld [vmem:[%s5258_s4 + $0x760] sm:$0xff] }
 0x25a   :  { %v1432_v47 = vadd.f32 %v1421_v28, %v1353_v9  ;;  %1872 = vmatpush.msra.mxu2 %v2720_v2  ;;  %v5291_v28 = vld [vmem:[#allocation5_spill] sm:$0xff]  ;;  %v2761_v2 = vld [vmem:[%s5258_s4 + $0x770] sm:$0xff] }
 0x25b   :  { %1568 = vmatmul.f32.gmra.mxu2 %v1517_v6  ;;  %v2704_v6 = vld [vmem:[%s5258_s4 + $0x5a8] sm:$0xff] }
 0x25c   :  { %1793 = vmatpush.msra.mxu1 %v2704_v6  ;;  %1873 = vmatpush.msra.mxu2 %v2719_v46  ;;  %v2794_v6 = vld [vmem:[%s5258_s4 + $0x878] sm:$0xff]  ;;  %v2793_v46 = vld [vmem:[%s5258_s4 + $0x870] sm:$0xff] }
 0x25e   :  { %v1494_v59 = vpop.f32.mrf.mxu1  ;;  %1794 = vmatpush.msra.mxu1 %v2703_v26  ;;  %1874 = vmatpush.msra.mxu2 %v2718_v12  ;;  %v2777_v26 = vld [vmem:[%s5258_s4 + $0x7f0] sm:$0xff] }
 0x25f   :  { %v1509_v32 = vadd.f32 %v1494_v59, %v1430_v31  ;;  %v2683_v31 = vld [vmem:[%s5258_s4 + $0x500] sm:$0xff] }
 0x260   :  { %1795 = vmatpush.msra.mxu1 %v2702_v10  ;;  %1875 = vmatpush.msra.mxu2 %v2717_v11  ;;  %v2667_v59 = vld [vmem:[%s5258_s4 + $0x480] sm:$0xff]  ;;  %v2760_v10 = vld [vmem:[%s5258_s4 + $0x768] sm:$0xff] }
 0x261   :  { %v1518_v43 = vmax.f32 %v1509_v32, 0.0  ;;  %1684 = vmatpush.msra.mxu3 %v2683_v31  ;;  %v2715_v32 = vld [vmem:[%s5258_s4 + $0x600] sm:$0xff]  ;;  %1728 = vmatpush.msrb.mxu0 %v2667_v59 }
 0x262   :  { %1796 = vmatpush.msra.mxu1 %v2701_v41  ;;  %1876 = vmatpush.msra.mxu2 %v2716_v36  ;;  %v2792_v41 = vld [vmem:[%s5258_s4 + $0x868] sm:$0xff]  ;;  %v5294_v11 = vld [vmem:[#allocation8_spill] sm:$0xff] }
 0x263   :  { %1571 = vmatmul.f32.gmra.mxu2 %v1518_v43  ;;  %1941 = vmatpush.msrb.mxu3 %v2746_v27 }
 0x264   :  { %1797 = vmatpush.msra.mxu1 %v2700_v45  ;;  %1877 = vmatpush.msra.mxu2 %v2715_v32  ;;  %v2775_v45 = vld [vmem:[%s5258_s4 + $0x7e0] sm:$0xff] }
 0x265   :  { %1942 = vmatpush.msrb.mxu3 %v2745_v24  ;;  %2020 = vmatpush.msra.mxu0 %v2762_v34  ;;  %v2791_v32 = vld [vmem:[%s5258_s4 + $0x860] sm:$0xff]  ;;  %v2754_v34 = vld [vmem:[%s5258_s4 + $0x738] sm:$0xff] }
 0x266   :  { %v1497_v55 = vpop.f32.mrf.mxu1  ;;  %1798 = vmatpush.msra.mxu1 %v2699_v14  ;;  %2178 = vmatpush.msrb.mxu2 %v2794_v6  ;;  %v2786_v6 = vld [vmem:[%s5258_s4 + $0x838] sm:$0xff] }
 0x267   :  { %v1510_v49 = vadd.f32 %v1497_v55, %v1431_v58  ;;  %1943 = vmatpush.msrb.mxu3 %v2744_v40  ;;  %2021 = vmatpush.msra.mxu0 %v2761_v2  ;;  %v2758_v40 = vld [vmem:[%s5258_s4 + $0x758] sm:$0xff]  ;;  %v2731_v2 = vld [vmem:[%s5258_s4 + $0x680] sm:$0xff] }
 0x268   :  { %2099 = vmatpush.msrb.mxu1 %v2778_v39  ;;  %2179 = vmatpush.msrb.mxu2 %v2793_v46  ;;  %v2753_v46 = vld [vmem:[%s5258_s4 + $0x730] sm:$0xff] }
 0x269   :  { %v1519_v56 = vmax.f32 %v1510_v49, 0.0  ;;  %1944 = vmatpush.msrb.mxu3 %v2743_v53  ;;  %2022 = vmatpush.msra.mxu0 %v2760_v10  ;;  %v2774_v53 = vld [vmem:[%s5258_s4 + $0x7d8] sm:$0xff] }
 0x26a   :  { %2100 = vmatpush.msrb.mxu1 %v2777_v26  ;;  %2180 = vmatpush.msrb.mxu2 %v2792_v41 }
 0x26b   :  { %1574 = vmatmul.f32.gmra.mxu2 %v1519_v56  ;;  %1945 = vmatpush.msrb.mxu3 %v2742_v29  ;;  %v2738_v56 = vld [vmem:[%s5258_s4 + $0x6b8] sm:$0xff] }
 0x26c   :  { %2101 = vmatpush.msrb.mxu1 %v2776_v37  ;;  %2023 = vmatpush.msra.mxu0 %v2759_v54 }
 0x26d   :  { %1946 = vmatpush.msrb.mxu3 %v2741_v62  ;;  %v2790_v62 = vld [vmem:[%s5258_s4 + $0x858] sm:$0xff]  ;;  %2181 = vmatpush.msrb.mxu2 %v2791_v32  ;;  %v5299_v32 = vld [vmem:[#allocation13_spill] sm:$0xff] }
 0x26e   :  { %v1500_v50 = vpop.f32.mrf.mxu1  ;;  %2102 = vmatpush.msrb.mxu1 %v2775_v45  ;;  %2024 = vmatpush.msra.mxu0 %v2758_v40  ;;  %v2752_v45 = vld [vmem:[%s5258_s4 + $0x728] sm:$0xff] }
 0x26f   :  { %v1511_v16 = vadd.f32 %v1500_v50, %v1432_v47  ;;  %1947 = vmatpush.msrb.mxu3 %v2740_v38  ;;  %2182 = vmatpush.msrb.mxu2 %v2790_v62  ;;  %v2784_v40 = vld [vmem:[%s5258_s4 + $0x828] sm:$0xff] }
 0x270   :  { %2103 = vmatpush.msrb.mxu1 %v2774_v53  ;;  %v2809_v53 = vld [vmem:[%s5258_s4 + $0x8f0] sm:$0xff] }
 0x271   :  { %v1520_v18 = vmax.f32 %v1511_v16, 0.0  ;;  %v5292_v16 = vld [vmem:[#allocation6_spill] sm:$0xff] }
 0x273   :  { %1577 = vmatmul.f32.gmra.mxu2 %v1520_v18 }
 0x2b6   :  { %v1554_v3 = vpop.f32.mrf.mxu2 }
 0x2b7   :  { %v4750_v44 = vadd.f32 %v1554_v3, %v3949_v5  ;;  %v2735_v3 = vld [vmem:[%s5258_s4 + $0x6a0] sm:$0xff] }
 0x2b9   :  { %v1590_v43 = vmax.f32 %v4750_v44, 0.0 }
 0x2bb   :  { %v4754_v15 = vmul.f32 %v1590_v43, %v3951_v7  ;;  %v5295_v43 = vld [vmem:[#allocation9_spill] sm:$0xff] }
 0x2bd   :  { %1608 = vst [vmem:[#allocation2 + $0x8] sm:$0xff] %v4754_v15 }
 0x2be   :  { %v1557_v1 = vpop.f32.mrf.mxu2 }
 0x2bf   :  { %v4764_v5 = vadd.f32 %v1557_v1, %v3967_v33  ;;  %v2757_v1 = vld [vmem:[%s5258_s4 + $0x750] sm:$0xff] }
 0x2c0   :  { %2025 = vmatpush.msra.mxu0 %v2757_v1  ;;  %v2783_v1 = vld [vmem:[%s5258_s4 + $0x820] sm:$0xff] }
 0x2c1   :  { %v1591_v61 = vmax.f32 %v4764_v5, 0.0 }
 0x2c3   :  { %v4768_v7 = vmul.f32 %v1591_v61, %v3971_v60  ;;  %v2739_v60 = vld [vmem:[%s5258_s4 + $0x6c0] sm:$0xff]  ;;  %v2773_v61 = vld [vmem:[%s5258_s4 + $0x7d0] sm:$0xff] }
 0x2c4   :  { %v1643_v48 = vld [vmem:[#allocation2 + $0x2] sm:$0xff]  ;;  %1948 = vmatpush.msrb.mxu3 %v2739_v60  ;;  %2104 = vmatpush.msrb.mxu1 %v2773_v61  ;;  %v5300_v61 = vld [vmem:[#allocation14_spill] sm:$0xff] }
 0x2c5   :  { %v1617_v22 = vld [vmem:[#allocation2 + $0x1] sm:$0xff]  ;;  %1609 = vst [vmem:[#allocation2 + $0x10] sm:$0xff] %v4768_v7  ;;  %1685 = vmatmul.f32.vlgmr.msra.gmra.mxu3 %v1643_v48  ;;  %v2734_v48 = vld [vmem:[%s5258_s4 + $0x698] sm:$0xff] }
 0x2c6   :  { %v1757_v20 = vld [vmem:[#allocation2 + $0x3] sm:$0xff]  ;;  %1729 = vmatmul.f32.vlgmr.msrb.gmra.mxu0 %v1617_v22  ;;  %v1560_v33 = vpop.f32.mrf.mxu2  ;;  %1949 = vmatpush.msrb.mxu3 %v2738_v56 }
 0x2c7   :  { %v1836_v17 = vld [vmem:[#allocation2 + $0x7] sm:$0xff]  ;;  %1799 = vmatmul.f32.vlgmr.msra.gmra.mxu1 %v1757_v20  ;;  %v4778_v58 = vadd.f32 %v1560_v33, %v5289_v8  ;;  %v2789_v20 = vld [vmem:[%s5258_s4 + $0x850] sm:$0xff] }
 0x2c8   :  { %1878 = vmatmul.f32.vlgmr.msra.gmra.mxu2 %v1836_v17  ;;  %1950 = vmatpush.msrb.mxu3 %v2737_v63  ;;  %v5296_v17 = vld [vmem:[#allocation10_spill] sm:$0xff]  ;;  %v2756_v33 = vld [vmem:[%s5258_s4 + $0x748] sm:$0xff]  ;;  %v2787_v63 = vld [vmem:[%s5258_s4 + $0x840] sm:$0xff] }
 0x2c9   :  { %v1592_v13 = vmax.f32 %v4778_v58, 0.0  ;;  %v2772_v60 = vld [vmem:[%s5258_s4 + $0x7c8] sm:$0xff]  ;;  %v2733_v8 = vld [vmem:[%s5258_s4 + $0x690] sm:$0xff]  ;;  %2183 = vmatpush.msrb.mxu2 %v2789_v20  ;;  %2026 = vmatpush.msra.mxu0 %v2756_v33  ;;  %v2766_v20 = vld [vmem:[%s5258_s4 + $0x798] sm:$0xff] }
 0x2ca   :  { %1951 = vmatpush.msrb.mxu3 %v2736_v0  ;;  %v2788_v56 = vld [vmem:[%s5258_s4 + $0x848] sm:$0xff]  ;;  %2105 = vmatpush.msrb.mxu1 %v2772_v60  ;;  %v2769_v0 = vld [vmem:[%s5258_s4 + $0x7b0] sm:$0xff] }
 0x2cb   :  { %v4782_v55 = vmul.f32 %v1592_v13, %v5290_v51  ;;  %2184 = vmatpush.msrb.mxu2 %v2788_v56  ;;  %v2749_v56 = vld [vmem:[%s5258_s4 + $0x710] sm:$0xff] }
 0x2cc   :  { %v1644_v49 = vld [vmem:[#allocation2 + $0xa] sm:$0xff]  ;;  %1952 = vmatpush.msrb.mxu3 %v2735_v3  ;;  %v2751_v3 = vld [vmem:[%s5258_s4 + $0x720] sm:$0xff] }
 0x2cd   :  { %v4784_v52 = vld [vmem:[#allocation2 + $0x9] sm:$0xff]  ;;  %1610 = vst [vmem:[#allocation2 + $0x18] sm:$0xff] %v4782_v55  ;;  %1688 = vmatmul.f32.gmra.mxu3 %v1644_v49  ;;  %2185 = vmatpush.msrb.mxu2 %v2787_v63  ;;  %v2807_v63 = vld [vmem:[%s5258_s4 + $0x8e0] sm:$0xff] }
 0x2ce   :  { %v1758_v19 = vld [vmem:[#allocation2 + $0xb] sm:$0xff]  ;;  %1732 = vmatmul.f32.gmra.mxu0 %v4784_v52  ;;  %v1563_v35 = vpop.f32.mrf.mxu2  ;;  %1953 = vmatpush.msrb.mxu3 %v2734_v48 }
 0x2cf   :  { %v4788_v9 = vld [vmem:[#allocation2 + $0xf] sm:$0xff]  ;;  %1802 = vmatmul.f32.gmra.mxu1 %v1758_v19  ;;  %v4795_v47 = vadd.f32 %v1563_v35, %v5291_v28  ;;  %v2755_v28 = vld [vmem:[%s5258_s4 + $0x740] sm:$0xff]  ;;  %2186 = vmatpush.msrb.mxu2 %v2786_v6 }
 0x2d0   :  { %1881 = vmatmul.f32.gmra.mxu2 %v4788_v9  ;;  %1954 = vmatpush.msrb.mxu3 %v2733_v8  ;;  %v2780_v6 = vld [vmem:[%s5258_s4 + $0x808] sm:$0xff] }
 0x2d1   :  { %v1593_v50 = vmax.f32 %v4795_v47, 0.0  ;;  %2027 = vmatpush.msra.mxu0 %v2755_v28  ;;  %v2808_v28 = vld [vmem:[%s5258_s4 + $0x8e8] sm:$0xff] }
 0x2d3   :  { %v4799_v18 = vmul.f32 %v1593_v50, %v5292_v16  ;;  %v2771_v50 = vld [vmem:[%s5258_s4 + $0x7c0] sm:$0xff]  ;;  %v2732_v16 = vld [vmem:[%s5258_s4 + $0x688] sm:$0xff]  ;;  %2028 = vmatpush.msra.mxu0 %v2754_v34 }
 0x2d4   :  { %v1645_v23 = vld [vmem:[#allocation2 + $0x12] sm:$0xff]  ;;  %1955 = vmatpush.msrb.mxu3 %v2732_v16  ;;  %2106 = vmatpush.msrb.mxu1 %v2771_v50  ;;  %v2748_v34 = vld [vmem:[%s5258_s4 + $0x708] sm:$0xff] }
 0x2d5   :  { %v4801_v21 = vld [vmem:[#allocation2 + $0x11] sm:$0xff]  ;;  %1611 = vst [vmem:[#allocation2 + $0x20] sm:$0xff] %v4799_v18  ;;  %1691 = vmatmul.f32.gmra.mxu3 %v1645_v23  ;;  %2029 = vmatpush.msra.mxu0 %v2753_v46  ;;  %v2747_v46 = vld [vmem:[%s5258_s4 + $0x700] sm:$0xff] }
 0x2d6   :  { %v1759_v57 = vld [vmem:[#allocation2 + $0x13] sm:$0xff]  ;;  %1735 = vmatmul.f32.gmra.mxu0 %v4801_v21  ;;  %v1566_v4 = vpop.f32.mrf.mxu2  ;;  %1956 = vmatpush.msrb.mxu3 %v2731_v2  ;;  %v5302_v2 = vld [vmem:[#allocation16_spill] sm:$0xff] }
 0x2d7   :  { %v4805_v30 = vld [vmem:[#allocation2 + $0x17] sm:$0xff]  ;;  %1805 = vmatmul.f32.gmra.mxu1 %v1759_v57  ;;  %v4824_v42 = vadd.f32 %v1566_v4, %v5293_v25  ;;  %v5298_v25 = vld [vmem:[#allocation12_spill] sm:$0xff]  ;;  %2030 = vmatpush.msra.mxu0 %v2752_v45 }
 0x2d8   :  { %1884 = vmatmul.f32.gmra.mxu2 %v4805_v30  ;;  %v5297_v23 = vld [vmem:[#allocation11_spill] sm:$0xff]  ;;  %v2779_v45 = vld [vmem:[%s5258_s4 + $0x800] sm:$0xff] }
 0x2d9   :  { %v1594_v12 = vmax.f32 %v4824_v42, 0.0  ;;  %v2770_v4 = vld [vmem:[%s5258_s4 + $0x7b8] sm:$0xff]  ;;  %2031 = vmatpush.msra.mxu0 %v2751_v3 }
 0x2da   :  { %2107 = vmatpush.msrb.mxu1 %v2770_v4  ;;  %v5301_v50 = vld [vmem:[#allocation15_spill] sm:$0xff]  ;;  %v2764_v4 = vld [vmem:[%s5258_s4 + $0x788] sm:$0xff] }
 0x2db   :  { %v4846_v31 = vmul.f32 %v1594_v12, %v5294_v11  ;;  %v2785_v11 = vld [vmem:[%s5258_s4 + $0x830] sm:$0xff] }
 0x2dc   :  { %v1646_v36 = vld [vmem:[#allocation2 + $0x1a] sm:$0xff]  ;;  %2108 = vmatpush.msrb.mxu1 %v2769_v0  ;;  %2187 = vmatpush.msrb.mxu2 %v2785_v11 }
 0x2dd   :  { %v4854_v59 = vld [vmem:[#allocation2 + $0x19] sm:$0xff]  ;;  %1612 = vst [vmem:[#allocation2 + $0x28] sm:$0xff] %v4846_v31  ;;  %1694 = vmatmul.f32.gmra.mxu3 %v1646_v36  ;;  %v2768_v36 = vld [vmem:[%s5258_s4 + $0x7a8] sm:$0xff] }
 0x2de   :  { %v1760_v14 = vld [vmem:[#allocation2 + $0x1b] sm:$0xff]  ;;  %1738 = vmatmul.f32.gmra.mxu0 %v4854_v59  ;;  %v1569_v24 = vpop.f32.mrf.mxu2  ;;  %2109 = vmatpush.msrb.mxu1 %v2768_v36 }
 0x2df   :  { %v4858_v27 = vld [vmem:[#allocation2 + $0x1f] sm:$0xff]  ;;  %1808 = vmatmul.f32.gmra.mxu1 %v1760_v14  ;;  %v4874_v29 = vadd.f32 %v1569_v24, %v5295_v43  ;;  %2188 = vmatpush.msrb.mxu2 %v2784_v40 }
 0x2e0   :  { %1887 = vmatmul.f32.gmra.mxu2 %v4858_v27  ;;  %v2810_v14 = vld [vmem:[%s5258_s4 + $0x8f8] sm:$0xff]  ;;  %v2767_v43 = vld [vmem:[%s5258_s4 + $0x7a0] sm:$0xff] }
 0x2e1   :  { %v1595_v22 = vmax.f32 %v4874_v29, 0.0  ;;  %2257 = vmatpush.msra.mxu3 %v2810_v14  ;;  %2110 = vmatpush.msrb.mxu1 %v2767_v43  ;;  %v2763_v0 = vld [vmem:[%s5258_s4 + $0x780] sm:$0xff]  ;;  %v2806_v36 = vld [vmem:[%s5258_s4 + $0x8d8] sm:$0xff]  ;;  %v2805_v14 = vld [vmem:[%s5258_s4 + $0x8d0] sm:$0xff] }
 0x2e2   :  { %2189 = vmatpush.msrb.mxu2 %v2783_v1  ;;  %v2804_v43 = vld [vmem:[%s5258_s4 + $0x8c8] sm:$0xff] }
 0x2e3   :  { %v4893_v38 = vmul.f32 %v1595_v22, %v5296_v17  ;;  %2258 = vmatpush.msra.mxu3 %v2809_v53  ;;  %v2750_v22 = vld [vmem:[%s5258_s4 + $0x718] sm:$0xff]  ;;  %2111 = vmatpush.msrb.mxu1 %v2766_v20  ;;  %v2152_v1 = vld [vmem:[#allocation2 + $0xe] sm:$0xff] }
 0x2e4   :  { %v1647_v13 = vld [vmem:[#allocation2 + $0x22] sm:$0xff]  ;;  %2032 = vmatpush.msra.mxu0 %v2750_v22  ;;  %v2802_v22 = vld [vmem:[%s5258_s4 + $0x8b8] sm:$0xff]  ;;  %v2801_v20 = vld [vmem:[%s5258_s4 + $0x8b0] sm:$0xff] }
 0x2e5   :  { %v4904_v51 = vld [vmem:[#allocation2 + $0x21] sm:$0xff]  ;;  %1613 = vst [vmem:[#allocation2 + $0x30] sm:$0xff] %v4893_v38  ;;  %1697 = vmatmul.f32.gmra.mxu3 %v1647_v13  ;;  %v2782_v13 = vld [vmem:[%s5258_s4 + $0x818] sm:$0xff] }
 0x2e6   :  { %v1761_v49 = vld [vmem:[#allocation2 + $0x23] sm:$0xff]  ;;  %1741 = vmatmul.f32.gmra.mxu0 %v4904_v51  ;;  %v1572_v35 = vpop.f32.mrf.mxu2  ;;  %2190 = vmatpush.msrb.mxu2 %v2782_v13  ;;  %v2798_v13 = vld [vmem:[%s5258_s4 + $0x898] sm:$0xff] }
 0x2e7   :  { %v4908_v19 = vld [vmem:[#allocation2 + $0x27] sm:$0xff]  ;;  %1811 = vmatmul.f32.gmra.mxu1 %v1761_v49  ;;  %v4924_v57 = vadd.f32 %v1572_v35, %v5297_v23  ;;  %v2765_v35 = vld [vmem:[%s5258_s4 + $0x790] sm:$0xff]  ;;  %2259 = vmatpush.msra.mxu3 %v2808_v28 }
 0x2e8   :  { %1890 = vmatmul.f32.gmra.mxu2 %v4908_v19  ;;  %v2781_v23 = vld [vmem:[%s5258_s4 + $0x810] sm:$0xff]  ;;  %2033 = vmatpush.msra.mxu0 %v2749_v56 }
 0x2e9   :  { %v1596_v39 = vmax.f32 %v4924_v57, 0.0  ;;  %2112 = vmatpush.msrb.mxu1 %v2765_v35  ;;  %2191 = vmatpush.msrb.mxu2 %v2781_v23  ;;  %v2797_v35 = vld [vmem:[%s5258_s4 + $0x890] sm:$0xff] }
 0x2ea   :  { %2260 = vmatpush.msra.mxu3 %v2807_v63  ;;  %2034 = vmatpush.msra.mxu0 %v2748_v34 }
 0x2eb   :  { %v4943_v26 = vmul.f32 %v1596_v39, %v5298_v25  ;;  %2113 = vmatpush.msrb.mxu1 %v2764_v4  ;;  %2192 = vmatpush.msrb.mxu2 %v2780_v6 }
 0x2ec   :  { %v1648_v10 = vld [vmem:[#allocation2 + $0x2a] sm:$0xff]  ;;  %2035 = vmatpush.msra.mxu0 %v2747_v46  ;;  %2261 = vmatpush.msra.mxu3 %v2806_v36 }
 0x2ed   :  { %v4951_v12 = vld [vmem:[#allocation2 + $0x29] sm:$0xff]  ;;  %1614 = vst [vmem:[#allocation2 + $0x38] sm:$0xff] %v4943_v26  ;;  %1700 = vmatmul.f32.gmra.mxu3 %v1648_v10  ;;  %2114 = vmatpush.msrb.mxu1 %v2763_v0 }
 0x2ee   :  { %v1762_v37 = vld [vmem:[#allocation2 + $0x2b] sm:$0xff]  ;;  %1744 = vmatmul.f32.gmra.mxu0 %v4951_v12  ;;  %v1575_v54 = vpop.f32.mrf.mxu2  ;;  %2193 = vmatpush.msrb.mxu2 %v2779_v45 }
 0x2ef   :  { %v4955_v41 = vld [vmem:[#allocation2 + $0x2f] sm:$0xff]  ;;  %1814 = vmatmul.f32.gmra.mxu1 %v1762_v37  ;;  %v4971_v24 = vadd.f32 %v1575_v54, %v5299_v32  ;;  %2262 = vmatpush.msra.mxu3 %v2805_v14 }
 0x2f0   :  { %1893 = vmatmul.f32.gmra.mxu2 %v4955_v41  ;;  %v2156_v56 = vld [vmem:[#allocation2 + $0x2e] sm:$0xff] }
 0x2f1   :  { %v1597_v62 = vmax.f32 %v4971_v24, 0.0  ;;  %2263 = vmatpush.msra.mxu3 %v2804_v43 }
 0x2f3   :  { %v4990_v48 = vmul.f32 %v1597_v62, %v5300_v61  ;;  %v2073_v62 = vld [vmem:[#allocation2 + $0xd] sm:$0xff]  ;;  %v2803_v61 = vld [vmem:[%s5258_s4 + $0x8c0] sm:$0xff] }
 0x2f4   :  { %v1649_v17 = vld [vmem:[#allocation2 + $0x32] sm:$0xff]  ;;  %2264 = vmatpush.msra.mxu3 %v2803_v61 }
 0x2f5   :  { %v4998_v33 = vld [vmem:[#allocation2 + $0x31] sm:$0xff]  ;;  %1615 = vst [vmem:[#allocation2 + $0x40] sm:$0xff] %v4990_v48  ;;  %1703 = vmatmul.f32.gmra.mxu3 %v1649_v17  ;;  %v2800_v17 = vld [vmem:[%s5258_s4 + $0x8a8] sm:$0xff] }
 0x2f6   :  { %v1763_v60 = vld [vmem:[#allocation2 + $0x33] sm:$0xff]  ;;  %1747 = vmatmul.f32.gmra.mxu0 %v4998_v33  ;;  %v1578_v49 = vpop.f32.mrf.mxu2  ;;  %2265 = vmatpush.msra.mxu3 %v2802_v22 }
 0x2f7   :  { %v5002_v8 = vld [vmem:[#allocation2 + $0x37] sm:$0xff]  ;;  %1817 = vmatmul.f32.gmra.mxu1 %v1763_v60  ;;  %v5018_v16 = vadd.f32 %v1578_v49, %v5301_v50  ;;  %v2799_v60 = vld [vmem:[%s5258_s4 + $0x8a0] sm:$0xff]  ;;  %v2077_v49 = vld [vmem:[#allocation2 + $0x2d] sm:$0xff] }
 0x2f8   :  { %1896 = vmatmul.f32.gmra.mxu2 %v5002_v8  ;;  %2266 = vmatpush.msra.mxu3 %v2801_v20 }
 0x2f9   :  { %v1598_v39 = vmax.f32 %v5018_v16, 0.0 }
 0x2fa   :  { %2267 = vmatpush.msra.mxu3 %v2800_v17 }
 0x2fb   :  { %v5037_v25 = vmul.f32 %v1598_v39, %v5302_v2 }
 0x2fc   :  { %v1650_v10 = vld [vmem:[#allocation2 + $0x3a] sm:$0xff]  ;;  %2268 = vmatpush.msra.mxu3 %v2799_v60 }
 0x2fd   :  { %v5045_v37 = vld [vmem:[#allocation2 + $0x39] sm:$0xff]  ;;  %1616 = vst [vmem:[#allocation2 + $0x48] sm:$0xff] %v5037_v25  ;;  %1706 = vmatmul.f32.gmra.mxu3 %v1650_v10 }
 0x2fe   :  { %v1764_v11 = vld [vmem:[#allocation2 + $0x3b] sm:$0xff]  ;;  %1750 = vmatmul.f32.gmra.mxu0 %v5045_v37  ;;  %2269 = vmatpush.msra.mxu3 %v2798_v13 }
 0x2ff   :  { %v5049_v54 = vld [vmem:[#allocation2 + $0x3f] sm:$0xff]  ;;  %1820 = vmatmul.f32.gmra.mxu1 %v1764_v11 }
 0x300   :  { %1899 = vmatmul.f32.gmra.mxu2 %v5049_v54  ;;  %2270 = vmatpush.msra.mxu3 %v2797_v35  ;;  %v2079_v28 = vld [vmem:[#allocation2 + $0x3d] sm:$0xff] }
 0x301   :  { %v2158_v50 = vld [vmem:[#allocation2 + $0x3e] sm:$0xff] }
 0x304   :  { %v1651_v32 = vld [vmem:[#allocation2 + $0x42] sm:$0xff]  ;;  %v2081_v10 = vld [vmem:[#allocation2 + $0x4d] sm:$0xff] }
 0x305   :  { %v5061_v40 = vld [vmem:[#allocation2 + $0x41] sm:$0xff]  ;;  %1709 = vmatmul.f32.gmra.mxu3 %v1651_v32  ;;  %v2002_v46 = vld [vmem:[#allocation2 + $0x49] sm:$0xff] }
 0x306   :  { %v1765_v53 = vld [vmem:[#allocation2 + $0x43] sm:$0xff]  ;;  %1753 = vmatmul.f32.gmra.mxu0 %v5061_v40 }
 0x307   :  { %v5064_v3 = vld [vmem:[#allocation2 + $0x47] sm:$0xff]  ;;  %1823 = vmatmul.f32.gmra.mxu1 %v1765_v53 }
 0x308   :  { %1902 = vmatmul.f32.gmra.mxu2 %v5064_v3  ;;  %v2159_v63 = vld [vmem:[#allocation2 + $0x46] sm:$0xff] }
 0x30d   :  { %1957 = vmatmul.f32.vlgmr.msrb.gmra.mxu3 %v4754_v15  ;;  %v2074_v15 = vld [vmem:[#allocation2 + $0x15] sm:$0xff] }
 0x30e   :  { %2036 = vmatmul.f32.vlgmr.msra.gmra.mxu0 %v4784_v52  ;;  %v2153_v52 = vld [vmem:[#allocation2 + $0x16] sm:$0xff] }
 0x30f   :  { %2115 = vmatmul.f32.vlgmr.msrb.gmra.mxu1 %v2073_v62 }
 0x310   :  { %2194 = vmatmul.f32.vlgmr.msrb.gmra.mxu2 %v2152_v1 }
 0x315   :  { %1960 = vmatmul.f32.gmra.mxu3 %v4768_v7  ;;  %v2075_v7 = vld [vmem:[#allocation2 + $0x1d] sm:$0xff] }
 0x316   :  { %2039 = vmatmul.f32.gmra.mxu0 %v4801_v21  ;;  %v2154_v21 = vld [vmem:[#allocation2 + $0x1e] sm:$0xff] }
 0x317   :  { %2118 = vmatmul.f32.gmra.mxu1 %v2074_v15 }
 0x318   :  { %2197 = vmatmul.f32.gmra.mxu2 %v2153_v52 }
 0x31d   :  { %1963 = vmatmul.f32.gmra.mxu3 %v4782_v55  ;;  %v2076_v55 = vld [vmem:[#allocation2 + $0x25] sm:$0xff] }
 0x31e   :  { %2042 = vmatmul.f32.gmra.mxu0 %v4854_v59  ;;  %v2155_v59 = vld [vmem:[#allocation2 + $0x26] sm:$0xff] }
 0x31f   :  { %2121 = vmatmul.f32.gmra.mxu1 %v2075_v7 }
 0x320   :  { %2200 = vmatmul.f32.gmra.mxu2 %v2154_v21 }
 0x325   :  { %1966 = vmatmul.f32.gmra.mxu3 %v4799_v18  ;;  %v2796_v18 = vld [vmem:[%s5258_s4 + $0x888] sm:$0xff] }
 0x326   :  { %2045 = vmatmul.f32.gmra.mxu0 %v4904_v51  ;;  %2271 = vmatpush.msra.mxu3 %v2796_v18  ;;  %v2157_v51 = vld [vmem:[#allocation2 + $0x36] sm:$0xff] }
 0x327   :  { %2124 = vmatmul.f32.gmra.mxu1 %v2076_v55 }
 0x328   :  { %2203 = vmatmul.f32.gmra.mxu2 %v2155_v59 }
 0x32d   :  { %1969 = vmatmul.f32.gmra.mxu3 %v4846_v31  ;;  %v2078_v31 = vld [vmem:[#allocation2 + $0x35] sm:$0xff] }
 0x32e   :  { %2048 = vmatmul.f32.gmra.mxu0 %v4951_v12  ;;  %v2795_v12 = vld [vmem:[%s5258_s4 + $0x880] sm:$0xff] }
 0x32f   :  { %2127 = vmatmul.f32.gmra.mxu1 %v2077_v49  ;;  %2272 = vmatpush.msra.mxu3 %v2795_v12 }
 0x330   :  { %2206 = vmatmul.f32.gmra.mxu2 %v2156_v56 }
 0x335   :  { %1972 = vmatmul.f32.gmra.mxu3 %v4893_v38 }
 0x336   :  { %2051 = vmatmul.f32.gmra.mxu0 %v4998_v33  ;;  %v2080_v33 = vld [vmem:[#allocation2 + $0x45] sm:$0xff] }
 0x337   :  { %2130 = vmatmul.f32.gmra.mxu1 %v2078_v31 }
 0x338   :  { %2209 = vmatmul.f32.gmra.mxu2 %v2157_v51 }
 0x33d   :  { %1975 = vmatmul.f32.gmra.mxu3 %v4943_v26 }
 0x33e   :  { %2054 = vmatmul.f32.gmra.mxu0 %v5045_v37 }
 0x33f   :  { %2133 = vmatmul.f32.gmra.mxu1 %v2079_v28 }
 0x340   :  { %2212 = vmatmul.f32.gmra.mxu2 %v2158_v50 }
 0x343   :  { %v1730_v38 = vpop.f32.mrf.mxu0 }
 0x344   :  { %v1800_v23 = vpop.f32.mrf.mxu1 }
 0x345   :  { %1978 = vmatmul.f32.gmra.mxu3 %v4990_v48  ;;  %v2160_v48 = vld [vmem:[#allocation2 + $0x4e] sm:$0xff] }
 0x346   :  { %2057 = vmatmul.f32.gmra.mxu0 %v5061_v40 }
 0x347   :  { %2136 = vmatmul.f32.gmra.mxu1 %v2080_v33 }
 0x348   :  { %2215 = vmatmul.f32.gmra.mxu2 %v2159_v63  ;;  %v1686_v34 = vpop.f32.mrf.mxu3 }
 0x349   :  { %v1731_v4 = vadd.f32 %v1730_v38, %v1686_v34 }
 0x34b   :  { %v1879_v39 = vpop.f32.mrf.mxu2  ;;  %v1733_v26 = vpop.f32.mrf.mxu0  ;;  %v1827_v6 = vadd.f32 %v1800_v23, %v1731_v4 }
 0x34c   :  { %v1803_v2 = vpop.f32.mrf.mxu1 }
 0x34d   :  { %v5113_v0 = vadd.f32 %v1879_v39, %v1827_v6  ;;  %1981 = vmatmul.f32.gmra.mxu3 %v5037_v25 }
 0x34e   :  { %2060 = vmatmul.f32.gmra.mxu0 %v2002_v46 }
 0x34f   :  { %2139 = vmatmul.f32.gmra.mxu1 %v2081_v10 }
 0x350   :  { %2218 = vmatmul.f32.gmra.mxu2 %v2160_v48  ;;  %v1689_v37 = vpop.f32.mrf.mxu3 }
 0x351   :  { %v1734_v11 = vadd.f32 %v1733_v26, %v1689_v37 }
 0x353   :  { %v1882_v45 = vpop.f32.mrf.mxu2  ;;  %v1736_v36 = vpop.f32.mrf.mxu0  ;;  %v1828_v14 = vadd.f32 %v1803_v2, %v1734_v11 }
 0x354   :  { %v1806_v32 = vpop.f32.mrf.mxu1 }
 0x355   :  { %v5116_v40 = vadd.f32 %v1882_v45, %v1828_v14  ;;  %2273 = vmatmul.f32.vlgmr.msra.gmra.mxu3 %v4788_v9 }
 0x358   :  { %v1692_v53 = vpop.f32.mrf.mxu3 }
 0x359   :  { %v1737_v43 = vadd.f32 %v1736_v36, %v1692_v53  ;;  %v2824_v36 = vld [vmem:[%s5259_s5 + $0xe8] sm:$0xff] }
 0x35a   :  { %v2239_v53 = vld [vmem:[#allocation2 + $0x4f] sm:$0xff] }
 0x35b   :  { %v1885_v62 = vpop.f32.mrf.mxu2  ;;  %v1739_v1 = vpop.f32.mrf.mxu0  ;;  %v1829_v25 = vadd.f32 %v1806_v32, %v1737_v43  ;;  %v2822_v43 = vld [vmem:[%s5259_s5 + $0xd8] sm:$0xff] }
 0x35c   :  { %v1809_v61 = vpop.f32.mrf.mxu1 }
 0x35d   :  { %v5119_v22 = vadd.f32 %v1885_v62, %v1829_v25  ;;  %2276 = vmatmul.f32.gmra.mxu3 %v4805_v30  ;;  %v2820_v25 = vld [vmem:[%s5259_s5 + $0xc8] sm:$0xff] }
 0x360   :  { %v1695_v15 = vpop.f32.mrf.mxu3 }
 0x361   :  { %v1740_v52 = vadd.f32 %v1739_v1, %v1695_v15 }
 0x363   :  { %v1888_v20 = vpop.f32.mrf.mxu2  ;;  %v1742_v17 = vpop.f32.mrf.mxu0  ;;  %v1830_v7 = vadd.f32 %v1809_v61, %v1740_v52  ;;  %v2818_v52 = vld [vmem:[%s5259_s5 + $0xb8] sm:$0xff] }
 0x364   :  { %v1812_v21 = vpop.f32.mrf.mxu1 }
 0x365   :  { %v5122_v60 = vadd.f32 %v1888_v20, %v1830_v7  ;;  %2279 = vmatmul.f32.gmra.mxu3 %v4858_v27 }
 0x368   :  { %v1698_v9 = vpop.f32.mrf.mxu3 }
 0x369   :  { %v1743_v13 = vadd.f32 %v1742_v17, %v1698_v9  ;;  %v2816_v9 = vld [vmem:[%s5259_s5 + $0xa8] sm:$0xff] }
 0x36b   :  { %v1891_v55 = vpop.f32.mrf.mxu2  ;;  %v1745_v59 = vpop.f32.mrf.mxu0  ;;  %v1831_v49 = vadd.f32 %v1812_v21, %v1743_v13 }
 0x36c   :  { %v1815_v56 = vpop.f32.mrf.mxu1 }
 0x36d   :  { %v5125_v35 = vadd.f32 %v1891_v55, %v1831_v49  ;;  %2282 = vmatmul.f32.gmra.mxu3 %v4908_v19  ;;  %v2813_v49 = vld [vmem:[%s5259_s5 + $0x90] sm:$0xff] }
 0x370   :  { %v1701_v30 = vpop.f32.mrf.mxu3 }
 0x371   :  { %v1746_v18 = vadd.f32 %v1745_v59, %v1701_v30  ;;  %v2814_v59 = vld [vmem:[%s5259_s5 + $0x98] sm:$0xff]  ;;  %v2811_v30 = vld [vmem:[%s5259_s5 + $0x80] sm:$0xff] }
 0x373   :  { %v1894_v31 = vpop.f32.mrf.mxu2  ;;  %v1832_v51 = vadd.f32 %v1815_v56, %v1746_v18  ;;  %v1748_v12 = vpop.f32.mrf.mxu0  ;;  %v2812_v56 = vld [vmem:[%s5259_s5 + $0x88] sm:$0xff] }
 0x374   :  { %v1818_v27 = vpop.f32.mrf.mxu1 }
 0x375   :  { %v5128_v28 = vadd.f32 %v1894_v31, %v1832_v51  ;;  %2285 = vmatmul.f32.gmra.mxu3 %v4955_v41  ;;  %v2826_v41 = vld [vmem:[%s5259_s5 + $0xf8] sm:$0xff] }
 0x376   :  { %2336 = vmatpush.msrb.mxu0 %v2826_v41  ;;  %2859 = vmatpush.msrb.mxu3 %v2826_v41 }
 0x378   :  { %v1704_v50 = vpop.f32.mrf.mxu3 }
 0x379   :  { %v1749_v38 = vadd.f32 %v1748_v12, %v1704_v50 }
 0x37b   :  { %v1897_v23 = vpop.f32.mrf.mxu2  ;;  %v1833_v33 = vadd.f32 %v1818_v27, %v1749_v38  ;;  %v1751_v34 = vpop.f32.mrf.mxu0 }
 0x37c   :  { %v1821_v19 = vpop.f32.mrf.mxu1 }
 0x37d   :  { %v5131_v63 = vadd.f32 %v1897_v23, %v1833_v33  ;;  %2288 = vmatmul.f32.gmra.mxu3 %v5002_v8 }
 0x380   :  { %v1707_v4 = vpop.f32.mrf.mxu3 }
 0x381   :  { %v1752_v39 = vadd.f32 %v1751_v34, %v1707_v4 }
 0x383   :  { %v1900_v26 = vpop.f32.mrf.mxu2  ;;  %v1834_v6 = vadd.f32 %v1821_v19, %v1752_v39  ;;  %v1754_v46 = vpop.f32.mrf.mxu0 }
 0x384   :  { %v1824_v8 = vpop.f32.mrf.mxu1 }
 0x385   :  { %v5134_v2 = vadd.f32 %v1900_v26, %v1834_v6  ;;  %2291 = vmatmul.f32.gmra.mxu3 %v5049_v54  ;;  %v2825_v54 = vld [vmem:[%s5259_s5 + $0xf0] sm:$0xff] }
 0x386   :  { %2337 = vmatpush.msrb.mxu0 %v2825_v54  ;;  %2860 = vmatpush.msrb.mxu3 %v2825_v54 }
 0x388   :  { %v1710_v10 = vpop.f32.mrf.mxu3  ;;  %2338 = vmatpush.msrb.mxu0 %v2824_v36  ;;  %2861 = vmatpush.msrb.mxu3 %v2824_v36 }
 0x389   :  { %v1755_v48 = vadd.f32 %v1754_v46, %v1710_v10 }
 0x38b   :  { %v1835_v37 = vadd.f32 %v1824_v8, %v1755_v48  ;;  %v1903_v11 = vpop.f32.mrf.mxu2 }
 0x38c   :  { %v2116_v51 = vpop.f32.mrf.mxu1 }
 0x38d   :  { %v5140_v45 = vadd.f32 %v1903_v11, %v1835_v37  ;;  %2294 = vmatmul.f32.gmra.mxu3 %v5064_v3  ;;  %v2823_v3 = vld [vmem:[%s5259_s5 + $0xe0] sm:$0xff] }
 0x38e   :  { %2339 = vmatpush.msrb.mxu0 %v2823_v3  ;;  %2862 = vmatpush.msrb.mxu3 %v2823_v3 }
 0x390   :  { %v1958_v14 = vpop.f32.mrf.mxu3  ;;  %2340 = vmatpush.msrb.mxu0 %v2822_v43  ;;  %2863 = vmatpush.msrb.mxu3 %v2822_v43 }
 0x391   :  { %v5150_v32 = vadd.f32 %v1958_v14, %v5113_v0  ;;  %v2821_v0 = vld [vmem:[%s5259_s5 + $0xd0] sm:$0xff] }
 0x392   :  { %2341 = vmatpush.msrb.mxu0 %v2821_v0  ;;  %2864 = vmatpush.msrb.mxu3 %v2821_v0 }
 0x393   :  { %v2195_v12 = vpop.f32.mrf.mxu2 }
 0x394   :  { %2342 = vmatpush.msrb.mxu0 %v2820_v25  ;;  %2865 = vmatpush.msrb.mxu3 %v2820_v25  ;;  %v2119_v38 = vpop.f32.mrf.mxu1 }
 0x395   :  { %2297 = vmatmul.f32.gmra.mxu3 %v2239_v53 }
 0x398   :  { %v1961_v62 = vpop.f32.mrf.mxu3 }
 0x399   :  { %v1986_v1 = vadd.f32 %v1961_v62, %v5116_v40  ;;  %v2819_v40 = vld [vmem:[%s5259_s5 + $0xc0] sm:$0xff] }
 0x39a   :  { %2343 = vmatpush.msrb.mxu0 %v2819_v40  ;;  %2866 = vmatpush.msrb.mxu3 %v2819_v40 }
 0x39b   :  { %v2198_v33 = vpop.f32.mrf.mxu2 }
 0x39c   :  { %2344 = vmatpush.msrb.mxu0 %v2818_v52  ;;  %2867 = vmatpush.msrb.mxu3 %v2818_v52  ;;  %v2122_v39 = vpop.f32.mrf.mxu1 }
 0x3a0   :  { %v1964_v61 = vpop.f32.mrf.mxu3 }
 0x3a1   :  { %v1987_v15 = vadd.f32 %v1964_v61, %v5119_v22  ;;  %v2817_v22 = vld [vmem:[%s5259_s5 + $0xb0] sm:$0xff] }
 0x3a2   :  { %2345 = vmatpush.msrb.mxu0 %v2817_v22  ;;  %2868 = vmatpush.msrb.mxu3 %v2817_v22 }
 0x3a3   :  { %v2201_v10 = vpop.f32.mrf.mxu2 }
 0x3a4   :  { %2346 = vmatpush.msrb.mxu0 %v2816_v9  ;;  %2869 = vmatpush.msrb.mxu3 %v2816_v9  ;;  %v2125_v54 = vpop.f32.mrf.mxu1 }
 0x3a8   :  { %v1967_v20 = vpop.f32.mrf.mxu3 }
 0x3a9   :  { %v5173_v17 = vadd.f32 %v1967_v20, %v5122_v60  ;;  %v2815_v60 = vld [vmem:[%s5259_s5 + $0xa0] sm:$0xff] }
 0x3aa   :  { %2347 = vmatpush.msrb.mxu0 %v2815_v60  ;;  %2870 = vmatpush.msrb.mxu3 %v2815_v60 }
 0x3ab   :  { %v2204_v53 = vpop.f32.mrf.mxu2 }
 0x3ac   :  { %2348 = vmatpush.msrb.mxu0 %v2814_v59  ;;  %2871 = vmatpush.msrb.mxu3 %v2814_v59  ;;  %v2128_v25 = vpop.f32.mrf.mxu1 }
 0x3ae   :  { %2349 = vmatpush.msrb.mxu0 %v2813_v49  ;;  %2872 = vmatpush.msrb.mxu3 %v2813_v49 }
 0x3b0   :  { %v1970_v7 = vpop.f32.mrf.mxu3  ;;  %2350 = vmatpush.msrb.mxu0 %v2812_v56  ;;  %2873 = vmatpush.msrb.mxu3 %v2812_v56 }
 0x3b1   :  { %v5179_v21 = vadd.f32 %v1970_v7, %v5125_v35  ;;  %v2037_v35 = vpop.f32.mrf.mxu0 }
 0x3b2   :  { %2351 = vmatpush.msrb.mxu0 %v2811_v30  ;;  %2874 = vmatpush.msrb.mxu3 %v2811_v30  ;;  %v2064_v23 = vadd.f32 %v2037_v35, %v5150_v32 }
 0x3b3   :  { %v2207_v52 = vpop.f32.mrf.mxu2 }
 0x3b4   :  { %v2131_v59 = vpop.f32.mrf.mxu1 }
 0x3b8   :  { %v1973_v13 = vpop.f32.mrf.mxu3 }
 0x3b9   :  { %v5188_v55 = vadd.f32 %v1973_v13, %v5128_v28  ;;  %v2040_v28 = vpop.f32.mrf.mxu0 }
 0x3ba   :  { %v2065_v6 = vadd.f32 %v2040_v28, %v1986_v1 }
 0x3bb   :  { %v2210_v56 = vpop.f32.mrf.mxu2 }
 0x3bc   :  { %v2144_v48 = vadd.f32 %v2119_v38, %v2065_v6  ;;  %v2134_v28 = vpop.f32.mrf.mxu1 }
 0x3be   :  { %v2223_v37 = vadd.f32 %v2198_v33, %v2144_v48 }
 0x3c0   :  { %v1976_v18 = vpop.f32.mrf.mxu3 }
 0x3c1   :  { %v5203_v31 = vadd.f32 %v1976_v18, %v5131_v63  ;;  %v2043_v4 = vpop.f32.mrf.mxu0  ;;  %v2143_v63 = vadd.f32 %v2116_v51, %v2064_v23 }
 0x3c2   :  { %v2066_v11 = vadd.f32 %v2043_v4, %v1987_v15 }
 0x3c3   :  { %v2222_v26 = vadd.f32 %v2195_v12, %v2143_v63  ;;  %v2213_v33 = vpop.f32.mrf.mxu2 }
 0x3c4   :  { %v2145_v32 = vadd.f32 %v2122_v39, %v2066_v11 }
 0x3c6   :  { %v2224_v43 = vadd.f32 %v2201_v10, %v2145_v32 }
 0x3c8   :  { %v1979_v27 = vpop.f32.mrf.mxu3 }
 0x3c9   :  { %v5206_v50 = vadd.f32 %v1979_v27, %v5134_v2  ;;  %v2046_v2 = vpop.f32.mrf.mxu0 }
 0x3ca   :  { %v2067_v62 = vadd.f32 %v2046_v2, %v5173_v17 }
 0x3cb   :  { %v2216_v48 = vpop.f32.mrf.mxu2 }
 0x3cc   :  { %v2146_v61 = vadd.f32 %v2125_v54, %v2067_v62 }
 0x3ce   :  { %v2225_v20 = vadd.f32 %v2204_v53, %v2146_v61 }
 0x3d0   :  { %v1982_v34 = vpop.f32.mrf.mxu3 }
 0x3d1   :  { %v5210_v19 = vadd.f32 %v1982_v34, %v5140_v45  ;;  %v2049_v3 = vpop.f32.mrf.mxu0 }
 0x3d2   :  { %v2068_v15 = vadd.f32 %v2049_v3, %v5179_v21 }
 0x3d3   :  { %v2219_v32 = vpop.f32.mrf.mxu2 }
 0x3d4   :  { %v2147_v60 = vadd.f32 %v2128_v25, %v2068_v15 }
 0x3d6   :  { %v2226_v49 = vadd.f32 %v2207_v52, %v2147_v60 }
 0x3d8   :  { %v2274_v41 = vpop.f32.mrf.mxu3 }
 0x3d9   :  { %v2301_v46 = vadd.f32 %v2274_v41, %v2222_v26  ;;  %v2052_v22 = vpop.f32.mrf.mxu0  ;;  %v2137_v26 = vpop.f32.mrf.mxu1 }
 0x3da   :  { %v2069_v17 = vadd.f32 %v2052_v22, %v5188_v55 }
 0x3db   :  { %v2310_v8 = vmax.f32 %v2301_v46, 0.0 }
 0x3dc   :  { %v2148_v51 = vadd.f32 %v2131_v59, %v2069_v17 }
 0x3dd   :  { %2352 = vmatmul.f32.vlgmr.msrb.gmra.mxu0 %v2310_v8 }
 0x3de   :  { %v2227_v27 = vadd.f32 %v2210_v56, %v2148_v51 }
 0x3e0   :  { %v2277_v36 = vpop.f32.mrf.mxu3 }
 0x3e1   :  { %v2302_v14 = vadd.f32 %v2277_v36, %v2223_v37  ;;  %v2055_v18 = vpop.f32.mrf.mxu0  ;;  %v2140_v54 = vpop.f32.mrf.mxu1 }
 0x3e2   :  { %v2070_v21 = vadd.f32 %v2055_v18, %v5203_v31 }
 0x3e3   :  { %v2311_v45 = vmax.f32 %v2302_v14, 0.0 }
 0x3e4   :  { %v2149_v34 = vadd.f32 %v2134_v28, %v2070_v21 }
 0x3e5   :  { %2355 = vmatmul.f32.gmra.mxu0 %v2311_v45 }
 0x3e6   :  { %v2228_v39 = vadd.f32 %v2213_v33, %v2149_v34 }
 0x3e8   :  { %v2280_v1 = vpop.f32.mrf.mxu3 }
 0x3e9   :  { %v2303_v0 = vadd.f32 %v2280_v1, %v2224_v43  ;;  %v2058_v63 = vpop.f32.mrf.mxu0 }
 0x3ea   :  { %v2071_v55 = vadd.f32 %v2058_v63, %v5206_v50 }
 0x3eb   :  { %v2312_v40 = vmax.f32 %v2303_v0, 0.0 }
 0x3ec   :  { %v2150_v46 = vadd.f32 %v2137_v26, %v2071_v55 }
 0x3ed   :  { %2358 = vmatmul.f32.gmra.mxu0 %v2312_v40 }
 0x3ee   :  { %v2229_v2 = vadd.f32 %v2216_v48, %v2150_v46 }
 0x3f0   :  { %v2283_v7 = vpop.f32.mrf.mxu3 }
 0x3f1   :  { %v2304_v9 = vadd.f32 %v2283_v7, %v2225_v20  ;;  %v2061_v8 = vpop.f32.mrf.mxu0 }
 0x3f2   :  { %v2072_v31 = vadd.f32 %v2061_v8, %v5210_v19 }
 0x3f3   :  { %v2313_v13 = vmax.f32 %v2304_v9, 0.0 }
 0x3f4   :  { %v2151_v36 = vadd.f32 %v2140_v54, %v2072_v31 }
 0x3f5   :  { %2361 = vmatmul.f32.gmra.mxu0 %v2313_v13 }
 0x3f6   :  { %v2230_v45 = vadd.f32 %v2219_v32, %v2151_v36 }
 0x3f8   :  { %v2286_v35 = vpop.f32.mrf.mxu3 }
 0x3f9   :  { %v2305_v30 = vadd.f32 %v2286_v35, %v2226_v49 }
 0x3fb   :  { %v2314_v12 = vmax.f32 %v2305_v30, 0.0 }
 0x3fd   :  { %2364 = vmatmul.f32.gmra.mxu0 %v2314_v12 }
 0x400   :  { %v2289_v38 = vpop.f32.mrf.mxu3 }
 0x401   :  { %v2306_v23 = vadd.f32 %v2289_v38, %v2227_v27 }
 0x403   :  { %v2315_v4 = vmax.f32 %v2306_v23, 0.0 }
 0x405   :  { %2367 = vmatmul.f32.gmra.mxu0 %v2315_v4 }
 0x408   :  { %v2292_v6 = vpop.f32.mrf.mxu3 }
 0x409   :  { %v2307_v41 = vadd.f32 %v2292_v6, %v2228_v39 }
 0x40b   :  { %v2316_v10 = vmax.f32 %v2307_v41, 0.0 }
 0x40d   :  { %2370 = vmatmul.f32.gmra.mxu0 %v2316_v10 }
 0x410   :  { %v2295_v37 = vpop.f32.mrf.mxu3 }
 0x411   :  { %v2308_v11 = vadd.f32 %v2295_v37, %v2229_v2 }
 0x413   :  { %v2317_v14 = vmax.f32 %v2308_v11, 0.0 }
 0x415   :  { %2373 = vmatmul.f32.gmra.mxu0 %v2317_v14 }
 0x418   :  { %v2298_v50 = vpop.f32.mrf.mxu3 }
 0x419   :  { %v2309_v53 = vadd.f32 %v2298_v50, %v2230_v45 }
 0x41b   :  { %v2318_v3 = vmax.f32 %v2309_v53, 0.0 }
 0x41d   :  { %2376 = vmatmul.f32.vlgmr.msrb.gmra.mxu3 %v2318_v3 }
 0x45a   :  { %v2353_v43 = vpop.f32.mrf.mxu0 }
 0x45b   :  { %v2380_v62 = vadd.f32 %v2353_v43, %v4750_v44 }
 0x45d   :  { %v2389_v1 = vmax.f32 %v2380_v62, 0.0 }
 0x45f   :  { %2398 = vst [vmem:[%s5260_s6] sm:$0xff] %v2389_v1 }
 0x462   :  { %v2356_v19 = vpop.f32.mrf.mxu0 }
 0x463   :  { %v2381_v0 = vadd.f32 %v2356_v19, %v4764_v5 }
 0x465   :  { %v2390_v25 = vmax.f32 %v2381_v0, 0.0 }
 0x467   :  { %2399 = vst [vmem:[%s5260_s6 + $0x8] sm:$0xff] %v2390_v25 }
 0x46a   :  { %v2359_v61 = vpop.f32.mrf.mxu0 }
 0x46b   :  { %v2382_v40 = vadd.f32 %v2359_v61, %v4778_v58 }
 0x46d   :  { %v2391_v52 = vmax.f32 %v2382_v40, 0.0 }
 0x46f   :  { %2400 = vst [vmem:[%s5260_s6 + $0x10] sm:$0xff] %v2391_v52 }
 0x472   :  { %v2362_v44 = vpop.f32.mrf.mxu0 }
 0x473   :  { %v2383_v20 = vadd.f32 %v2362_v44, %v4795_v47 }
 0x475   :  { %v2392_v15 = vmax.f32 %v2383_v20, 0.0 }
 0x477   :  { %2401 = vst [vmem:[%s5260_s6 + $0x18] sm:$0xff] %v2392_v15 }
 0x47a   :  { %v2365_v5 = vpop.f32.mrf.mxu0 }
 0x47b   :  { %v2384_v22 = vadd.f32 %v2365_v5, %v4824_v42 }
 0x47d   :  { %v2393_v7 = vmax.f32 %v2384_v22, 0.0 }
 0x47f   :  { %2402 = vst [vmem:[%s5260_s6 + $0x20] sm:$0xff] %v2393_v7 }
 0x482   :  { %v2368_v58 = vpop.f32.mrf.mxu0 }
 0x483   :  { %v2385_v9 = vadd.f32 %v2368_v58, %v4874_v29 }
 0x485   :  { %v2394_v60 = vmax.f32 %v2385_v9, 0.0 }
 0x487   :  { %2403 = vst [vmem:[%s5260_s6 + $0x28] sm:$0xff] %v2394_v60 }
 0x48a   :  { %v2371_v47 = vpop.f32.mrf.mxu0 }
 0x48b   :  { %v2386_v13 = vadd.f32 %v2371_v47, %v4924_v57 }
 0x48d   :  { %v2395_v59 = vmax.f32 %v2386_v13, 0.0 }
 0x48f   :  { %2404 = vst [vmem:[%s5260_s6 + $0x30] sm:$0xff] %v2395_v59 }
 0x492   :  { %v2374_v42 = vpop.f32.mrf.mxu0 }
 0x493   :  { %v2387_v49 = vadd.f32 %v2374_v42, %v4971_v24 }
 0x495   :  { %v2396_v17 = vmax.f32 %v2387_v49, 0.0 }
 0x497   :  { %2405 = vst [vmem:[%s5260_s6 + $0x38] sm:$0xff] %v2396_v17 }
 0x4a0   :  { %v2377_v29 = vpop.f32.mrf.mxu3 }
 0x4a1   :  { %v2388_v56 = vadd.f32 %v2377_v29, %v5018_v16 }
 0x4a3   :  { %v2397_v35 = vmax.f32 %v2388_v56, 0.0 }
 0x4a5   :  { %2406 = vst [vmem:[%s5260_s6 + $0x40] sm:$0xff] %v2397_v35 }

</bundles_post_ra>
